<compile_context>
chip_gen: v7x
topology: tpu7x:2x2x1
jax: 0.10.0
libtpu: 0.0.40
codegen_flags: <defaults>
</compile_context>

<pallas_src>
import jax
import jax.numpy as jnp
from jax.experimental import pallas as pl
from jax.experimental.pallas import tpu as pltpu


def _round_up(x, m):
    return (x + m - 1) // m * m


# ----------------------------------------------------------------------------
# Fused residual-block kernel (built per static config: B, Cin, Cout, L, flags)
# ----------------------------------------------------------------------------
def _make_block_kernel(B, Cin, Cout, L, first, downsample, eps=1e-5, slope=0.3):
    L3 = L // 3
    L3p = _round_up(L3, 128)          # lane-dense (padded) per-batch output width
    BL = B * L
    f32 = jnp.float32

    def kernel(*refs):
        it = iter(refs)
        x_ref = next(it)                                   # (Cin, B*L)
        ml_ref = next(it)                                  # (1, B*L) f32 {0,1}: 0 at per-batch left edge
        mr_ref = next(it)                                  # (1, B*L) f32 {0,1}: 0 at per-batch right edge
        if not first:
            g1_ref, b1_ref = next(it), next(it)            # (Cin, 1)
        w1k = (next(it), next(it), next(it))               # 3 x (Cout, Cin)   per-tap conv1 weights
        c1b_ref = next(it)                                 # (Cout, 1)
        g2_ref, b2_ref = next(it), next(it)                # (Cout, 1)
        w2k = (next(it), next(it), next(it))               # 3 x (Cout, Cout)  per-tap conv2 weights
        c2b_ref = next(it)                                 # (Cout, 1)
        if downsample:
            wd_ref, bd_ref = next(it), next(it)            # (Cout, Cin), (Cout, 1)
        fw_ref, fb_ref = next(it), next(it)                # (Cout, Cout), (Cout, 1)
        sel_ref = next(it)                                 # (L, L3p) 0/1 stride-3 selection, 0-padded cols
        o_ref = next(it)                                   # (Cout, B*L3p)

        xv = x_ref[...]                                    # (Cin, B*L)
        mlv = ml_ref[...]
        mrv = mr_ref[...]

        def lrelu(v):
            return jnp.maximum(v, slope * v)

        def bnorm(v, g, b_):
            # training-mode BatchNorm1d: per-channel stats over (N, L) == the lane axis here.
            mean = jnp.mean(v, axis=1, keepdims=True)
            var = jnp.mean((v - mean) ** 2, axis=1, keepdims=True)
            return (v - mean) * jax.lax.rsqrt(var + eps) * g + b_

        def conv3(v, wk, b_ref2):
            # Conv1d(K=3, pad=1): three accumulating MXU dots (no im2col concat).
            t0 = pltpu.roll(v, 1, axis=1) * mlv            # x[l-1], zeroed at per-batch left edges
            t2 = pltpu.roll(v, BL - 1, axis=1) * mrv       # x[l+1], zeroed at per-batch right edges
            acc = jnp.dot(wk[0][...], t0, preferred_element_type=f32)
            acc = acc + jnp.dot(wk[1][...], v, preferred_element_type=f32)
            acc = acc + jnp.dot(wk[2][...], t2, preferred_element_type=f32)
            return acc + b_ref2[...]

        out = xv if first else lrelu(bnorm(xv, g1_ref[...], b1_ref[...]))
        out = lrelu(bnorm(conv3(out, w1k, c1b_ref), g2_ref[...], b2_ref[...]))
        out = conv3(out, w2k, c2b_ref)

        if downsample:
            identity = jnp.dot(wd_ref[...], xv, preferred_element_type=f32) + bd_ref[...]
        else:
            identity = xv
        res = out + identity                               # (Cout, B*L)

        # --- MaxPool1d(3): rolled-window max (VPU/XLU), then per-batch stride-3 selection (MXU).
        # Selected columns are i = 3*j with 3*j+2 <= L-1, so the wrap-around of the global rolls
        # across batch boundaries is never selected.
        win = jnp.maximum(res, jnp.maximum(pltpu.roll(res, BL - 1, axis=1),
                                           pltpu.roll(res, BL - 2, axis=1)))
        sel = sel_ref[...]                                 # (L, L3p)
        inv_L3 = 1.0 / L3
        for b in range(B):                                 # tiny static batch loop
            win_b = win[:, b * L:(b + 1) * L]              # lane-aligned static slice (L % 128 == 0)
            pooled_b = jnp.dot(win_b, sel, preferred_element_type=f32)   # (Cout, L3p), 0-padded cols
            # FRM gate: adaptive_avg_pool1d -> Linear -> sigmoid (padded columns are zero)
            avg_b = jnp.sum(pooled_b, axis=1, keepdims=True) * inv_L3    # (Cout, 1)
            y_b = jax.nn.sigmoid(
                jnp.dot(fw_ref[...], avg_b, preferred_element_type=f32) + fb_ref[...])  # (Cout, 1)
            # FRM apply + lane-dense store of the whole padded per-batch slab.
            o_ref[:, b * L3p:(b + 1) * L3p] = pooled_b * y_b + y_b

    return kernel


# ----------------------------------------------------------------------------
# Wrapper: one fused pallas_call per block, channels-major (C, B*L) layout kept across blocks
# ----------------------------------------------------------------------------
def residual_block_wfrm_flat(x_flat, params, first, B, L):
    """x_flat: (Cin, B*L) f32  ->  (out_flat (Cout, B*L3p) f32, L3).
    Valid output columns per batch b are [b*L3p, b*L3p + L3); the rest are lane padding."""
    Cin = x_flat.shape[0]
    assert x_flat.shape == (Cin, B * L)
    assert L % 128 == 0, "per-batch lane slices inside the kernel require L % 128 == 0"
    Cout = params['conv1_w'].shape[0]
    downsample = Cin != Cout
    L3 = L // 3
    L3p = _round_up(L3, 128)

    w1 = params['conv1_w']                       # (Cout, Cin, 3)
    w2 = params['conv2_w']                       # (Cout, Cout, 3)

    # per-batch conv edge masks (f32 {0,1} multipliers), precomputed once
    pos = jnp.arange(B * L, dtype=jnp.int32) % L
    not_left = (pos != 0).astype(jnp.float32).reshape(1, B * L)
    not_right = (pos != L - 1).astype(jnp.float32).reshape(1, B * L)

    # shared stride-3 selection matrix, zero-padded to L3p lanes
    row = jnp.arange(L, dtype=jnp.int32)[:, None]
    col = jnp.arange(L3p, dtype=jnp.int32)[None, :]
    sel = jnp.logical_and(row == 3 * col, col < L3).astype(jnp.float32)   # (L, L3p)

    inputs = [x_flat, not_left, not_right]
    if not first:
        inputs += [params['bn1_g'].reshape(Cin, 1), params['bn1_b'].reshape(Cin, 1)]
    inputs += [w1[:, :, 0], w1[:, :, 1], w1[:, :, 2], params['conv1_b'].reshape(Cout, 1),
               params['bn2_g'].reshape(Cout, 1), params['bn2_b'].reshape(Cout, 1),
               w2[:, :, 0], w2[:, :, 1], w2[:, :, 2], params['conv2_b'].reshape(Cout, 1)]
    if downsample:
        inputs += [params['convd_w'].reshape(Cout, Cin), params['convd_b'].reshape(Cout, 1)]
    inputs += [params['frm_w'], params['frm_b'].reshape(Cout, 1), sel]

    kernel = _make_block_kernel(B, Cin, Cout, L, first, downsample)
    out = pl.pallas_call(
        kernel,
        out_shape=jax.ShapeDtypeStruct((Cout, B * L3p), jnp.float32),
        in_specs=[pl.BlockSpec(memory_space=pltpu.MemorySpace.VMEM)] * len(inputs),
        out_specs=pl.BlockSpec(memory_space=pltpu.MemorySpace.VMEM),
    )(*inputs)
    return out, L3


def flat_to_bcl(out_flat, B, L3):
    """(Cout, B*L3p) lane-padded flat layout -> (B, Cout, L3)."""
    Cout = out_flat.shape[0]
    L3p = out_flat.shape[1] // B
    return jnp.transpose(out_flat.reshape(Cout, B, L3p)[:, :, :L3], (1, 0, 2))


@jax.jit
def forward(x, p1, p2):
    """Two chained residual blocks; internal (C, B*L) layout kept between them."""
    B, Cin, L = x.shape
    x_flat = jnp.transpose(x, (1, 0, 2)).reshape(Cin, B * L)     # one transpose at chain entry
    h_flat, L3_1 = residual_block_wfrm_flat(x_flat, p1, first=True, B=B, L=L)
    assert L3_1 % 128 == 0, "chaining requires the intermediate pooled length to be lane-dense"
    o_flat, L3_2 = residual_block_wfrm_flat(h_flat, p2, first=False, B=B, L=L3_1)
    return flat_to_bcl(h_flat, B, L3_1), flat_to_bcl(o_flat, B, L3_2)


# ----------------------------------------------------------------------------
# Deterministic parameters + plain-JAX reference of the PyTorch forward
# ----------------------------------------------------------------------------
def init_block_params(key, cin, cout, first=False):
    ks = jax.random.split(key, 8)
    p = {
        'conv1_w': 0.1 * jax.random.normal(ks[0], (cout, cin, 3), jnp.float32),
        'conv1_b': 0.01 * jax.random.normal(ks[1], (cout,), jnp.float32),
        'bn2_g': jnp.ones((cout,), jnp.float32),
        'bn2_b': jnp.zeros((cout,), jnp.float32),
        'conv2_w': 0.1 * jax.random.normal(ks[2], (cout, cout, 3), jnp.float32),
        'conv2_b': 0.01 * jax.random.normal(ks[3], (cout,), jnp.float32),
        'frm_w': 0.1 * jax.random.normal(ks[4], (cout, cout), jnp.float32),
        'frm_b': 0.01 * jax.random.normal(ks[5], (cout,), jnp.float32),
    }
    if not first:
        p['bn1_g'] = jnp.ones((cin,), jnp.float32)
        p['bn1_b'] = jnp.zeros((cin,), jnp.float32)
    if cin != cout:
        p['convd_w'] = 0.1 * jax.random.normal(ks[6], (cout, cin, 1), jnp.float32)
        p['convd_b'] = 0.01 * jax.random.normal(ks[7], (cout,), jnp.float32)
    return p


def ref_block(x, params, first):
    B, Cin, L = x.shape
    Cout = params['conv1_w'].shape[0]
    hp = jax.lax.Precision.HIGHEST

    def bnorm(v, g, b):
        mean = jnp.mean(v, axis=(0, 2), keepdims=True)
        var = jnp.mean((v - mean) ** 2, axis=(0, 2), keepdims=True)
        return (v - mean) / jnp.sqrt(var + 1e-5) * g.reshape(1, -1, 1) + b.reshape(1, -1, 1)

    def lrelu(v):
        return jnp.where(v >= 0, v, 0.3 * v)

    def conv3(v, w, b):
        vp = jnp.pad(v, ((0, 0), (0, 0), (1, 1)))
        cols = jnp.stack([vp[:, :, k:k + v.shape[2]] for k in range(3)], axis=2)   # (B,C,3,L)
        return jnp.einsum('ock,nckl->nol', w, cols, precision=hp) + b.reshape(1, -1, 1)

    out = x if first else lrelu(bnorm(x, params['bn1_g'], params['bn1_b']))
    out = lrelu(bnorm(conv3(out, params['conv1_w'], params['conv1_b']),
                      params['bn2_g'], params['bn2_b']))
    out = conv3(out, params['conv2_w'], params['conv2_b'])
    identity = x
    if Cin != Cout:
        identity = (jnp.einsum('oc,ncl->nol', params['convd_w'][:, :, 0], x, precision=hp)
                    + params['convd_b'].reshape(1, -1, 1))
    out = out + identity
    L3 = out.shape[-1] // 3
    out = out[:, :, :3 * L3].reshape(B, Cout, L3, 3).max(axis=-1)
    y = jax.nn.sigmoid(jnp.mean(out, axis=-1) @ params['frm_w'].T + params['frm_b'])
    y = y[:, :, None]
    return out * y + y


# ----------------------------------------------------------------------------
if __name__ == "__main__":
    key = jax.random.PRNGKey(0)
    kx, k1, k2 = jax.random.split(key, 3)
    B, L = 2, 384                          # block outputs: length 128, then 42 (= floor(128/3))
    x = jax.random.normal(kx, (B, 16, L), dtype=jnp.float32)

    p1 = init_block_params(k1, 16, 32, first=True)    # first block: no bn1, with downsample conv
    p2 = init_block_params(k2, 32, 32, first=False)   # later block: bn1 path, no downsample

    out1, out2 = forward(x, p1, p2)
    out2 = jax.block_until_ready(out2)

    assert out1.shape == (B, 32, L // 3), out1.shape
    assert out2.shape == (B, 32, (L // 3) // 3), out2.shape
    assert bool(jnp.all(jnp.isfinite(out1)))
    assert bool(jnp.all(jnp.isfinite(out2)))

    # Numerical check against a plain-JAX reference of the PyTorch forward (loose tolerance:
    # the in-kernel f32 MXU dots may use fewer bf16 passes than Precision.HIGHEST).
    r1 = ref_block(x, p1, True)
    r2 = ref_block(r1, p2, False)
    err1 = float(jnp.max(jnp.abs(out1 - r1)))
    err2 = float(jnp.max(jnp.abs(out2 - r2)))
    assert err1 < 5e-2, f"block1 max abs err vs reference: {err1}"
    assert err2 < 5e-2, f"block2 max abs err vs reference: {err2}"

    print("KERNEL_OK")
</pallas_src>

<mosaic_0001>
module attributes {stable_mosaic.version = 11 : i64} {
  func.func @kernel(%arg0: memref<16x768xf32, #tpu.memory_space<vmem>>, %arg1: memref<1x768xf32, #tpu.memory_space<vmem>>, %arg2: memref<1x768xf32, #tpu.memory_space<vmem>>, %arg3: memref<32x16xf32, #tpu.memory_space<vmem>>, %arg4: memref<32x16xf32, #tpu.memory_space<vmem>>, %arg5: memref<32x16xf32, #tpu.memory_space<vmem>>, %arg6: memref<32x1xf32, #tpu.memory_space<vmem>>, %arg7: memref<32x1xf32, #tpu.memory_space<vmem>>, %arg8: memref<32x1xf32, #tpu.memory_space<vmem>>, %arg9: memref<32x32xf32, #tpu.memory_space<vmem>>, %arg10: memref<32x32xf32, #tpu.memory_space<vmem>>, %arg11: memref<32x32xf32, #tpu.memory_space<vmem>>, %arg12: memref<32x1xf32, #tpu.memory_space<vmem>>, %arg13: memref<32x16xf32, #tpu.memory_space<vmem>>, %arg14: memref<32x1xf32, #tpu.memory_space<vmem>>, %arg15: memref<32x32xf32, #tpu.memory_space<vmem>>, %arg16: memref<32x1xf32, #tpu.memory_space<vmem>>, %arg17: memref<384x128xf32, #tpu.memory_space<vmem>>, %arg18: memref<32x256xf32, #tpu.memory_space<vmem>>) attributes {dimension_semantics = [], scalar_prefetch = 0 : i64, scratch_operands = 0 : i64, tpu.core_type = #tpu.core_type<tc>} {
    %c0 = arith.constant 0 : index
    %c0_0 = arith.constant 0 : index
    %0 = vector.load %arg0[%c0, %c0_0] : memref<16x768xf32, #tpu.memory_space<vmem>>, vector<16x768xf32>
    %c0_1 = arith.constant 0 : index
    %c0_2 = arith.constant 0 : index
    %1 = vector.load %arg1[%c0_1, %c0_2] : memref<1x768xf32, #tpu.memory_space<vmem>>, vector<1x768xf32>
    %c0_3 = arith.constant 0 : index
    %c0_4 = arith.constant 0 : index
    %2 = vector.load %arg2[%c0_3, %c0_4] : memref<1x768xf32, #tpu.memory_space<vmem>>, vector<1x768xf32>
    %c1_i32 = arith.constant 1 : i32
    %3 = tpu.dynamic_rotate %0 by %c1_i32 dim 1 : vector<16x768xf32>, i32 -> vector<16x768xf32>
    %4 = vector.broadcast %1 : vector<1x768xf32> to vector<16x768xf32>
    %5 = arith.mulf %3, %4 : vector<16x768xf32>
    %c767_i32 = arith.constant 767 : i32
    %6 = tpu.dynamic_rotate %0 by %c767_i32 dim 1 : vector<16x768xf32>, i32 -> vector<16x768xf32>
    %7 = vector.broadcast %2 : vector<1x768xf32> to vector<16x768xf32>
    %8 = arith.mulf %6, %7 : vector<16x768xf32>
    %c0_5 = arith.constant 0 : index
    %c0_6 = arith.constant 0 : index
    %9 = vector.load %arg3[%c0_5, %c0_6] : memref<32x16xf32, #tpu.memory_space<vmem>>, vector<32x16xf32>
    %cst = arith.constant dense<0.000000e+00> : vector<32x768xf32>
    %10 = tpu.matmul %9, %5, %cst {dimension_numbers = #tpu.dot_dimension_numbers<[1], [0], [0], [1], [0, 0, 1, 1], [], []>} : vector<32x16xf32>, vector<16x768xf32>, vector<32x768xf32> -> vector<32x768xf32>
    %c0_7 = arith.constant 0 : index
    %c0_8 = arith.constant 0 : index
    %11 = vector.load %arg4[%c0_7, %c0_8] : memref<32x16xf32, #tpu.memory_space<vmem>>, vector<32x16xf32>
    %cst_9 = arith.constant dense<0.000000e+00> : vector<32x768xf32>
    %12 = tpu.matmul %11, %0, %cst_9 {dimension_numbers = #tpu.dot_dimension_numbers<[1], [0], [0], [1], [0, 0, 1, 1], [], []>} : vector<32x16xf32>, vector<16x768xf32>, vector<32x768xf32> -> vector<32x768xf32>
    %13 = arith.addf %10, %12 : vector<32x768xf32>
    %c0_10 = arith.constant 0 : index
    %c0_11 = arith.constant 0 : index
    %14 = vector.load %arg5[%c0_10, %c0_11] : memref<32x16xf32, #tpu.memory_space<vmem>>, vector<32x16xf32>
    %cst_12 = arith.constant dense<0.000000e+00> : vector<32x768xf32>
    %15 = tpu.matmul %14, %8, %cst_12 {dimension_numbers = #tpu.dot_dimension_numbers<[1], [0], [0], [1], [0, 0, 1, 1], [], []>} : vector<32x16xf32>, vector<16x768xf32>, vector<32x768xf32> -> vector<32x768xf32>
    %16 = arith.addf %13, %15 : vector<32x768xf32>
    %c0_13 = arith.constant 0 : index
    %c0_14 = arith.constant 0 : index
    %17 = vector.load %arg6[%c0_13, %c0_14] : memref<32x1xf32, #tpu.memory_space<vmem>>, vector<32x1xf32>
    %18 = vector.broadcast %17 : vector<32x1xf32> to vector<32x768xf32>
    %19 = arith.addf %16, %18 : vector<32x768xf32>
    %c0_15 = arith.constant 0 : index
    %c0_16 = arith.constant 0 : index
    %20 = vector.load %arg7[%c0_15, %c0_16] : memref<32x1xf32, #tpu.memory_space<vmem>>, vector<32x1xf32>
    %c0_17 = arith.constant 0 : index
    %c0_18 = arith.constant 0 : index
    %21 = vector.load %arg8[%c0_17, %c0_18] : memref<32x1xf32, #tpu.memory_space<vmem>>, vector<32x1xf32>
    %cst_19 = arith.constant dense<0.000000e+00> : vector<32xf32>
    %22 = vector.multi_reduction <add>, %19, %cst_19 [1] : vector<32x768xf32> to vector<32xf32>
    %23 = vector.shape_cast %22 : vector<32xf32> to vector<32x1xf32>
    %cst_20 = arith.constant 7.680000e+02 : f32
    %24 = vector.broadcast %cst_20 : f32 to vector<32x1xf32>
    %25 = arith.divf %23, %24 : vector<32x1xf32>
    %26 = vector.broadcast %25 : vector<32x1xf32> to vector<32x768xf32>
    %27 = arith.subf %19, %26 : vector<32x768xf32>
    %28 = arith.mulf %27, %27 : vector<32x768xf32>
    %cst_21 = arith.constant dense<0.000000e+00> : vector<32xf32>
    %29 = vector.multi_reduction <add>, %28, %cst_21 [1] : vector<32x768xf32> to vector<32xf32>
    %30 = vector.shape_cast %29 : vector<32xf32> to vector<32x1xf32>
    %cst_22 = arith.constant 7.680000e+02 : f32
    %31 = vector.broadcast %cst_22 : f32 to vector<32x1xf32>
    %32 = arith.divf %30, %31 : vector<32x1xf32>
    %33 = vector.broadcast %25 : vector<32x1xf32> to vector<32x768xf32>
    %34 = arith.subf %19, %33 : vector<32x768xf32>
    %cst_23 = arith.constant 9.99999974E-6 : f32
    %35 = vector.broadcast %cst_23 : f32 to vector<32x1xf32>
    %36 = arith.addf %32, %35 : vector<32x1xf32>
    %37 = math.rsqrt %36 : vector<32x1xf32>
    %38 = vector.broadcast %37 : vector<32x1xf32> to vector<32x768xf32>
    %39 = arith.mulf %34, %38 : vector<32x768xf32>
    %40 = vector.broadcast %20 : vector<32x1xf32> to vector<32x768xf32>
    %41 = arith.mulf %39, %40 : vector<32x768xf32>
    %42 = vector.broadcast %21 : vector<32x1xf32> to vector<32x768xf32>
    %43 = arith.addf %41, %42 : vector<32x768xf32>
    %cst_24 = arith.constant 3.000000e-01 : f32
    %44 = vector.broadcast %cst_24 : f32 to vector<32x768xf32>
    %45 = arith.mulf %44, %43 : vector<32x768xf32>
    %46 = arith.maximumf %43, %45 : vector<32x768xf32>
    %c1_i32_25 = arith.constant 1 : i32
    %47 = tpu.dynamic_rotate %46 by %c1_i32_25 dim 1 : vector<32x768xf32>, i32 -> vector<32x768xf32>
    %48 = vector.broadcast %1 : vector<1x768xf32> to vector<32x768xf32>
    %49 = arith.mulf %47, %48 : vector<32x768xf32>
    %c767_i32_26 = arith.constant 767 : i32
    %50 = tpu.dynamic_rotate %46 by %c767_i32_26 dim 1 : vector<32x768xf32>, i32 -> vector<32x768xf32>
    %51 = vector.broadcast %2 : vector<1x768xf32> to vector<32x768xf32>
    %52 = arith.mulf %50, %51 : vector<32x768xf32>
    %c0_27 = arith.constant 0 : index
    %c0_28 = arith.constant 0 : index
    %53 = vector.load %arg9[%c0_27, %c0_28] : memref<32x32xf32, #tpu.memory_space<vmem>>, vector<32x32xf32>
    %cst_29 = arith.constant dense<0.000000e+00> : vector<32x768xf32>
    %54 = tpu.matmul %53, %49, %cst_29 {dimension_numbers = #tpu.dot_dimension_numbers<[1], [0], [0], [1], [0, 0, 1, 1], [], []>} : vector<32x32xf32>, vector<32x768xf32>, vector<32x768xf32> -> vector<32x768xf32>
    %c0_30 = arith.constant 0 : index
    %c0_31 = arith.constant 0 : index
    %55 = vector.load %arg10[%c0_30, %c0_31] : memref<32x32xf32, #tpu.memory_space<vmem>>, vector<32x32xf32>
    %cst_32 = arith.constant dense<0.000000e+00> : vector<32x768xf32>
    %56 = tpu.matmul %55, %46, %cst_32 {dimension_numbers = #tpu.dot_dimension_numbers<[1], [0], [0], [1], [0, 0, 1, 1], [], []>} : vector<32x32xf32>, vector<32x768xf32>, vector<32x768xf32> -> vector<32x768xf32>
    %57 = arith.addf %54, %56 : vector<32x768xf32>
    %c0_33 = arith.constant 0 : index
    %c0_34 = arith.constant 0 : index
    %58 = vector.load %arg11[%c0_33, %c0_34] : memref<32x32xf32, #tpu.memory_space<vmem>>, vector<32x32xf32>
    %cst_35 = arith.constant dense<0.000000e+00> : vector<32x768xf32>
    %59 = tpu.matmul %58, %52, %cst_35 {dimension_numbers = #tpu.dot_dimension_numbers<[1], [0], [0], [1], [0, 0, 1, 1], [], []>} : vector<32x32xf32>, vector<32x768xf32>, vector<32x768xf32> -> vector<32x768xf32>
    %60 = arith.addf %57, %59 : vector<32x768xf32>
    %c0_36 = arith.constant 0 : index
    %c0_37 = arith.constant 0 : index
    %61 = vector.load %arg12[%c0_36, %c0_37] : memref<32x1xf32, #tpu.memory_space<vmem>>, vector<32x1xf32>
    %62 = vector.broadcast %61 : vector<32x1xf32> to vector<32x768xf32>
    %63 = arith.addf %60, %62 : vector<32x768xf32>
    %c0_38 = arith.constant 0 : index
    %c0_39 = arith.constant 0 : index
    %64 = vector.load %arg13[%c0_38, %c0_39] : memref<32x16xf32, #tpu.memory_space<vmem>>, vector<32x16xf32>
    %cst_40 = arith.constant dense<0.000000e+00> : vector<32x768xf32>
    %65 = tpu.matmul %64, %0, %cst_40 {dimension_numbers = #tpu.dot_dimension_numbers<[1], [0], [0], [1], [0, 0, 1, 1], [], []>} : vector<32x16xf32>, vector<16x768xf32>, vector<32x768xf32> -> vector<32x768xf32>
    %c0_41 = arith.constant 0 : index
    %c0_42 = arith.constant 0 : index
    %66 = vector.load %arg14[%c0_41, %c0_42] : memref<32x1xf32, #tpu.memory_space<vmem>>, vector<32x1xf32>
    %67 = vector.broadcast %66 : vector<32x1xf32> to vector<32x768xf32>
    %68 = arith.addf %65, %67 : vector<32x768xf32>
    %69 = arith.addf %63, %68 : vector<32x768xf32>
    %c767_i32_43 = arith.constant 767 : i32
    %70 = tpu.dynamic_rotate %69 by %c767_i32_43 dim 1 : vector<32x768xf32>, i32 -> vector<32x768xf32>
    %c766_i32 = arith.constant 766 : i32
    %71 = tpu.dynamic_rotate %69 by %c766_i32 dim 1 : vector<32x768xf32>, i32 -> vector<32x768xf32>
    %72 = arith.maximumf %70, %71 : vector<32x768xf32>
    %73 = arith.maximumf %69, %72 : vector<32x768xf32>
    %c0_44 = arith.constant 0 : index
    %c0_45 = arith.constant 0 : index
    %74 = vector.load %arg17[%c0_44, %c0_45] : memref<384x128xf32, #tpu.memory_space<vmem>>, vector<384x128xf32>
    %75 = vector.extract_strided_slice %73 {offsets = [0, 0], sizes = [32, 384], strides = [1, 1]} : vector<32x768xf32> to vector<32x384xf32>
    %cst_46 = arith.constant dense<0.000000e+00> : vector<32x128xf32>
    %76 = tpu.matmul %75, %74, %cst_46 {dimension_numbers = #tpu.dot_dimension_numbers<[1], [0], [0], [1], [0, 0, 1, 1], [], []>} : vector<32x384xf32>, vector<384x128xf32>, vector<32x128xf32> -> vector<32x128xf32>
    %cst_47 = arith.constant dense<0.000000e+00> : vector<32xf32>
    %77 = vector.multi_reduction <add>, %76, %cst_47 [1] : vector<32x128xf32> to vector<32xf32>
    %78 = vector.shape_cast %77 : vector<32xf32> to vector<32x1xf32>
    %cst_48 = arith.constant 7.812500e-03 : f32
    %79 = vector.broadcast %cst_48 : f32 to vector<32x1xf32>
    %80 = arith.mulf %78, %79 : vector<32x1xf32>
    %c0_49 = arith.constant 0 : index
    %c0_50 = arith.constant 0 : index
    %81 = vector.load %arg15[%c0_49, %c0_50] : memref<32x32xf32, #tpu.memory_space<vmem>>, vector<32x32xf32>
    %cst_51 = arith.constant dense<0.000000e+00> : vector<32x1xf32>
    %82 = tpu.matmul %81, %80, %cst_51 {dimension_numbers = #tpu.dot_dimension_numbers<[1], [0], [0], [1], [0, 0, 1, 1], [], []>} : vector<32x32xf32>, vector<32x1xf32>, vector<32x1xf32> -> vector<32x1xf32>
    %c0_52 = arith.constant 0 : index
    %c0_53 = arith.constant 0 : index
    %83 = vector.load %arg16[%c0_52, %c0_53] : memref<32x1xf32, #tpu.memory_space<vmem>>, vector<32x1xf32>
    %84 = arith.addf %82, %83 : vector<32x1xf32>
    %85 = arith.negf %84 : vector<32x1xf32>
    %86 = math.exp %85 : vector<32x1xf32>
    %cst_54 = arith.constant 1.000000e+00 : f32
    %87 = vector.broadcast %cst_54 : f32 to vector<32x1xf32>
    %88 = arith.addf %87, %86 : vector<32x1xf32>
    %89 = arith.divf %87, %88 : vector<32x1xf32>
    %90 = vector.broadcast %89 : vector<32x1xf32> to vector<32x128xf32>
    %91 = arith.mulf %76, %90 : vector<32x128xf32>
    %92 = vector.broadcast %89 : vector<32x1xf32> to vector<32x128xf32>
    %93 = arith.addf %91, %92 : vector<32x128xf32>
    %c0_55 = arith.constant 0 : index
    %c0_56 = arith.constant 0 : index
    %94 = vector.load %arg18[%c0_55, %c0_56] : memref<32x256xf32, #tpu.memory_space<vmem>>, vector<32x128xf32>
    tpu.vector_store %arg18[%c0_55, %c0_56], %93 {strides = array<i32>} : memref<32x256xf32, #tpu.memory_space<vmem>>, vector<32x128xf32>,
    %95 = vector.extract_strided_slice %73 {offsets = [0, 384], sizes = [32, 384], strides = [1, 1]} : vector<32x768xf32> to vector<32x384xf32>
    %cst_57 = arith.constant dense<0.000000e+00> : vector<32x128xf32>
    %96 = tpu.matmul %95, %74, %cst_57 {dimension_numbers = #tpu.dot_dimension_numbers<[1], [0], [0], [1], [0, 0, 1, 1], [], []>} : vector<32x384xf32>, vector<384x128xf32>, vector<32x128xf32> -> vector<32x128xf32>
    %cst_58 = arith.constant dense<0.000000e+00> : vector<32xf32>
    %97 = vector.multi_reduction <add>, %96, %cst_58 [1] : vector<32x128xf32> to vector<32xf32>
    %98 = vector.shape_cast %97 : vector<32xf32> to vector<32x1xf32>
    %cst_59 = arith.constant 7.812500e-03 : f32
    %99 = vector.broadcast %cst_59 : f32 to vector<32x1xf32>
    %100 = arith.mulf %98, %99 : vector<32x1xf32>
    %c0_60 = arith.constant 0 : index
    %c0_61 = arith.constant 0 : index
    %101 = vector.load %arg15[%c0_60, %c0_61] : memref<32x32xf32, #tpu.memory_space<vmem>>, vector<32x32xf32>
    %cst_62 = arith.constant dense<0.000000e+00> : vector<32x1xf32>
    %102 = tpu.matmul %101, %100, %cst_62 {dimension_numbers = #tpu.dot_dimension_numbers<[1], [0], [0], [1], [0, 0, 1, 1], [], []>} : vector<32x32xf32>, vector<32x1xf32>, vector<32x1xf32> -> vector<32x1xf32>
    %c0_63 = arith.constant 0 : index
    %c0_64 = arith.constant 0 : index
    %103 = vector.load %arg16[%c0_63, %c0_64] : memref<32x1xf32, #tpu.memory_space<vmem>>, vector<32x1xf32>
    %104 = arith.addf %102, %103 : vector<32x1xf32>
    %105 = arith.negf %104 : vector<32x1xf32>
    %106 = math.exp %105 : vector<32x1xf32>
    %cst_65 = arith.constant 1.000000e+00 : f32
    %107 = vector.broadcast %cst_65 : f32 to vector<32x1xf32>
    %108 = arith.addf %107, %106 : vector<32x1xf32>
    %109 = arith.divf %107, %108 : vector<32x1xf32>
    %110 = vector.broadcast %109 : vector<32x1xf32> to vector<32x128xf32>
    %111 = arith.mulf %96, %110 : vector<32x128xf32>
    %112 = vector.broadcast %109 : vector<32x1xf32> to vector<32x128xf32>
    %113 = arith.addf %111, %112 : vector<32x128xf32>
    %c0_66 = arith.constant 0 : index
    %c128 = arith.constant 128 : index
    %114 = vector.load %arg18[%c0_66, %c128] : memref<32x256xf32, #tpu.memory_space<vmem>>, vector<32x128xf32>
    tpu.vector_store %arg18[%c0_66, %c128], %113 {strides = array<i32>} : memref<32x256xf32, #tpu.memory_space<vmem>>, vector<32x128xf32>,
    return
  }
}

module attributes {stable_mosaic.version = 11 : i64} {
  func.func @kernel(%arg0: memref<32x256xf32, #tpu.memory_space<vmem>>, %arg1: memref<1x256xf32, #tpu.memory_space<vmem>>, %arg2: memref<1x256xf32, #tpu.memory_space<vmem>>, %arg3: memref<32x1xf32, #tpu.memory_space<vmem>>, %arg4: memref<32x1xf32, #tpu.memory_space<vmem>>, %arg5: memref<32x32xf32, #tpu.memory_space<vmem>>, %arg6: memref<32x32xf32, #tpu.memory_space<vmem>>, %arg7: memref<32x32xf32, #tpu.memory_space<vmem>>, %arg8: memref<32x1xf32, #tpu.memory_space<vmem>>, %arg9: memref<32x1xf32, #tpu.memory_space<vmem>>, %arg10: memref<32x1xf32, #tpu.memory_space<vmem>>, %arg11: memref<32x32xf32, #tpu.memory_space<vmem>>, %arg12: memref<32x32xf32, #tpu.memory_space<vmem>>, %arg13: memref<32x32xf32, #tpu.memory_space<vmem>>, %arg14: memref<32x1xf32, #tpu.memory_space<vmem>>, %arg15: memref<32x32xf32, #tpu.memory_space<vmem>>, %arg16: memref<32x1xf32, #tpu.memory_space<vmem>>, %arg17: memref<128x128xf32, #tpu.memory_space<vmem>>, %arg18: memref<32x256xf32, #tpu.memory_space<vmem>>) attributes {dimension_semantics = [], scalar_prefetch = 0 : i64, scratch_operands = 0 : i64, tpu.core_type = #tpu.core_type<tc>} {
    %c0 = arith.constant 0 : index
    %c0_0 = arith.constant 0 : index
    %0 = vector.load %arg0[%c0, %c0_0] : memref<32x256xf32, #tpu.memory_space<vmem>>, vector<32x256xf32>
    %c0_1 = arith.constant 0 : index
    %c0_2 = arith.constant 0 : index
    %1 = vector.load %arg1[%c0_1, %c0_2] : memref<1x256xf32, #tpu.memory_space<vmem>>, vector<1x256xf32>
    %c0_3 = arith.constant 0 : index
    %c0_4 = arith.constant 0 : index
    %2 = vector.load %arg2[%c0_3, %c0_4] : memref<1x256xf32, #tpu.memory_space<vmem>>, vector<1x256xf32>
    %c0_5 = arith.constant 0 : index
    %c0_6 = arith.constant 0 : index
    %3 = vector.load %arg3[%c0_5, %c0_6] : memref<32x1xf32, #tpu.memory_space<vmem>>, vector<32x1xf32>
    %c0_7 = arith.constant 0 : index
    %c0_8 = arith.constant 0 : index
    %4 = vector.load %arg4[%c0_7, %c0_8] : memref<32x1xf32, #tpu.memory_space<vmem>>, vector<32x1xf32>
    %cst = arith.constant dense<0.000000e+00> : vector<32xf32>
    %5 = vector.multi_reduction <add>, %0, %cst [1] : vector<32x256xf32> to vector<32xf32>
    %6 = vector.shape_cast %5 : vector<32xf32> to vector<32x1xf32>
    %cst_9 = arith.constant 2.560000e+02 : f32
    %7 = vector.broadcast %cst_9 : f32 to vector<32x1xf32>
    %8 = arith.divf %6, %7 : vector<32x1xf32>
    %9 = vector.broadcast %8 : vector<32x1xf32> to vector<32x256xf32>
    %10 = arith.subf %0, %9 : vector<32x256xf32>
    %11 = arith.mulf %10, %10 : vector<32x256xf32>
    %cst_10 = arith.constant dense<0.000000e+00> : vector<32xf32>
    %12 = vector.multi_reduction <add>, %11, %cst_10 [1] : vector<32x256xf32> to vector<32xf32>
    %13 = vector.shape_cast %12 : vector<32xf32> to vector<32x1xf32>
    %cst_11 = arith.constant 2.560000e+02 : f32
    %14 = vector.broadcast %cst_11 : f32 to vector<32x1xf32>
    %15 = arith.divf %13, %14 : vector<32x1xf32>
    %16 = vector.broadcast %8 : vector<32x1xf32> to vector<32x256xf32>
    %17 = arith.subf %0, %16 : vector<32x256xf32>
    %cst_12 = arith.constant 9.99999974E-6 : f32
    %18 = vector.broadcast %cst_12 : f32 to vector<32x1xf32>
    %19 = arith.addf %15, %18 : vector<32x1xf32>
    %20 = math.rsqrt %19 : vector<32x1xf32>
    %21 = vector.broadcast %20 : vector<32x1xf32> to vector<32x256xf32>
    %22 = arith.mulf %17, %21 : vector<32x256xf32>
    %23 = vector.broadcast %3 : vector<32x1xf32> to vector<32x256xf32>
    %24 = arith.mulf %22, %23 : vector<32x256xf32>
    %25 = vector.broadcast %4 : vector<32x1xf32> to vector<32x256xf32>
    %26 = arith.addf %24, %25 : vector<32x256xf32>
    %cst_13 = arith.constant 3.000000e-01 : f32
    %27 = vector.broadcast %cst_13 : f32 to vector<32x256xf32>
    %28 = arith.mulf %27, %26 : vector<32x256xf32>
    %29 = arith.maximumf %26, %28 : vector<32x256xf32>
    %c1_i32 = arith.constant 1 : i32
    %30 = tpu.dynamic_rotate %29 by %c1_i32 dim 1 : vector<32x256xf32>, i32 -> vector<32x256xf32>
    %31 = vector.broadcast %1 : vector<1x256xf32> to vector<32x256xf32>
    %32 = arith.mulf %30, %31 : vector<32x256xf32>
    %c255_i32 = arith.constant 255 : i32
    %33 = tpu.dynamic_rotate %29 by %c255_i32 dim 1 : vector<32x256xf32>, i32 -> vector<32x256xf32>
    %34 = vector.broadcast %2 : vector<1x256xf32> to vector<32x256xf32>
    %35 = arith.mulf %33, %34 : vector<32x256xf32>
    %c0_14 = arith.constant 0 : index
    %c0_15 = arith.constant 0 : index
    %36 = vector.load %arg5[%c0_14, %c0_15] : memref<32x32xf32, #tpu.memory_space<vmem>>, vector<32x32xf32>
    %cst_16 = arith.constant dense<0.000000e+00> : vector<32x256xf32>
    %37 = tpu.matmul %36, %32, %cst_16 {dimension_numbers = #tpu.dot_dimension_numbers<[1], [0], [0], [1], [0, 0, 1, 1], [], []>} : vector<32x32xf32>, vector<32x256xf32>, vector<32x256xf32> -> vector<32x256xf32>
    %c0_17 = arith.constant 0 : index
    %c0_18 = arith.constant 0 : index
    %38 = vector.load %arg6[%c0_17, %c0_18] : memref<32x32xf32, #tpu.memory_space<vmem>>, vector<32x32xf32>
    %cst_19 = arith.constant dense<0.000000e+00> : vector<32x256xf32>
    %39 = tpu.matmul %38, %29, %cst_19 {dimension_numbers = #tpu.dot_dimension_numbers<[1], [0], [0], [1], [0, 0, 1, 1], [], []>} : vector<32x32xf32>, vector<32x256xf32>, vector<32x256xf32> -> vector<32x256xf32>
    %40 = arith.addf %37, %39 : vector<32x256xf32>
    %c0_20 = arith.constant 0 : index
    %c0_21 = arith.constant 0 : index
    %41 = vector.load %arg7[%c0_20, %c0_21] : memref<32x32xf32, #tpu.memory_space<vmem>>, vector<32x32xf32>
    %cst_22 = arith.constant dense<0.000000e+00> : vector<32x256xf32>
    %42 = tpu.matmul %41, %35, %cst_22 {dimension_numbers = #tpu.dot_dimension_numbers<[1], [0], [0], [1], [0, 0, 1, 1], [], []>} : vector<32x32xf32>, vector<32x256xf32>, vector<32x256xf32> -> vector<32x256xf32>
    %43 = arith.addf %40, %42 : vector<32x256xf32>
    %c0_23 = arith.constant 0 : index
    %c0_24 = arith.constant 0 : index
    %44 = vector.load %arg8[%c0_23, %c0_24] : memref<32x1xf32, #tpu.memory_space<vmem>>, vector<32x1xf32>
    %45 = vector.broadcast %44 : vector<32x1xf32> to vector<32x256xf32>
    %46 = arith.addf %43, %45 : vector<32x256xf32>
    %c0_25 = arith.constant 0 : index
    %c0_26 = arith.constant 0 : index
    %47 = vector.load %arg9[%c0_25, %c0_26] : memref<32x1xf32, #tpu.memory_space<vmem>>, vector<32x1xf32>
    %c0_27 = arith.constant 0 : index
    %c0_28 = arith.constant 0 : index
    %48 = vector.load %arg10[%c0_27, %c0_28] : memref<32x1xf32, #tpu.memory_space<vmem>>, vector<32x1xf32>
    %cst_29 = arith.constant dense<0.000000e+00> : vector<32xf32>
    %49 = vector.multi_reduction <add>, %46, %cst_29 [1] : vector<32x256xf32> to vector<32xf32>
    %50 = vector.shape_cast %49 : vector<32xf32> to vector<32x1xf32>
    %cst_30 = arith.constant 2.560000e+02 : f32
    %51 = vector.broadcast %cst_30 : f32 to vector<32x1xf32>
    %52 = arith.divf %50, %51 : vector<32x1xf32>
    %53 = vector.broadcast %52 : vector<32x1xf32> to vector<32x256xf32>
    %54 = arith.subf %46, %53 : vector<32x256xf32>
    %55 = arith.mulf %54, %54 : vector<32x256xf32>
    %cst_31 = arith.constant dense<0.000000e+00> : vector<32xf32>
    %56 = vector.multi_reduction <add>, %55, %cst_31 [1] : vector<32x256xf32> to vector<32xf32>
    %57 = vector.shape_cast %56 : vector<32xf32> to vector<32x1xf32>
    %cst_32 = arith.constant 2.560000e+02 : f32
    %58 = vector.broadcast %cst_32 : f32 to vector<32x1xf32>
    %59 = arith.divf %57, %58 : vector<32x1xf32>
    %60 = vector.broadcast %52 : vector<32x1xf32> to vector<32x256xf32>
    %61 = arith.subf %46, %60 : vector<32x256xf32>
    %cst_33 = arith.constant 9.99999974E-6 : f32
    %62 = vector.broadcast %cst_33 : f32 to vector<32x1xf32>
    %63 = arith.addf %59, %62 : vector<32x1xf32>
    %64 = math.rsqrt %63 : vector<32x1xf32>
    %65 = vector.broadcast %64 : vector<32x1xf32> to vector<32x256xf32>
    %66 = arith.mulf %61, %65 : vector<32x256xf32>
    %67 = vector.broadcast %47 : vector<32x1xf32> to vector<32x256xf32>
    %68 = arith.mulf %66, %67 : vector<32x256xf32>
    %69 = vector.broadcast %48 : vector<32x1xf32> to vector<32x256xf32>
    %70 = arith.addf %68, %69 : vector<32x256xf32>
    %cst_34 = arith.constant 3.000000e-01 : f32
    %71 = vector.broadcast %cst_34 : f32 to vector<32x256xf32>
    %72 = arith.mulf %71, %70 : vector<32x256xf32>
    %73 = arith.maximumf %70, %72 : vector<32x256xf32>
    %c1_i32_35 = arith.constant 1 : i32
    %74 = tpu.dynamic_rotate %73 by %c1_i32_35 dim 1 : vector<32x256xf32>, i32 -> vector<32x256xf32>
    %75 = vector.broadcast %1 : vector<1x256xf32> to vector<32x256xf32>
    %76 = arith.mulf %74, %75 : vector<32x256xf32>
    %c255_i32_36 = arith.constant 255 : i32
    %77 = tpu.dynamic_rotate %73 by %c255_i32_36 dim 1 : vector<32x256xf32>, i32 -> vector<32x256xf32>
    %78 = vector.broadcast %2 : vector<1x256xf32> to vector<32x256xf32>
    %79 = arith.mulf %77, %78 : vector<32x256xf32>
    %c0_37 = arith.constant 0 : index
    %c0_38 = arith.constant 0 : index
    %80 = vector.load %arg11[%c0_37, %c0_38] : memref<32x32xf32, #tpu.memory_space<vmem>>, vector<32x32xf32>
    %cst_39 = arith.constant dense<0.000000e+00> : vector<32x256xf32>
    %81 = tpu.matmul %80, %76, %cst_39 {dimension_numbers = #tpu.dot_dimension_numbers<[1], [0], [0], [1], [0, 0, 1, 1], [], []>} : vector<32x32xf32>, vector<32x256xf32>, vector<32x256xf32> -> vector<32x256xf32>
    %c0_40 = arith.constant 0 : index
    %c0_41 = arith.constant 0 : index
    %82 = vector.load %arg12[%c0_40, %c0_41] : memref<32x32xf32, #tpu.memory_space<vmem>>, vector<32x32xf32>
    %cst_42 = arith.constant dense<0.000000e+00> : vector<32x256xf32>
    %83 = tpu.matmul %82, %73, %cst_42 {dimension_numbers = #tpu.dot_dimension_numbers<[1], [0], [0], [1], [0, 0, 1, 1], [], []>} : vector<32x32xf32>, vector<32x256xf32>, vector<32x256xf32> -> vector<32x256xf32>
    %84 = arith.addf %81, %83 : vector<32x256xf32>
    %c0_43 = arith.constant 0 : index
    %c0_44 = arith.constant 0 : index
    %85 = vector.load %arg13[%c0_43, %c0_44] : memref<32x32xf32, #tpu.memory_space<vmem>>, vector<32x32xf32>
    %cst_45 = arith.constant dense<0.000000e+00> : vector<32x256xf32>
    %86 = tpu.matmul %85, %79, %cst_45 {dimension_numbers = #tpu.dot_dimension_numbers<[1], [0], [0], [1], [0, 0, 1, 1], [], []>} : vector<32x32xf32>, vector<32x256xf32>, vector<32x256xf32> -> vector<32x256xf32>
    %87 = arith.addf %84, %86 : vector<32x256xf32>
    %c0_46 = arith.constant 0 : index
    %c0_47 = arith.constant 0 : index
    %88 = vector.load %arg14[%c0_46, %c0_47] : memref<32x1xf32, #tpu.memory_space<vmem>>, vector<32x1xf32>
    %89 = vector.broadcast %88 : vector<32x1xf32> to vector<32x256xf32>
    %90 = arith.addf %87, %89 : vector<32x256xf32>
    %91 = arith.addf %90, %0 : vector<32x256xf32>
    %c255_i32_48 = arith.constant 255 : i32
    %92 = tpu.dynamic_rotate %91 by %c255_i32_48 dim 1 : vector<32x256xf32>, i32 -> vector<32x256xf32>
    %c254_i32 = arith.constant 254 : i32
    %93 = tpu.dynamic_rotate %91 by %c254_i32 dim 1 : vector<32x256xf32>, i32 -> vector<32x256xf32>
    %94 = arith.maximumf %92, %93 : vector<32x256xf32>
    %95 = arith.maximumf %91, %94 : vector<32x256xf32>
    %c0_49 = arith.constant 0 : index
    %c0_50 = arith.constant 0 : index
    %96 = vector.load %arg17[%c0_49, %c0_50] : memref<128x128xf32, #tpu.memory_space<vmem>>, vector<128x128xf32>
    %97 = vector.extract_strided_slice %95 {offsets = [0, 0], sizes = [32, 128], strides = [1, 1]} : vector<32x256xf32> to vector<32x128xf32>
    %cst_51 = arith.constant dense<0.000000e+00> : vector<32x128xf32>
    %98 = tpu.matmul %97, %96, %cst_51 {dimension_numbers = #tpu.dot_dimension_numbers<[1], [0], [0], [1], [0, 0, 1, 1], [], []>} : vector<32x128xf32>, vector<128x128xf32>, vector<32x128xf32> -> vector<32x128xf32>
    %cst_52 = arith.constant dense<0.000000e+00> : vector<32xf32>
    %99 = vector.multi_reduction <add>, %98, %cst_52 [1] : vector<32x128xf32> to vector<32xf32>
    %100 = vector.shape_cast %99 : vector<32xf32> to vector<32x1xf32>
    %cst_53 = arith.constant 0.0238095243 : f32
    %101 = vector.broadcast %cst_53 : f32 to vector<32x1xf32>
    %102 = arith.mulf %100, %101 : vector<32x1xf32>
    %c0_54 = arith.constant 0 : index
    %c0_55 = arith.constant 0 : index
    %103 = vector.load %arg15[%c0_54, %c0_55] : memref<32x32xf32, #tpu.memory_space<vmem>>, vector<32x32xf32>
    %cst_56 = arith.constant dense<0.000000e+00> : vector<32x1xf32>
    %104 = tpu.matmul %103, %102, %cst_56 {dimension_numbers = #tpu.dot_dimension_numbers<[1], [0], [0], [1], [0, 0, 1, 1], [], []>} : vector<32x32xf32>, vector<32x1xf32>, vector<32x1xf32> -> vector<32x1xf32>
    %c0_57 = arith.constant 0 : index
    %c0_58 = arith.constant 0 : index
    %105 = vector.load %arg16[%c0_57, %c0_58] : memref<32x1xf32, #tpu.memory_space<vmem>>, vector<32x1xf32>
    %106 = arith.addf %104, %105 : vector<32x1xf32>
    %107 = arith.negf %106 : vector<32x1xf32>
    %108 = math.exp %107 : vector<32x1xf32>
    %cst_59 = arith.constant 1.000000e+00 : f32
    %109 = vector.broadcast %cst_59 : f32 to vector<32x1xf32>
    %110 = arith.addf %109, %108 : vector<32x1xf32>
    %111 = arith.divf %109, %110 : vector<32x1xf32>
    %112 = vector.broadcast %111 : vector<32x1xf32> to vector<32x128xf32>
    %113 = arith.mulf %98, %112 : vector<32x128xf32>
    %114 = vector.broadcast %111 : vector<32x1xf32> to vector<32x128xf32>
    %115 = arith.addf %113, %114 : vector<32x128xf32>
    %c0_60 = arith.constant 0 : index
    %c0_61 = arith.constant 0 : index
    %116 = vector.load %arg18[%c0_60, %c0_61] : memref<32x256xf32, #tpu.memory_space<vmem>>, vector<32x128xf32>
    tpu.vector_store %arg18[%c0_60, %c0_61], %115 {strides = array<i32>} : memref<32x256xf32, #tpu.memory_space<vmem>>, vector<32x128xf32>,
    %117 = vector.extract_strided_slice %95 {offsets = [0, 128], sizes = [32, 128], strides = [1, 1]} : vector<32x256xf32> to vector<32x128xf32>
    %cst_62 = arith.constant dense<0.000000e+00> : vector<32x128xf32>
    %118 = tpu.matmul %117, %96, %cst_62 {dimension_numbers = #tpu.dot_dimension_numbers<[1], [0], [0], [1], [0, 0, 1, 1], [], []>} : vector<32x128xf32>, vector<128x128xf32>, vector<32x128xf32> -> vector<32x128xf32>
    %cst_63 = arith.constant dense<0.000000e+00> : vector<32xf32>
    %119 = vector.multi_reduction <add>, %118, %cst_63 [1] : vector<32x128xf32> to vector<32xf32>
    %120 = vector.shape_cast %119 : vector<32xf32> to vector<32x1xf32>
    %cst_64 = arith.constant 0.0238095243 : f32
    %121 = vector.broadcast %cst_64 : f32 to vector<32x1xf32>
    %122 = arith.mulf %120, %121 : vector<32x1xf32>
    %c0_65 = arith.constant 0 : index
    %c0_66 = arith.constant 0 : index
    %123 = vector.load %arg15[%c0_65, %c0_66] : memref<32x32xf32, #tpu.memory_space<vmem>>, vector<32x32xf32>
    %cst_67 = arith.constant dense<0.000000e+00> : vector<32x1xf32>
    %124 = tpu.matmul %123, %122, %cst_67 {dimension_numbers = #tpu.dot_dimension_numbers<[1], [0], [0], [1], [0, 0, 1, 1], [], []>} : vector<32x32xf32>, vector<32x1xf32>, vector<32x1xf32> -> vector<32x1xf32>
    %c0_68 = arith.constant 0 : index
    %c0_69 = arith.constant 0 : index
    %125 = vector.load %arg16[%c0_68, %c0_69] : memref<32x1xf32, #tpu.memory_space<vmem>>, vector<32x1xf32>
    %126 = arith.addf %124, %125 : vector<32x1xf32>
    %127 = arith.negf %126 : vector<32x1xf32>
    %128 = math.exp %127 : vector<32x1xf32>
    %cst_70 = arith.constant 1.000000e+00 : f32
    %129 = vector.broadcast %cst_70 : f32 to vector<32x1xf32>
    %130 = arith.addf %129, %128 : vector<32x1xf32>
    %131 = arith.divf %129, %130 : vector<32x1xf32>
    %132 = vector.broadcast %131 : vector<32x1xf32> to vector<32x128xf32>
    %133 = arith.mulf %118, %132 : vector<32x128xf32>
    %134 = vector.broadcast %131 : vector<32x1xf32> to vector<32x128xf32>
    %135 = arith.addf %133, %134 : vector<32x128xf32>
    %c0_71 = arith.constant 0 : index
    %c128 = arith.constant 128 : index
    %136 = vector.load %arg18[%c0_71, %c128] : memref<32x256xf32, #tpu.memory_space<vmem>>, vector<32x128xf32>
    tpu.vector_store %arg18[%c0_71, %c128], %135 {strides = array<i32>} : memref<32x256xf32, #tpu.memory_space<vmem>>, vector<32x128xf32>,
    return
  }
}

</mosaic_0001>

<bundles_post_ra>
// kernel: forward.3
= control target key start
LH: loop header
LB: loop body
LE: loop exit
PB: predicated region body
PF: predicated region fallthrough
CT: control target
= control target key end

     0   :  { %v2295_v12 = vmov 0   ;;  %s2296_s20 = smov 1   ;;  %vm312_vm0 = vcmask 261120   ;;  %s2299_s24 = smov 126   ;;  %s3132_s0 = inlined_call_operand.vmem [shape: f32[32,256], index: 0, kind: input, shape index: {}]   ;;  %s3133_s3 = inlined_call_operand.vmem [shape: f32[32,1], index: 3, kind: input, shape index: {}]   ;;  %s3134_s4 = inlined_call_operand.vmem [shape: f32[32,1], index: 4, kind: input, shape index: {}]   ;;  %s3135_s8 = inlined_call_operand.vmem [shape: f32[32,1], index: 8, kind: input, shape index: {}]   ;;  %s3136_s6 = inlined_call_operand.vmem [shape: f32[32,32], index: 6, kind: input, shape index: {}]   ;;  %s3137_s1 = inlined_call_operand.vmem [shape: f32[1,256], index: 1, kind: input, shape index: {}]   ;;  %s3138_s2 = inlined_call_operand.vmem [shape: f32[1,256], index: 2, kind: input, shape index: {}]   ;;  %s3139_s5 = inlined_call_operand.vmem [shape: f32[32,32], index: 5, kind: input, shape index: {}]   ;;  %s3140_s7 = inlined_call_operand.vmem [shape: f32[32,32], index: 7, kind: input, shape index: {}]   ;;  %s3141_s9 = inlined_call_operand.vmem [shape: f32[32,1], index: 9, kind: input, shape index: {}]   ;;  %s3142_s10 = inlined_call_operand.vmem [shape: f32[32,1], index: 10, kind: input, shape index: {}]   ;;  %s3143_s12 = inlined_call_operand.vmem [shape: f32[32,32], index: 12, kind: input, shape index: {}]   ;;  %s3144_s14 = inlined_call_operand.vmem [shape: f32[32,1], index: 14, kind: input, shape index: {}]   ;;  %s3145_s11 = inlined_call_operand.vmem [shape: f32[32,32], index: 11, kind: input, shape index: {}]   ;;  %s3146_s13 = inlined_call_operand.vmem [shape: f32[32,32], index: 13, kind: input, shape index: {}]   ;;  %s3147_s17 = inlined_call_operand.vmem [shape: f32[128,128], index: 17, kind: input, shape index: {}]   ;;  %s3148_s15 = inlined_call_operand.vmem [shape: f32[32,32], index: 15, kind: input, shape index: {}]   ;;  %s3149_s16 = inlined_call_operand.vmem [shape: f32[32,1], index: 16, kind: input, shape index: {}]   ;;  %s3150_s18 = inlined_call_operand.vmem [shape: f32[32,256], index: 18, kind: output, shape index: {}]  }
   0x1   :  { %3154 = sst [smem:[#allocation2_spill]] %s3132_s0  ;;  %2198 = vset.pattern.permute.xlu1 %v2295_v12  ;;  %2197 = vset.pattern.permute.xlu0 %v2295_v12 }
   0x2   :  { %3155 = sst [smem:[#allocation3_spill]] %s3133_s3  ;;  %s3157_s29 = sld [smem:[#allocation2_spill]] }
   0x3   :  { %3156 = sst [smem:[#allocation4_spill]] %s3134_s4  ;;  %s3158_s19 = sld [smem:[#allocation3_spill]] }
   0x4   :  { %s3159_s21 = sld [smem:[#allocation4_spill]] }
   0x8   :  { %v59_v0 = vld [vmem:[%s3157_s29] sm:$0xff]  ;;  %v60_v1 = vld [vmem:[%s3157_s29 + $0x8] sm:$0xff]  ;;  %v61_v5 = vld [vmem:[%s3157_s29 + $0x10] sm:$0xff] }
   0x9   :  { %v63_v2 = vld [vmem:[%s3157_s29 + $0x20] sm:$0xff]  ;;  %v77_v3 = vadd.f32 %v60_v1, %v59_v0  ;;  %v64_v4 = vld [vmem:[%s3157_s29 + $0x28] sm:$0xff]  ;;  %v62_v6 = vld [vmem:[%s3157_s29 + $0x18] sm:$0xff] }
   0xa   :  { %v83_v7 = vadd.f32 %v64_v4, %v63_v2  ;;  %v65_v8 = vld [vmem:[%s3157_s29 + $0x30] sm:$0xff]  ;;  %v66_v9 = vld [vmem:[%s3157_s29 + $0x38] sm:$0xff]  ;;  %v80_v10 = vadd.f32 %v62_v6, %v61_v5  ;;  %v70_v34 = vld [vmem:[%s3158_s19 + $0x8] sm:$0xff] }
   0xb   :  { %78 = vadd.xlane.f32.xlu0 %v77_v3  ;;  %v86_v11 = vadd.f32 %v66_v9, %v65_v8  ;;  %v73_v35 = vld [vmem:[%s3159_s21] sm:$0xff]  ;;  %v74_v37 = vld [vmem:[%s3159_s21 + $0x8] sm:$0xff]  ;;  %v71_v38 = vld [vmem:[%s3158_s19 + $0x10] sm:$0xff] }
   0xc   :  { %84 = vadd.xlane.f32.xlu1 %v83_v7  ;;  %v69_v36 = vld [vmem:[%s3158_s19] sm:$0xff]  ;;  %v72_v39 = vld [vmem:[%s3158_s19 + $0x18] sm:$0xff]  ;;  %v75_v40 = vld [vmem:[%s3159_s21 + $0x10] sm:$0xff] }
   0xd   :  { %v76_v48 = vld [vmem:[%s3159_s21 + $0x18] sm:$0xff]  ;;  %s2298_s21 = smov 127  }
   0xf   :  { %81 = vadd.xlane.f32.xlu0 %v80_v10 }
  0x10   :  { %87 = vadd.xlane.f32.xlu1 %v86_v11 }
  0x98   :  { %v79_v13 = vpop.xlane.xlu0 %78 }
  0x99   :  { %v90_v14 = vmul.f32 0.00390625, %v79_v13  ;;  %v85_v15 = vpop.xlane.xlu1 %84 }
  0x9a   :  { %v92_v16 = vmul.f32 0.00390625, %v85_v15 }
  0x9b   :  { %v2419_v17 = vsub.f32 %v59_v0, %v90_v14  ;;  %v2421_v18 = vsub.f32 %v60_v1, %v90_v14 }
  0x9c   :  { %v2423_v19 = vsub.f32 %v63_v2, %v92_v16  ;;  %v2425_v20 = vsub.f32 %v64_v4, %v92_v16  ;;  %v82_v21 = vpop.xlane.xlu0 %81 }
  0x9d   :  { %v91_v22 = vmul.f32 0.00390625, %v82_v21  ;;  %v102_v23 = vmul.f32 %v2419_v17, %v2419_v17  ;;  %v103_v24 = vmul.f32 %v2421_v18, %v2421_v18  ;;  %v88_v41 = vpop.xlane.xlu1 %87 }
  0x9e   :  { %v106_v25 = vmul.f32 %v2423_v19, %v2423_v19  ;;  %v107_v26 = vmul.f32 %v2425_v20, %v2425_v20  ;;  %v93_v42 = vmul.f32 0.00390625, %v88_v41 }
  0x9f   :  { %v96_v27 = vsub.f32 %v61_v5, %v91_v22  ;;  %v97_v28 = vsub.f32 %v62_v6, %v91_v22  ;;  %v110_v29 = vadd.f32 %v103_v24, %v102_v23 }
  0xa0   :  { %v116_v30 = vadd.f32 %v107_v26, %v106_v25  ;;  %v2456_v43 = vsub.f32 %v65_v8, %v93_v42  ;;  %v2458_v44 = vsub.f32 %v66_v9, %v93_v42  ;;  %v2297_v26 = vmov 0.0  }
  0xa1   :  { %111 = vadd.xlane.f32.xlu0 %v110_v29  ;;  %v104_v31 = vmul.f32 %v96_v27, %v96_v27  ;;  %v105_v32 = vmul.f32 %v97_v28, %v97_v28  ;;  %389 = vmatprep.mubr.f32.mxu0 %v2297_v26 }
  0xa2   :  { %v108_v45 = vmul.f32 %v2456_v43, %v2456_v43  ;;  %v109_v46 = vmul.f32 %v2458_v44, %v2458_v44  ;;  %952 = vmatprep.mubr.f32.mxu1 %v2297_v26 }
  0xa3   :  { %v113_v33 = vadd.f32 %v105_v32, %v104_v31 }
  0xa4   :  { %v119_v47 = vadd.f32 %v109_v46, %v108_v45 }
  0xa5   :  { %117 = vadd.xlane.f32.xlu0 %v116_v30  ;;  %114 = vadd.xlane.f32.xlu1 %v113_v33 }
  0xb6   :  { %149 = vperm.xlu1 %2198, %v70_v34  }
  0xba   :  { %172 = vperm.xlu1 %2198, %v73_v35  }
  0xbb   :  { %144 = vperm.xlu0 %2197, %v69_v36  }
  0xbe   :  { %177 = vperm.xlu1 %2198, %v74_v37   ;;  %v628_v37 = vld [vmem:[%s3135_s8] sm:$0xff] }
  0xc2   :  { %154 = vperm.xlu1 %2198, %v71_v38   ;;  %v630_v38 = vld [vmem:[%s3135_s8 + $0x10] sm:$0xff] }
  0xc6   :  { %159 = vperm.xlu1 %2198, %v72_v39  }
  0xca   :  { %182 = vperm.xlu1 %2198, %v75_v40  }
  0xee   :  { %120 = vadd.xlane.f32.xlu1 %v119_v47 }
  0xff   :  { %187 = vperm.xlu1 %2198, %v76_v48  }
 0x12e   :  { %v112_v49 = vpop.xlane.xlu0 %111 }
 0x12f   :  { %v122_v50 = vmul.f32 0.00390625, %v112_v49 }
 0x131   :  { %v126_v51 = vadd.f32 1e-05, %v122_v50 }
 0x132   :  { %v115_v52 = vpop.xlane.xlu1 %114  ;;  %v118_v53 = vpop.xlane.xlu0 %117 }
 0x133   :  { %2239 = vrsqrt.f32 %v126_v51  ;;  %v123_v54 = vmul.f32 0.00390625, %v115_v52  ;;  %v124_v55 = vmul.f32 0.00390625, %v118_v53 }
 0x135   :  { %v127_v56 = vadd.f32 1e-05, %v123_v54  ;;  %v128_v57 = vadd.f32 1e-05, %v124_v55 }
 0x136   :  { %v150_v58 = vpop.permute.xlu1 %149 }
 0x137   :  { %2241 = vrsqrt.f32 %v127_v56 }
 0x138   :  { %2243 = vrsqrt.f32 %v128_v57 }
 0x13a   :  { %v173_v59 = vpop.permute.xlu1 %172  ;;  %v145_v61 = vpop.permute.xlu0 %144 }
 0x13d   :  { %v2240_v60 = vpop.eup %2239 }
 0x13e   :  { %v178_v62 = vpop.permute.xlu1 %177  ;;  %v134_v63 = vmul.f32 %v2240_v60, %v2419_v17  ;;  %v135_v0 = vmul.f32 %v2240_v60, %v2421_v18  ;;  %v629_v60 = vld [vmem:[%s3135_s8 + $0x8] sm:$0xff] }
 0x140   :  { %v162_v1 = vmul.f32 %v145_v61, %v134_v63  ;;  %v163_v2 = vmul.f32 %v145_v61, %v135_v0  ;;  %v631_v61 = vld [vmem:[%s3135_s8 + $0x18] sm:$0xff] }
 0x141   :  { %v2242_v3 = vpop.eup %2241 }
 0x142   :  { %v2244_v4 = vpop.eup %2243  ;;  %v136_v5 = vmul.f32 %v2242_v3, %v96_v27  ;;  %v137_v6 = vmul.f32 %v2242_v3, %v97_v28  ;;  %v190_v7 = vadd.f32 %v173_v59, %v162_v1  ;;  %v191_v8 = vadd.f32 %v173_v59, %v163_v2  ;;  %v155_v9 = vpop.permute.xlu1 %154  ;;  %v311_v59 = vld [vmem:[%s3136_s6 + $0x18] sm:$0xff] }
 0x143   :  { %v138_v13 = vmul.f32 %v2244_v4, %v2423_v19  ;;  %v139_v14 = vmul.f32 %v2244_v4, %v2425_v20  ;;  %v67_v4 = vld [vmem:[%s3137_s1] sm:$0x3] }
 0x144   :  { %v164_v10 = vmul.f32 %v150_v58, %v136_v5  ;;  %v165_v11 = vmul.f32 %v150_v58, %v137_v6  ;;  %v198_v12 = vmul.f32 0.3, %v190_v7  ;;  %v199_v17 = vmul.f32 0.3, %v191_v8  ;;  %v310_v58 = vld [vmem:[%s3136_s6 + $0x10] sm:$0xff] }
 0x145   :  { %v166_v24 = vmul.f32 %v155_v9, %v138_v13  ;;  %v167_v25 = vmul.f32 %v155_v9, %v139_v14 }
 0x146   :  { %v192_v15 = vadd.f32 %v178_v62, %v164_v10  ;;  %v193_v16 = vadd.f32 %v178_v62, %v165_v11  ;;  %v160_v18 = vpop.permute.xlu1 %159  ;;  %v206_v21 = vmax.f32 %v190_v7, %v198_v12  ;;  %v207_v28 = vmax.f32 %v191_v8, %v199_v17 }
 0x147   :  { %v230_v62 = vlaneseq }
 0x148   :  { %v200_v22 = vmul.f32 0.3, %v192_v15  ;;  %v201_v23 = vmul.f32 0.3, %v193_v16  ;;  %214 = vrot.lane.b32.xlu1 %v206_v21, %s2296_s20 }
 0x149   :  { %v243_v63 = vshrl.u32 %v230_v62, 7  ;;  %v2523_v1 = vand.u32 127, %v230_v62 }
 0x14a   :  { %v208_v19 = vmax.f32 %v192_v15, %v200_v22  ;;  %v209_v27 = vmax.f32 %v193_v16, %v201_v23  ;;  %v183_v20 = vpop.permute.xlu1 %182 }
 0x14b   :  { %v194_v29 = vadd.f32 %v183_v20, %v166_v24  ;;  %v195_v30 = vadd.f32 %v183_v20, %v167_v25  ;;  %v244_v2 = vsub.s32 0, %v243_v63  ;;  %v248_v3 = vsub.s32 1, %v243_v63 }
 0x14c   :  { %216 = vrot.lane.b32.xlu0 %v208_v19, %s2296_s20  ;;  %222 = vrot.lane.b32.xlu1 %v207_v28, %s2296_s20  ;;  %v2032_v31 = vpack.c.bf16 %v209_v27, %v207_v28  ;;  %v2034_v32 = vpack.c.bf16 %v208_v19, %v206_v21  ;;  %vm232_vm1 = vcmp.lt.s32.totalorder %v2523_v1, 1  ;;  %vm276_vm2 = vcmp.lt.s32.totalorder %v2523_v1, 127 }
 0x14d   :  { %v202_v33 = vmul.f32 0.3, %v194_v29  ;;  %v203_v34 = vmul.f32 0.3, %v195_v30  ;;  %v2529_v7 = vrot.slane %v67_v4, %v244_v2  ;;  %v2531_v8 = vrot.slane %v67_v4, %v248_v3  ;;  %v307_v4 = vld [vmem:[%s3139_s5 + $0x18] sm:$0xff] }
 0x14e   :  { %2033 = vmatprep.subr.bf16.mxu0 %v2032_v31  ;;  %vm1271_vm3 = vcmp.lt.s32.totalorder %v2523_v1, 126 }
 0x14f   :  { %v210_v35 = vmax.f32 %v194_v29, %v202_v33  ;;  %2035 = vmatpush1.bf16.msra.mxu0 %v2034_v32  ;;  %v211_v36 = vmax.f32 %v195_v30, %v203_v34 }
 0x150   :  { %224 = vrot.lane.b32.xlu0 %v209_v27, %s2296_s20 }
 0x151   :  { %218 = vrot.lane.b32.xlu1 %v210_v35, %s2296_s20 }
 0x155   :  { %226 = vrot.lane.b32.xlu1 %v211_v36, %s2296_s20 }
 0x159   :  { %260 = vrot.lane.b32.xlu1 %v206_v21, %s2298_s21 }
 0x15d   :  { %268 = vrot.lane.b32.xlu1 %v207_v28, %s2298_s21 }
 0x161   :  { %264 = vrot.lane.b32.xlu1 %v210_v35, %s2298_s21 }
 0x165   :  { %272 = vrot.lane.b32.xlu1 %v211_v36, %s2298_s21 }
 0x169   :  { %634 = vperm.xlu1 %2198, %v628_v37  }
 0x16d   :  { %644 = vperm.xlu1 %2198, %v630_v38  }
 0x17b   :  { %v121_v39 = vpop.xlane.xlu1 %120 }
 0x17c   :  { %v125_v40 = vmul.f32 0.00390625, %v121_v39 }
 0x17e   :  { %v129_v41 = vadd.f32 1e-05, %v125_v40 }
 0x17f   :  { %v188_v49 = vpop.permute.xlu1 %187 }
 0x180   :  { %2245 = vrsqrt.f32 %v129_v41 }
 0x18a   :  { %v2246_v42 = vpop.eup %2245 }
 0x18b   :  { %v140_v45 = vmul.f32 %v2246_v42, %v2456_v43  ;;  %v141_v46 = vmul.f32 %v2246_v42, %v2458_v44  ;;  %v308_v43 = vld [vmem:[%s3136_s6] sm:$0xff]  ;;  %v309_v44 = vld [vmem:[%s3136_s6 + $0x8] sm:$0xff] }
 0x18d   :  { %v168_v47 = vmul.f32 %v160_v18, %v140_v45  ;;  %v169_v48 = vmul.f32 %v160_v18, %v141_v46  ;;  %v304_v46 = vld [vmem:[%s3139_s5] sm:$0xff] }
 0x18f   :  { %v196_v50 = vadd.f32 %v188_v49, %v168_v47  ;;  %v197_v51 = vadd.f32 %v188_v49, %v169_v48 }
 0x191   :  { %v204_v52 = vmul.f32 0.3, %v196_v50  ;;  %v205_v53 = vmul.f32 0.3, %v197_v51 }
 0x193   :  { %v212_v54 = vmax.f32 %v196_v50, %v204_v52  ;;  %v213_v55 = vmax.f32 %v197_v51, %v205_v53 }
 0x195   :  { %220 = vrot.lane.b32.xlu0 %v212_v54, %s2296_s20  ;;  %v2036_v56 = vpack.c.bf16 %v213_v55, %v211_v36  ;;  %v2038_v57 = vpack.c.bf16 %v212_v54, %v210_v35  ;;  %v68_v35 = vld [vmem:[%s3138_s2] sm:$0x3] }
 0x196   :  { %v2561_v39 = vrot.slane %v68_v35, %v244_v2  ;;  %v2563_v40 = vrot.slane %v68_v35, %v248_v3 }
 0x197   :  { %2037 = vmatprep.subr.bf16.mxu0 %v2036_v56 }
 0x198   :  { %2039 = vmatpush1.bf16.msra.mxu0 %v2038_v57 }
 0x199   :  { %228 = vrot.lane.b32.xlu0 %v213_v55, %s2296_s20 }
 0x19b   :  { %1832 = vmatmul.mubr.msk.f32.vlgmr.msra.gmra.mrb[0].mxu0 %vm312_vm0, %v308_v43 }
 0x19c   :  { %395 = vmatprep.mubr.f32.mxu0 %v2297_v26 }
 0x19d   :  { %262 = vrot.lane.b32.xlu0 %v208_v19, %s2298_s21 }
 0x19f   :  { %1833 = vmatmul.mubr.msk.f32.gmra.mrb[2].mxu0 %vm312_vm0, %v309_v44 }
 0x1a0   :  { %401 = vmatprep.mubr.f32.mxu0 %v2297_v26 }
 0x1a1   :  { %270 = vrot.lane.b32.xlu0 %v209_v27, %s2298_s21 }
 0x1a3   :  { %1834 = vmatmul.mubr.msk.f32.gmra.mrb[4].mxu0 %vm312_vm0, %v310_v58 }
 0x1a4   :  { %407 = vmatprep.mubr.f32.mxu0 %v2297_v26 }
 0x1a5   :  { %266 = vrot.lane.b32.xlu0 %v212_v54, %s2298_s21  ;;  %v305_v54 = vld [vmem:[%s3139_s5 + $0x8] sm:$0xff] }
 0x1a7   :  { %1835 = vmatmul.mubr.msk.f32.gmra.mrb[6].mxu0 %vm312_vm0, %v311_v59  ;;  %v306_v59 = vld [vmem:[%s3139_s5 + $0x10] sm:$0xff] }
 0x1a8   :  { %490 = vmatprep.mubr.f32.mxu0 %v2297_v26 }
 0x1a9   :  { %274 = vrot.lane.b32.xlu0 %v213_v55, %s2298_s21 }
 0x1ad   :  { %639 = vperm.xlu0 %2197, %v629_v60  }
 0x1b1   :  { %649 = vperm.xlu0 %2197, %v631_v61  }
 0x1ba   :  { %v215_v0 = vpop.permute.xlu1 %214 }
 0x1be   :  { %v223_v5 = vpop.permute.xlu1 %222  ;;  %v217_v6 = vpop.permute.xlu0 %216 }
 0x1bf   :  { %v233_v9 = vsel %vm232_vm1, %v215_v0, %v223_v5  ;;  %v237_v10 = vsel %vm232_vm1, %v223_v5, %v215_v0 }
 0x1c0   :  { %v252_v14 = vmul.f32 %v2529_v7, %v237_v10  ;;  %v253_v15 = vmul.f32 %v2531_v8, %v233_v9  ;;  %v515_v9 = vld [vmem:[%s3140_s7] sm:$0xff]  ;;  %v516_v10 = vld [vmem:[%s3140_s7 + $0x8] sm:$0xff] }
 0x1c2   :  { %v225_v11 = vpop.permute.xlu0 %224 }
 0x1c3   :  { %v234_v12 = vsel %vm232_vm1, %v217_v6, %v225_v11  ;;  %v238_v13 = vsel %vm232_vm1, %v225_v11, %v217_v6  ;;  %v219_v22 = vpop.permute.xlu1 %218  ;;  %v517_v11 = vld [vmem:[%s3140_s7 + $0x10] sm:$0xff] }
 0x1c4   :  { %v254_v16 = vmul.f32 %v2529_v7, %v238_v13  ;;  %v255_v17 = vmul.f32 %v2531_v8, %v234_v12  ;;  %v518_v12 = vld [vmem:[%s3140_s7 + $0x18] sm:$0xff] }
 0x1c6   :  { %v2042_v18 = vpack.c.bf16 %v254_v16, %v252_v14  ;;  %v2040_v21 = vpack.c.bf16 %v255_v17, %v253_v15 }
 0x1c7   :  { %v227_v23 = vpop.permute.xlu1 %226 }
 0x1c8   :  { %2041 = vmatprep.subr.bf16.mxu0 %v2040_v21  ;;  %v235_v19 = vsel %vm232_vm1, %v219_v22, %v227_v23  ;;  %v239_v27 = vsel %vm232_vm1, %v227_v23, %v219_v22 }
 0x1c9   :  { %2043 = vmatpush1.bf16.msra.mxu0 %v2042_v18  ;;  %v256_v31 = vmul.f32 %v2529_v7, %v239_v27  ;;  %v257_v32 = vmul.f32 %v2531_v8, %v235_v19 }
 0x1cb   :  { %v261_v24 = vpop.permute.xlu1 %260 }
 0x1cf   :  { %v269_v20 = vpop.permute.xlu1 %268 }
 0x1d0   :  { %v277_v42 = vsel %vm276_vm2, %v261_v24, %v269_v20  ;;  %v281_v45 = vsel %vm276_vm2, %v269_v20, %v261_v24 }
 0x1d1   :  { %v296_v50 = vmul.f32 %v2561_v39, %v277_v42  ;;  %v297_v51 = vmul.f32 %v2563_v40, %v281_v45  ;;  %v664_v42 = vld [vmem:[%s3142_s10] sm:$0xff]  ;;  %v665_v45 = vld [vmem:[%s3142_s10 + $0x8] sm:$0xff] }
 0x1d3   :  { %v265_v41 = vpop.permute.xlu1 %264 }
 0x1d7   :  { %v273_v55 = vpop.permute.xlu1 %272 }
 0x1d8   :  { %v279_v44 = vsel %vm276_vm2, %v265_v41, %v273_v55  ;;  %v283_v58 = vsel %vm276_vm2, %v273_v55, %v265_v41  ;;  %v660_v41 = vld [vmem:[%s3141_s9] sm:$0xff] }
 0x1d9   :  { %v300_v63 = vmul.f32 %v2561_v39, %v279_v44  ;;  %v301_v0 = vmul.f32 %v2563_v40, %v283_v58 }
 0x1e8   :  { %v635_v13 = vpop.permute.xlu1 %634 }
 0x1ec   :  { %v645_v19 = vpop.permute.xlu1 %644 }
 0x207   :  { %v221_v25 = vpop.permute.xlu0 %220 }
 0x20b   :  { %v229_v28 = vpop.permute.xlu0 %228 }
 0x20c   :  { %v236_v29 = vsel %vm232_vm1, %v221_v25, %v229_v28  ;;  %v240_v30 = vsel %vm232_vm1, %v229_v28, %v221_v25 }
 0x20d   :  { %v258_v33 = vmul.f32 %v2529_v7, %v240_v30  ;;  %v259_v34 = vmul.f32 %v2531_v8, %v236_v29 }
 0x20f   :  { %v2046_v36 = vpack.c.bf16 %v258_v33, %v256_v31  ;;  %v263_v37 = vpop.permute.xlu0 %262  ;;  %v2044_v38 = vpack.c.bf16 %v259_v34, %v257_v32 }
 0x211   :  { %2045 = vmatprep.subr.bf16.mxu0 %v2044_v38  ;;  %v661_v38 = vld [vmem:[%s3141_s9 + $0x8] sm:$0xff] }
 0x212   :  { %2047 = vmatpush1.bf16.msra.mxu0 %v2046_v36 }
 0x213   :  { %v271_v47 = vpop.permute.xlu0 %270 }
 0x214   :  { %v278_v48 = vsel %vm276_vm2, %v263_v37, %v271_v47  ;;  %v282_v49 = vsel %vm276_vm2, %v271_v47, %v263_v37  ;;  %v663_v47 = vld [vmem:[%s3141_s9 + $0x18] sm:$0xff] }
 0x215   :  { %v298_v52 = vmul.f32 %v2561_v39, %v278_v48  ;;  %v299_v53 = vmul.f32 %v2563_v40, %v282_v49  ;;  %1836 = vmatmul.mubr.msk.f32.vlgmr.msra.gmra.mrb[0].mxu0 %vm312_vm0, %v304_v46  ;;  %v662_v46 = vld [vmem:[%s3141_s9 + $0x10] sm:$0xff] }
 0x216   :  { %496 = vmatprep.mubr.f32.mxu0 %v2297_v26 }
 0x217   :  { %v2050_v56 = vpack.c.bf16 %v298_v52, %v296_v50  ;;  %v267_v57 = vpop.permute.xlu0 %266  ;;  %v2048_v43 = vpack.c.bf16 %v299_v53, %v297_v51 }
 0x219   :  { %1837 = vmatmul.mubr.msk.f32.gmra.mrb[2].mxu0 %vm312_vm0, %v305_v54  ;;  %2049 = vmatprep.subr.bf16.mxu0 %v2048_v43 }
 0x21a   :  { %2051 = vmatpush1.bf16.msra.mxu0 %v2050_v56  ;;  %502 = vmatprep.mubr.f32.mxu0 %v2297_v26 }
 0x21b   :  { %v275_v60 = vpop.permute.xlu0 %274 }
 0x21c   :  { %v280_v61 = vsel %vm276_vm2, %v267_v57, %v275_v60  ;;  %v284_v62 = vsel %vm276_vm2, %v275_v60, %v267_v57 }
 0x21d   :  { %v302_v2 = vmul.f32 %v2561_v39, %v280_v61  ;;  %v303_v3 = vmul.f32 %v2563_v40, %v284_v62  ;;  %1838 = vmatmul.mubr.msk.f32.gmra.mrb[4].mxu0 %vm312_vm0, %v306_v59 }
 0x21e   :  { %508 = vmatprep.mubr.f32.mxu0 %v2297_v26 }
 0x21f   :  { %v2054_v5 = vpack.c.bf16 %v302_v2, %v300_v63  ;;  %v2052_v6 = vpack.c.bf16 %v303_v3, %v301_v0 }
 0x221   :  { %1839 = vmatmul.mubr.msk.f32.gmra.mrb[6].mxu0 %vm312_vm0, %v307_v4  ;;  %2053 = vmatprep.subr.bf16.mxu0 %v2052_v6 }
 0x222   :  { %2055 = vmatpush1.bf16.msra.mxu0 %v2054_v5  ;;  %595 = vmatprep.mubr.f32.mxu0 %v2297_v26 }
 0x225   :  { %1840 = vmatmul.mubr.msk.f32.vlgmr.msra.gmra.mrb[0].mxu0 %vm312_vm0, %v515_v9 }
 0x226   :  { %601 = vmatprep.mubr.f32.mxu0 %v2297_v26 }
 0x229   :  { %1841 = vmatmul.mubr.msk.f32.gmra.mrb[2].mxu0 %vm312_vm0, %v516_v10 }
 0x22a   :  { %607 = vmatprep.mubr.f32.mxu0 %v2297_v26 }
 0x22c   :  { %v640_v18 = vpop.permute.xlu0 %639 }
 0x22d   :  { %1842 = vmatmul.mubr.msk.f32.gmra.mrb[4].mxu0 %vm312_vm0, %v517_v11 }
 0x22e   :  { %613 = vmatprep.mubr.f32.mxu0 %v2297_v26 }
 0x230   :  { %v650_v31 = vpop.permute.xlu0 %649 }
 0x231   :  { %1843 = vmatmul.mubr.msk.f32.gmra.mrb[6].mxu0 %vm312_vm0, %v518_v12 }
 0x2f8   :  { %v597_v14 = vpop.f32.mrb[0].mxu0 }
 0x2f9   :  { %v652_v15 = vadd.f32 %v635_v13, %v597_v14  ;;  %v599_v16 = vpop.f32.mrb[1].mxu0  ;;  %v667_v14 = vld [vmem:[%s3142_s10 + $0x18] sm:$0xff] }
 0x2fa   :  { %v653_v17 = vadd.f32 %v635_v13, %v599_v16  ;;  %v666_v13 = vld [vmem:[%s3142_s10 + $0x10] sm:$0xff] }
 0x2fc   :  { %v603_v21 = vpop.f32.mrb[2].mxu0  ;;  %v668_v22 = vadd.f32 %v653_v17, %v652_v15 }
 0x2fd   :  { %v654_v23 = vadd.f32 %v640_v18, %v603_v21  ;;  %v605_v24 = vpop.f32.mrb[3].mxu0 }
 0x2fe   :  { %v655_v25 = vadd.f32 %v640_v18, %v605_v24  ;;  %669 = vadd.xlane.f32.xlu1 %v668_v22 }
 0x300   :  { %v609_v27 = vpop.f32.mrb[4].mxu0  ;;  %v671_v20 = vadd.f32 %v655_v25, %v654_v23 }
 0x301   :  { %v656_v28 = vadd.f32 %v645_v19, %v609_v27  ;;  %v611_v29 = vpop.f32.mrb[5].mxu0 }
 0x302   :  { %v657_v30 = vadd.f32 %v645_v19, %v611_v29  ;;  %672 = vadd.xlane.f32.xlu0 %v671_v20 }
 0x304   :  { %v615_v32 = vpop.f32.mrb[6].mxu0  ;;  %v674_v33 = vadd.f32 %v657_v30, %v656_v28 }
 0x305   :  { %v658_v34 = vadd.f32 %v650_v31, %v615_v32  ;;  %v617_v35 = vpop.f32.mrb[7].mxu0 }
 0x306   :  { %v659_v36 = vadd.f32 %v650_v31, %v617_v35  ;;  %675 = vadd.xlane.f32.xlu0 %v674_v33 }
 0x308   :  { %v677_v37 = vadd.f32 %v659_v36, %v658_v34 }
 0x30a   :  { %678 = vadd.xlane.f32.xlu1 %v677_v37 }
 0x31b   :  { %739 = vperm.xlu1 %2198, %v661_v38  }
 0x31c   :  { %734 = vperm.xlu0 %2197, %v660_v41  }
 0x31f   :  { %762 = vperm.xlu1 %2198, %v664_v42  }
 0x320   :  { %767 = vperm.xlu0 %2197, %v665_v45  }
 0x323   :  { %744 = vperm.xlu1 %2198, %v662_v46  }
 0x324   :  { %749 = vperm.xlu0 %2197, %v663_v47  }
 0x38b   :  { %v670_v48 = vpop.xlane.xlu1 %669 }
 0x38c   :  { %v680_v49 = vmul.f32 0.00390625, %v670_v48 }
 0x38e   :  { %v684_v50 = vsub.f32 %v652_v15, %v680_v49  ;;  %v685_v51 = vsub.f32 %v653_v17, %v680_v49 }
 0x38f   :  { %v673_v52 = vpop.xlane.xlu0 %672 }
 0x390   :  { %v681_v53 = vmul.f32 0.00390625, %v673_v52  ;;  %v692_v54 = vmul.f32 %v684_v50, %v684_v50  ;;  %v693_v55 = vmul.f32 %v685_v51, %v685_v51 }
 0x392   :  { %v686_v56 = vsub.f32 %v654_v23, %v681_v53  ;;  %v687_v57 = vsub.f32 %v655_v25, %v681_v53  ;;  %v700_v43 = vadd.f32 %v693_v55, %v692_v54 }
 0x393   :  { %v676_v44 = vpop.xlane.xlu0 %675 }
 0x394   :  { %v682_v58 = vmul.f32 0.00390625, %v676_v44  ;;  %701 = vadd.xlane.f32.xlu0 %v700_v43  ;;  %v694_v59 = vmul.f32 %v686_v56, %v686_v56  ;;  %v695_v60 = vmul.f32 %v687_v57, %v687_v57 }
 0x396   :  { %v688_v61 = vsub.f32 %v656_v28, %v682_v58  ;;  %v689_v62 = vsub.f32 %v657_v30, %v682_v58  ;;  %v703_v63 = vadd.f32 %v695_v60, %v694_v59 }
 0x397   :  { %v679_v0 = vpop.xlane.xlu1 %678 }
 0x398   :  { %v683_v2 = vmul.f32 0.00390625, %v679_v0  ;;  %704 = vadd.xlane.f32.xlu1 %v703_v63  ;;  %v696_v3 = vmul.f32 %v688_v61, %v688_v61  ;;  %v697_v4 = vmul.f32 %v689_v62, %v689_v62 }
 0x39a   :  { %v2646_v5 = vsub.f32 %v658_v34, %v683_v2  ;;  %v2648_v6 = vsub.f32 %v659_v36, %v683_v2  ;;  %v706_v9 = vadd.f32 %v697_v4, %v696_v3 }
 0x39b   :  { %v735_v15 = vpop.permute.xlu0 %734  ;;  %v740_v16 = vpop.permute.xlu1 %739 }
 0x39c   :  { %707 = vadd.xlane.f32.xlu0 %v706_v9  ;;  %v698_v10 = vmul.f32 %v2646_v5, %v2646_v5  ;;  %v699_v11 = vmul.f32 %v2648_v6, %v2648_v6 }
 0x39e   :  { %v709_v12 = vadd.f32 %v699_v11, %v698_v10 }
 0x39f   :  { %v768_v17 = vpop.permute.xlu0 %767  ;;  %v763_v18 = vpop.permute.xlu1 %762 }
 0x3a0   :  { %710 = vadd.xlane.f32.xlu1 %v709_v12 }
 0x3a3   :  { %v750_v21 = vpop.permute.xlu0 %749  ;;  %v745_v22 = vpop.permute.xlu1 %744 }
 0x3b1   :  { %772 = vperm.xlu1 %2198, %v666_v13  }
 0x3b2   :  { %777 = vperm.xlu0 %2197, %v667_v14  }
 0x421   :  { %v702_v23 = vpop.xlane.xlu0 %701 }
 0x422   :  { %v712_v24 = vmul.f32 0.00390625, %v702_v23 }
 0x424   :  { %v716_v25 = vadd.f32 1e-05, %v712_v24 }
 0x425   :  { %v705_v19 = vpop.xlane.xlu1 %704 }
 0x426   :  { %2247 = vrsqrt.f32 %v716_v25  ;;  %v713_v27 = vmul.f32 0.00390625, %v705_v19 }
 0x428   :  { %v717_v20 = vadd.f32 1e-05, %v713_v27  ;;  %v872_v27 = vld [vmem:[%s3143_s12] sm:$0xff] }
 0x429   :  { %v708_v28 = vpop.xlane.xlu0 %707 }
 0x42a   :  { %2249 = vrsqrt.f32 %v717_v20  ;;  %v714_v29 = vmul.f32 0.00390625, %v708_v28  ;;  %v873_v20 = vld [vmem:[%s3143_s12 + $0x8] sm:$0xff]  ;;  %v874_v28 = vld [vmem:[%s3143_s12 + $0x10] sm:$0xff] }
 0x42c   :  { %v718_v30 = vadd.f32 1e-05, %v714_v29  ;;  %v875_v29 = vld [vmem:[%s3143_s12 + $0x18] sm:$0xff] }
 0x42d   :  { %v711_v31 = vpop.xlane.xlu1 %710 }
 0x42e   :  { %2251 = vrsqrt.f32 %v718_v30  ;;  %v715_v32 = vmul.f32 0.00390625, %v711_v31  ;;  %v1191_v30 = vld [vmem:[%s3144_s14] sm:$0xff]  ;;  %v1193_v31 = vld [vmem:[%s3144_s14 + $0x10] sm:$0xff] }
 0x430   :  { %v2248_v33 = vpop.eup %2247  ;;  %v719_v34 = vadd.f32 1e-05, %v715_v32  ;;  %v1192_v32 = vld [vmem:[%s3144_s14 + $0x8] sm:$0xff] }
 0x431   :  { %v724_v35 = vmul.f32 %v2248_v33, %v684_v50  ;;  %v725_v36 = vmul.f32 %v2248_v33, %v685_v51  ;;  %v773_v0 = vpop.permute.xlu1 %772  ;;  %v778_v13 = vpop.permute.xlu0 %777  ;;  %v1194_v33 = vld [vmem:[%s3144_s14 + $0x18] sm:$0xff] }
 0x432   :  { %2253 = vrsqrt.f32 %v719_v34 }
 0x433   :  { %v752_v37 = vmul.f32 %v735_v15, %v724_v35  ;;  %v753_v38 = vmul.f32 %v735_v15, %v725_v36 }
 0x434   :  { %v2250_v41 = vpop.eup %2249 }
 0x435   :  { %v780_v42 = vadd.f32 %v763_v18, %v752_v37  ;;  %v726_v45 = vmul.f32 %v2250_v41, %v686_v56  ;;  %v781_v46 = vadd.f32 %v763_v18, %v753_v38  ;;  %v727_v47 = vmul.f32 %v2250_v41, %v687_v57 }
 0x437   :  { %v788_v48 = vmul.f32 0.3, %v780_v42  ;;  %v754_v49 = vmul.f32 %v740_v16, %v726_v45  ;;  %v755_v52 = vmul.f32 %v740_v16, %v727_v47  ;;  %v789_v54 = vmul.f32 0.3, %v781_v46 }
 0x438   :  { %v2252_v53 = vpop.eup %2251 }
 0x439   :  { %v728_v55 = vmul.f32 %v2252_v53, %v688_v61  ;;  %v729_v43 = vmul.f32 %v2252_v53, %v689_v62  ;;  %v796_v44 = vmax.f32 %v780_v42, %v788_v48  ;;  %v782_v58 = vadd.f32 %v768_v17, %v754_v49 }
 0x43a   :  { %v783_v59 = vadd.f32 %v768_v17, %v755_v52  ;;  %v797_v56 = vmax.f32 %v781_v46, %v789_v54 }
 0x43b   :  { %v756_v50 = vmul.f32 %v745_v22, %v728_v55  ;;  %v757_v51 = vmul.f32 %v745_v22, %v729_v43  ;;  %804 = vrot.lane.b32.xlu1 %v796_v44, %s2296_s20  ;;  %v790_v60 = vmul.f32 0.3, %v782_v58 }
 0x43c   :  { %v2254_v63 = vpop.eup %2253  ;;  %v791_v2 = vmul.f32 0.3, %v783_v59 }
 0x43d   :  { %v784_v57 = vadd.f32 %v773_v0, %v756_v50  ;;  %v785_v3 = vadd.f32 %v773_v0, %v757_v51  ;;  %v730_v4 = vmul.f32 %v2254_v63, %v2646_v5  ;;  %v731_v9 = vmul.f32 %v2254_v63, %v2648_v6 }
 0x43e   :  { %v798_v61 = vmax.f32 %v782_v58, %v790_v60  ;;  %v799_v62 = vmax.f32 %v783_v59, %v791_v2 }
 0x43f   :  { %v792_v10 = vmul.f32 0.3, %v784_v57  ;;  %v758_v11 = vmul.f32 %v750_v21, %v730_v4  ;;  %v759_v12 = vmul.f32 %v750_v21, %v731_v9  ;;  %812 = vrot.lane.b32.xlu1 %v797_v56, %s2296_s20  ;;  %v793_v16 = vmul.f32 0.3, %v785_v3 }
 0x440   :  { %806 = vrot.lane.b32.xlu0 %v798_v61, %s2296_s20  ;;  %v2056_v14 = vpack.c.bf16 %v799_v62, %v797_v56  ;;  %v2058_v15 = vpack.c.bf16 %v798_v61, %v796_v44 }
 0x441   :  { %v800_v17 = vmax.f32 %v784_v57, %v792_v10  ;;  %v786_v18 = vadd.f32 %v778_v13, %v758_v11  ;;  %v787_v22 = vadd.f32 %v778_v13, %v759_v12  ;;  %v801_v6 = vmax.f32 %v785_v3, %v793_v16  ;;  %v868_v11 = vld [vmem:[%s3145_s11] sm:$0xff] }
 0x442   :  { %2057 = vmatprep.subr.bf16.mxu1 %v2056_v14 }
 0x443   :  { %v794_v5 = vmul.f32 0.3, %v786_v18  ;;  %v795_v23 = vmul.f32 0.3, %v787_v22  ;;  %2059 = vmatpush1.bf16.msra.mxu1 %v2058_v15  ;;  %808 = vrot.lane.b32.xlu1 %v800_v17, %s2296_s20 }
 0x444   :  { %814 = vrot.lane.b32.xlu0 %v799_v62, %s2296_s20 }
 0x445   :  { %v802_v21 = vmax.f32 %v786_v18, %v794_v5  ;;  %v803_v24 = vmax.f32 %v787_v22, %v795_v23 }
 0x447   :  { %816 = vrot.lane.b32.xlu1 %v801_v6, %s2296_s20  ;;  %v2060_v25 = vpack.c.bf16 %v803_v24, %v801_v6  ;;  %v2062_v19 = vpack.c.bf16 %v802_v21, %v800_v17 }
 0x448   :  { %810 = vrot.lane.b32.xlu0 %v802_v21, %s2296_s20 }
 0x449   :  { %2061 = vmatprep.subr.bf16.mxu1 %v2060_v25 }
 0x44a   :  { %2063 = vmatpush1.bf16.msra.mxu1 %v2062_v19 }
 0x44b   :  { %836 = vrot.lane.b32.xlu1 %v796_v44, %s2298_s21 }
 0x44c   :  { %818 = vrot.lane.b32.xlu0 %v803_v24, %s2296_s20 }
 0x44d   :  { %1844 = vmatmul.mubr.msk.f32.vlgmr.msra.gmra.mrb[0].mxu1 %vm312_vm0, %v872_v27 }
 0x44e   :  { %958 = vmatprep.mubr.f32.mxu1 %v2297_v26 }
 0x44f   :  { %844 = vrot.lane.b32.xlu1 %v797_v56, %s2298_s21 }
 0x450   :  { %838 = vrot.lane.b32.xlu0 %v798_v61, %s2298_s21 }
 0x451   :  { %1845 = vmatmul.mubr.msk.f32.gmra.mrb[2].mxu1 %vm312_vm0, %v873_v20 }
 0x452   :  { %964 = vmatprep.mubr.f32.mxu1 %v2297_v26 }
 0x453   :  { %840 = vrot.lane.b32.xlu1 %v800_v17, %s2298_s21  ;;  %v869_v17 = vld [vmem:[%s3145_s11 + $0x8] sm:$0xff] }
 0x454   :  { %846 = vrot.lane.b32.xlu0 %v799_v62, %s2298_s21 }
 0x455   :  { %1846 = vmatmul.mubr.msk.f32.gmra.mrb[4].mxu1 %vm312_vm0, %v874_v28 }
 0x456   :  { %970 = vmatprep.mubr.f32.mxu1 %v2297_v26 }
 0x457   :  { %848 = vrot.lane.b32.xlu1 %v801_v6, %s2298_s21 }
 0x458   :  { %842 = vrot.lane.b32.xlu0 %v802_v21, %s2298_s21 }
 0x459   :  { %1847 = vmatmul.mubr.msk.f32.gmra.mrb[6].mxu1 %vm312_vm0, %v875_v29 }
 0x45a   :  { %1053 = vmatprep.mubr.f32.mxu1 %v2297_v26 }
 0x45b   :  { %1197 = vperm.xlu1 %2198, %v1191_v30  }
 0x45c   :  { %850 = vrot.lane.b32.xlu0 %v803_v24, %s2298_s21  ;;  %v870_v24 = vld [vmem:[%s3145_s11 + $0x10] sm:$0xff] }
 0x45f   :  { %1207 = vperm.xlu1 %2198, %v1193_v31   ;;  %v871_v31 = vld [vmem:[%s3145_s11 + $0x18] sm:$0xff] }
 0x460   :  { %1202 = vperm.xlu0 %2197, %v1192_v32  }
 0x464   :  { %1212 = vperm.xlu0 %2197, %v1194_v33  }
 0x4ad   :  { %v805_v34 = vpop.permute.xlu1 %804 }
 0x4b1   :  { %v813_v35 = vpop.permute.xlu1 %812 }
 0x4b2   :  { %v807_v36 = vpop.permute.xlu0 %806  ;;  %v820_v37 = vsel %vm232_vm1, %v805_v34, %v813_v35  ;;  %v824_v38 = vsel %vm232_vm1, %v813_v35, %v805_v34  ;;  %v1080_v34 = vld [vmem:[%s3146_s13 + $0x10] sm:$0xff]  ;;  %v1081_v35 = vld [vmem:[%s3146_s13 + $0x18] sm:$0xff] }
 0x4b3   :  { %v828_v47 = vmul.f32 %v824_v38, %v2529_v7  ;;  %v829_v48 = vmul.f32 %v820_v37, %v2531_v8  ;;  %v1297_v37 = vld [vmem:[%s3147_s17 + $0x8] sm:$0xff]  ;;  %v1298_v38 = vld [vmem:[%s3147_s17 + $0x10] sm:$0xff] }
 0x4b5   :  { %v809_v41 = vpop.permute.xlu1 %808 }
 0x4b6   :  { %v815_v42 = vpop.permute.xlu0 %814 }
 0x4b7   :  { %v821_v45 = vsel %vm232_vm1, %v807_v36, %v815_v42  ;;  %v825_v46 = vsel %vm232_vm1, %v815_v42, %v807_v36  ;;  %v1296_v36 = vld [vmem:[%s3147_s17] sm:$0xff] }
 0x4b8   :  { %v830_v49 = vmul.f32 %v825_v46, %v2529_v7  ;;  %v831_v52 = vmul.f32 %v821_v45, %v2531_v8  ;;  %v1300_v45 = vld [vmem:[%s3147_s17 + $0x20] sm:$0xff]  ;;  %v1301_v46 = vld [vmem:[%s3147_s17 + $0x28] sm:$0xff] }
 0x4b9   :  { %v817_v53 = vpop.permute.xlu1 %816 }
 0x4ba   :  { %v2066_v54 = vpack.c.bf16 %v830_v49, %v828_v47  ;;  %v811_v55 = vpop.permute.xlu0 %810  ;;  %v2064_v43 = vpack.c.bf16 %v831_v52, %v829_v48  ;;  %v822_v44 = vsel %vm232_vm1, %v809_v41, %v817_v53  ;;  %v826_v58 = vsel %vm232_vm1, %v817_v53, %v809_v41  ;;  %v1302_v48 = vld [vmem:[%s3147_s17 + $0x30] sm:$0xff]  ;;  %v1303_v49 = vld [vmem:[%s3147_s17 + $0x38] sm:$0xff]  ;;  %v1304_v53 = vld [vmem:[%s3147_s17 + $0x40] sm:$0xff] }
 0x4bb   :  { %v832_v63 = vmul.f32 %v826_v58, %v2529_v7  ;;  %v833_v0 = vmul.f32 %v822_v44, %v2531_v8  ;;  %v2806_v41 = vpack.c.bf16 %v1297_v37, %v1296_v36  ;;  %v2822_v47 = vpack.c.bf16 %v1301_v46, %v1300_v45  ;;  %v1307_v44 = vld [vmem:[%s3147_s17 + $0x58] sm:$0xff] }
 0x4bc   :  { %2065 = vmatprep.subr.bf16.mxu1 %v2064_v43  ;;  %v2832_v52 = vpack.c.bf16 %v1303_v49, %v1302_v48  ;;  %v1306_v43 = vld [vmem:[%s3147_s17 + $0x50] sm:$0xff] }
 0x4bd   :  { %2067 = vmatpush1.bf16.msra.mxu1 %v2066_v54  ;;  %v837_v59 = vpop.permute.xlu1 %836  ;;  %2081 = vmatprep.subr.bf16.mxu0 %v2806_v41  ;;  %v1305_v54 = vld [vmem:[%s3147_s17 + $0x48] sm:$0xff]  ;;  %v2852_v58 = vpack.c.bf16 %v1307_v44, %v1306_v43 }
 0x4be   :  { %v819_v50 = vpop.permute.xlu0 %818  ;;  %2083 = vmatpush3.bf16.msra.mxu0 %v2806_v41 }
 0x4bf   :  { %v823_v51 = vsel %vm232_vm1, %v811_v55, %v819_v50  ;;  %v827_v60 = vsel %vm232_vm1, %v819_v50, %v811_v55  ;;  %v2842_v55 = vpack.c.bf16 %v1305_v54, %v1304_v53  ;;  %v1309_v50 = vld [vmem:[%s3147_s17 + $0x68] sm:$0xff] }
 0x4c0   :  { %v834_v56 = vmul.f32 %v827_v60, %v2529_v7  ;;  %v835_v2 = vmul.f32 %v823_v51, %v2531_v8  ;;  %v1310_v60 = vld [vmem:[%s3147_s17 + $0x70] sm:$0xff] }
 0x4c1   :  { %v845_v57 = vpop.permute.xlu1 %844 }
 0x4c2   :  { %v2070_v3 = vpack.c.bf16 %v834_v56, %v832_v63  ;;  %v839_v4 = vpop.permute.xlu0 %838  ;;  %v2068_v9 = vpack.c.bf16 %v835_v2, %v833_v0  ;;  %v852_v61 = vsel %vm276_vm2, %v837_v59, %v845_v57  ;;  %v856_v62 = vsel %vm276_vm2, %v845_v57, %v837_v59  ;;  %v1308_v59 = vld [vmem:[%s3147_s17 + $0x60] sm:$0xff]  ;;  %v1311_v63 = vld [vmem:[%s3147_s17 + $0x78] sm:$0xff] }
 0x4c3   :  { %v860_v13 = vmul.f32 %v852_v61, %v2561_v39  ;;  %v861_v14 = vmul.f32 %v856_v62, %v2563_v40  ;;  %v2863_v51 = vpack.c.bf16 %v1309_v50, %v1308_v59  ;;  %v2873_v2 = vpack.c.bf16 %v1311_v63, %v1310_v60 }
 0x4c4   :  { %2069 = vmatprep.subr.bf16.mxu1 %v2068_v9  ;;  %v2287_v9 = vld [vmem:[%s3157_s29] sm:$0xff] }
 0x4c5   :  { %2071 = vmatpush1.bf16.msra.mxu1 %v2070_v3  ;;  %v841_v10 = vpop.permute.xlu1 %840 }
 0x4c6   :  { %v847_v7 = vpop.permute.xlu0 %846 }
 0x4c7   :  { %v853_v8 = vsel %vm276_vm2, %v839_v4, %v847_v7  ;;  %v857_v12 = vsel %vm276_vm2, %v847_v7, %v839_v4 }
 0x4c8   :  { %v862_v15 = vmul.f32 %v853_v8, %v2561_v39  ;;  %v863_v16 = vmul.f32 %v857_v12, %v2563_v40  ;;  %1848 = vmatmul.mubr.msk.f32.vlgmr.msra.gmra.mrb[0].mxu1 %vm312_vm0, %v868_v11 }
 0x4c9   :  { %1059 = vmatprep.mubr.f32.mxu1 %v2297_v26  ;;  %v849_v22 = vpop.permute.xlu1 %848 }
 0x4ca   :  { %v2074_v18 = vpack.c.bf16 %v862_v15, %v860_v13  ;;  %v843_v5 = vpop.permute.xlu0 %842  ;;  %v2072_v23 = vpack.c.bf16 %v863_v16, %v861_v14  ;;  %v854_v6 = vsel %vm276_vm2, %v841_v10, %v849_v22  ;;  %v858_v21 = vsel %vm276_vm2, %v849_v22, %v841_v10  ;;  %v2288_v10 = vld [vmem:[%s3157_s29 + $0x8] sm:$0xff]  ;;  %v2289_v15 = vld [vmem:[%s3157_s29 + $0x10] sm:$0xff] }
 0x4cb   :  { %v864_v20 = vmul.f32 %v854_v6, %v2561_v39  ;;  %v865_v28 = vmul.f32 %v858_v21, %v2563_v40 }
 0x4cc   :  { %1849 = vmatmul.mubr.msk.f32.gmra.mrb[2].mxu1 %vm312_vm0, %v869_v17  ;;  %2073 = vmatprep.subr.bf16.mxu1 %v2072_v23 }
 0x4cd   :  { %2075 = vmatpush1.bf16.msra.mxu1 %v2074_v18  ;;  %1065 = vmatprep.mubr.f32.mxu1 %v2297_v26  ;;  %v2290_v18 = vld [vmem:[%s3157_s29 + $0x18] sm:$0xff] }
 0x4ce   :  { %v851_v25 = vpop.permute.xlu0 %850 }
 0x4cf   :  { %v855_v19 = vsel %vm276_vm2, %v843_v5, %v851_v25  ;;  %v859_v27 = vsel %vm276_vm2, %v851_v25, %v843_v5  ;;  %v2291_v25 = vld [vmem:[%s3157_s29 + $0x20] sm:$0xff] }
 0x4d0   :  { %v866_v29 = vmul.f32 %v855_v19, %v2561_v39  ;;  %v867_v30 = vmul.f32 %v859_v27, %v2563_v40  ;;  %1850 = vmatmul.mubr.msk.f32.gmra.mrb[4].mxu1 %vm312_vm0, %v870_v24  ;;  %v1078_v39 = vld [vmem:[%s3146_s13] sm:$0xff]  ;;  %v1079_v40 = vld [vmem:[%s3146_s13 + $0x8] sm:$0xff] }
 0x4d1   :  { %1071 = vmatprep.mubr.f32.mxu1 %v2297_v26 }
 0x4d2   :  { %v2078_v32 = vpack.c.bf16 %v866_v29, %v864_v20  ;;  %v2076_v33 = vpack.c.bf16 %v867_v30, %v865_v28  ;;  %v2292_v20 = vld [vmem:[%s3157_s29 + $0x28] sm:$0xff] }
 0x4d4   :  { %1851 = vmatmul.mubr.msk.f32.gmra.mrb[6].mxu1 %vm312_vm0, %v871_v31  ;;  %2077 = vmatprep.subr.bf16.mxu1 %v2076_v33 }
 0x4d5   :  { %2079 = vmatpush1.bf16.msra.mxu1 %v2078_v32  ;;  %1158 = vmatprep.mubr.f32.mxu1 %v2297_v26 }
 0x4d8   :  { %1852 = vmatmul.mubr.msk.f32.vlgmr.msra.gmra.mrb[0].mxu1 %vm312_vm0, %v1078_v39  ;;  %v2293_v39 = vld [vmem:[%s3157_s29 + $0x30] sm:$0xff] }
 0x4d9   :  { %1164 = vmatprep.mubr.f32.mxu1 %v2297_v26 }
 0x4da   :  { %v1198_v0 = vpop.permute.xlu1 %1197 }
 0x4dc   :  { %1853 = vmatmul.mubr.msk.f32.gmra.mrb[2].mxu1 %vm312_vm0, %v1079_v40 }
 0x4dd   :  { %1170 = vmatprep.mubr.f32.mxu1 %v2297_v26 }
 0x4de   :  { %v1208_v17 = vpop.permute.xlu1 %1207 }
 0x4df   :  { %v1203_v62 = vpop.permute.xlu0 %1202 }
 0x4e0   :  { %1854 = vmatmul.mubr.msk.f32.gmra.mrb[4].mxu1 %vm312_vm0, %v1080_v34  ;;  %v2294_v34 = vld [vmem:[%s3157_s29 + $0x38] sm:$0xff] }
 0x4e1   :  { %1176 = vmatprep.mubr.f32.mxu1 %v2297_v26  ;;  %v1299_v26 = vld [vmem:[%s3147_s17 + $0x18] sm:$0xff] }
 0x4e2   :  { %v2811_v42 = vpack.c.bf16 %v1299_v26, %v1298_v38 }
 0x4e3   :  { %v1213_v27 = vpop.permute.xlu0 %1212 }
 0x4e4   :  { %1855 = vmatmul.mubr.msk.f32.gmra.mrb[6].mxu1 %vm312_vm0, %v1081_v35  ;;  %2085 = vmatprep.subr.bf16.mxu0 %v2811_v42 }
 0x4e5   :  { %2087 = vmatpush3.bf16.msra.mxu0 %v2811_v42 }
 0x4e6   :  { %2089 = vmatprep.subr.bf16.mxu0 %v2822_v47 }
 0x4e9   :  { %2091 = vmatpush3.bf16.msra.mxu0 %v2822_v47 }
 0x4ea   :  { %2093 = vmatprep.subr.bf16.mxu0 %v2832_v52 }
 0x4ed   :  { %2095 = vmatpush3.bf16.msra.mxu0 %v2832_v52 }
 0x4ee   :  { %2097 = vmatprep.subr.bf16.mxu0 %v2842_v55 }
 0x4f1   :  { %2099 = vmatpush3.bf16.msra.mxu0 %v2842_v55 }
 0x4f2   :  { %2101 = vmatprep.subr.bf16.mxu0 %v2852_v58 }
 0x4f5   :  { %2103 = vmatpush3.bf16.msra.mxu0 %v2852_v58 }
 0x4f6   :  { %2105 = vmatprep.subr.bf16.mxu0 %v2863_v51 }
 0x4f9   :  { %2107 = vmatpush3.bf16.msra.mxu0 %v2863_v51 }
 0x4fa   :  { %2109 = vmatprep.subr.bf16.mxu0 %v2873_v2 }
 0x4fd   :  { %2111 = vmatpush3.bf16.msra.mxu0 %v2873_v2 }
 0x5ab   :  { %v1160_v56 = vpop.f32.mrb[0].mxu1 }
 0x5ac   :  { %v1215_v57 = vadd.f32 %v1198_v0, %v1160_v56  ;;  %v1162_v3 = vpop.f32.mrb[1].mxu1 }
 0x5ad   :  { %v1216_v4 = vadd.f32 %v1198_v0, %v1162_v3 }
 0x5ae   :  { %v2879_v61 = vadd.f32 %v2287_v9, %v1215_v57 }
 0x5af   :  { %v2885_v11 = vadd.f32 %v2288_v10, %v1216_v4  ;;  %v1166_v7 = vpop.f32.mrb[2].mxu1 }
 0x5b0   :  { %v1217_v8 = vadd.f32 %v1203_v62, %v1166_v7  ;;  %v1168_v12 = vpop.f32.mrb[3].mxu1 }
 0x5b1   :  { %v1218_v13 = vadd.f32 %v1203_v62, %v1168_v12  ;;  %v2204_v14 = vpack.i.bf16 %v2885_v11, %v2879_v61 }
 0x5b2   :  { %v2892_v16 = vadd.f32 %v2289_v15, %v1217_v8 }
 0x5b3   :  { %v2897_v22 = vadd.f32 %v2290_v18, %v1218_v13  ;;  %2205 = vrot.lane.b32.xlu0 %v2204_v14, %s2299_s24  ;;  %2200 = vrot.lane.b32.xlu1 %v2204_v14, %s2298_s21  ;;  %v1172_v5 = vpop.f32.mrb[4].mxu1 }
 0x5b4   :  { %v1219_v23 = vadd.f32 %v1208_v17, %v1172_v5  ;;  %v1174_v6 = vpop.f32.mrb[5].mxu1 }
 0x5b5   :  { %v1220_v21 = vadd.f32 %v1208_v17, %v1174_v6  ;;  %v2214_v24 = vpack.i.bf16 %v2897_v22, %v2892_v16 }
 0x5b6   :  { %v2905_v19 = vadd.f32 %v2291_v25, %v1219_v23 }
 0x5b7   :  { %v2910_v28 = vadd.f32 %v2292_v20, %v1220_v21  ;;  %v1178_v29 = vpop.f32.mrb[6].mxu1  ;;  %2215 = vrot.lane.b32.xlu0 %v2214_v24, %s2299_s24  ;;  %2210 = vrot.lane.b32.xlu1 %v2214_v24, %s2298_s21 }
 0x5b8   :  { %v1221_v30 = vadd.f32 %v1213_v27, %v1178_v29  ;;  %v1180_v31 = vpop.f32.mrb[7].mxu1 }
 0x5b9   :  { %v1222_v32 = vadd.f32 %v1213_v27, %v1180_v31  ;;  %v2224_v33 = vpack.i.bf16 %v2910_v28, %v2905_v19 }
 0x5ba   :  { %v2918_v40 = vadd.f32 %v2293_v39, %v1221_v30 }
 0x5bb   :  { %v2923_v35 = vadd.f32 %v2294_v34, %v1222_v32  ;;  %2225 = vrot.lane.b32.xlu0 %v2224_v33, %s2299_s24  ;;  %2220 = vrot.lane.b32.xlu1 %v2224_v33, %s2298_s21 }
 0x5bd   :  { %v2234_v36 = vpack.i.bf16 %v2923_v35, %v2918_v40 }
 0x5bf   :  { %2235 = vrot.lane.b32.xlu0 %v2234_v36, %s2299_s24  ;;  %2230 = vrot.lane.b32.xlu1 %v2234_v36, %s2298_s21 }
 0x625   :  { %v2201_v37 = vpop.permute.xlu1 %2200  ;;  %v2206_v38 = vpop.permute.xlu0 %2205 }
 0x626   :  { %v2203_v26 = vunpack.i.h.bf16 %v2201_v37  ;;  %v2202_v45 = vunpack.i.l.bf16 %v2201_v37  ;;  %v2208_v46 = vunpack.i.h.bf16 %v2206_v38  ;;  %v2207_v48 = vunpack.i.l.bf16 %v2206_v38 }
 0x628   :  { %v1247_v49 = vsel %vm276_vm2, %v2202_v45, %v2203_v26  ;;  %v2934_v53 = vsel %vm276_vm2, %v2203_v26, %v2202_v45  ;;  %v1272_v54 = vsel %vm1271_vm3, %v2207_v48, %v2208_v46  ;;  %v2940_v43 = vsel %vm1271_vm3, %v2208_v46, %v2207_v48 }
 0x629   :  { %v2211_v44 = vpop.permute.xlu1 %2210  ;;  %v2216_v59 = vpop.permute.xlu0 %2215  ;;  %v1280_v50 = vmax.f32 %v1247_v49, %v1272_v54  ;;  %v1281_v60 = vmax.f32 %v2934_v53, %v2940_v43 }
 0x62a   :  { %v2213_v63 = vunpack.i.h.bf16 %v2211_v44  ;;  %v2212_v0 = vunpack.i.l.bf16 %v2211_v44  ;;  %v2218_v56 = vunpack.i.h.bf16 %v2216_v59  ;;  %v2217_v57 = vunpack.i.l.bf16 %v2216_v59 }
 0x62b   :  { %v1288_v3 = vmax.f32 %v2879_v61, %v1280_v50 }
 0x62c   :  { %v1248_v4 = vsel %vm276_vm2, %v2212_v0, %v2213_v63  ;;  %v2949_v9 = vsel %vm276_vm2, %v2213_v63, %v2212_v0  ;;  %v1273_v62 = vsel %vm1271_vm3, %v2217_v57, %v2218_v56  ;;  %v2955_v10 = vsel %vm1271_vm3, %v2218_v56, %v2217_v57 }
 0x62d   :  { %v1282_v7 = vmax.f32 %v1248_v4, %v1273_v62  ;;  %v1283_v8 = vmax.f32 %v2949_v9, %v2955_v10  ;;  %v2221_v12 = vpop.permute.xlu1 %2220  ;;  %v2226_v61 = vpop.permute.xlu0 %2225  ;;  %1960 = vmatprep.mubr.f32.mxu0 %v1288_v3  ;;  %v3007_v3 = vld [vmem:[%s3148_s15 + $0x8] sm:$0xff]  ;;  %v3013_v4 = vld [vmem:[%s3148_s15 + $0x10] sm:$0xff]  ;;  %v3023_v62 = vld [vmem:[%s3148_s15 + $0x18] sm:$0xff] }
 0x62e   :  { %v2223_v13 = vunpack.i.h.bf16 %v2221_v12  ;;  %v2222_v14 = vunpack.i.l.bf16 %v2221_v12  ;;  %v2228_v15 = vunpack.i.h.bf16 %v2226_v61  ;;  %v2227_v17 = vunpack.i.l.bf16 %v2226_v61  ;;  %v3075_v9 = vld [vmem:[%s3149_s16 + $0x18] sm:$0xff] }
 0x62f   :  { %v1290_v18 = vmax.f32 %v2892_v16, %v1282_v7  ;;  %v1289_v7 = vmax.f32 %v2885_v11, %v1281_v60  ;;  %v3062_v11 = vld [vmem:[%s3149_s16 + $0x10] sm:$0xff] }
 0x630   :  { %v1249_v5 = vsel %vm276_vm2, %v2222_v14, %v2223_v13  ;;  %v2964_v23 = vsel %vm276_vm2, %v2223_v13, %v2222_v14  ;;  %v1274_v6 = vsel %vm1271_vm3, %v2227_v17, %v2228_v15  ;;  %v2970_v21 = vsel %vm1271_vm3, %v2228_v15, %v2227_v17 }
 0x631   :  { %v2231_v24 = vpop.permute.xlu1 %2230  ;;  %v2236_v25 = vpop.permute.xlu0 %2235  ;;  %1961 = vmatmul.mubr.f32.vlgmr.msra.gmra.mrb[8].mxu0 %v1290_v18  ;;  %v1284_v27 = vmax.f32 %v1249_v5, %v1274_v6  ;;  %v1285_v16 = vmax.f32 %v2964_v23, %v2970_v21 }
 0x632   :  { %v2233_v20 = vunpack.i.h.bf16 %v2231_v24  ;;  %v2232_v29 = vunpack.i.l.bf16 %v2231_v24  ;;  %v2238_v30 = vunpack.i.h.bf16 %v2236_v25  ;;  %v2237_v31 = vunpack.i.l.bf16 %v2236_v25 }
 0x633   :  { %v1292_v32 = vmax.f32 %v2905_v19, %v1284_v27 }
 0x634   :  { %v1250_v33 = vsel %vm276_vm2, %v2232_v29, %v2233_v20  ;;  %v2979_v39 = vsel %vm276_vm2, %v2233_v20, %v2232_v29  ;;  %v1275_v34 = vsel %vm1271_vm3, %v2237_v31, %v2238_v30  ;;  %v1279_v36 = vsel %vm1271_vm3, %v2238_v30, %v2237_v31 }
 0x635   :  { %1963 = vmatprep.mubr.f32.mxu0 %v1292_v32  ;;  %v1286_v37 = vmax.f32 %v1250_v33, %v1275_v34  ;;  %v1287_v38 = vmax.f32 %v2979_v39, %v1279_v36 }
 0x637   :  { %v1294_v26 = vmax.f32 %v2918_v40, %v1286_v37  ;;  %v1409_v40 = vld [vmem:[%s3148_s15] sm:$0xff] }
 0x638   :  { %1974 = vmatprep.mubr.msk.f32.mxu1 %vm312_vm0, %v1409_v40 }
 0x639   :  { %1964 = vmatmul.mubr.f32.gmra.mrb[10].mxu0 %v1294_v26 }
 0x63a   :  { %2026 = vmatprep.mubr.msk.f32.mxu0 %vm312_vm0, %v1409_v40 }
 0x704   :  { %v2987_v19 = vpop.f32.mrb[8].mxu0 }
 0x705   :  { %1399 = vadd.xlane.f32.xlu0 %v2987_v19  ;;  %v2990_v45 = vpop.f32.mrb[9].mxu0 }
 0x706   :  { %1397 = vadd.xlane.f32.xlu1 %v2990_v45 }
 0x70c   :  { %v2993_v46 = vpop.f32.mrb[10].mxu0 }
 0x70d   :  { %1403 = vadd.xlane.f32.xlu1 %v2993_v46  ;;  %v2996_v1 = vpop.f32.mrb[11].mxu0 }
 0x70e   :  { %1401 = vadd.xlane.f32.xlu0 %v2996_v1 }
 0x792   :  { %v1400_v48 = vpop.xlane.xlu0 %1399 }
 0x793   :  { %v1406_v49 = vmul.f32 0.023809524, %v1400_v48  ;;  %v1398_v54 = vpop.xlane.xlu1 %1397 }
 0x794   :  { %v1405_v44 = vmul.f32 0.023809524, %v1398_v54 }
 0x796   :  { %v2112_v59 = vpack.c.bf16 %v1406_v49, %v1405_v44 }
 0x798   :  { %2113 = vmatprep.subr.bf16.mxu1 %v2112_v59 }
 0x799   :  { %2115 = vmatpush3.bf16.msra.mxu1 %v2112_v59 }
 0x79a   :  { %v1404_v50 = vpop.xlane.xlu1 %1403 }
 0x79b   :  { %v1408_v63 = vmul.f32 0.023809524, %v1404_v50  ;;  %v1402_v0 = vpop.xlane.xlu0 %1401 }
 0x79c   :  { %v1407_v56 = vmul.f32 0.023809524, %v1402_v0 }
 0x79e   :  { %v2116_v57 = vpack.c.bf16 %v1408_v63, %v1407_v56 }
 0x7a0   :  { %2117 = vmatprep.subr.bf16.mxu1 %v2116_v57 }
 0x7a1   :  { %2119 = vmatpush3.bf16.msra.mxu1 %v2116_v57 }
 0x7a2   :  { %2121 = vmatprep.subr.bf16.mxu1 %v2806_v41 }
 0x7a4   :  { %1975 = vmatmul.mubr.msk.f32.vlgmr.msra.gmra.mrb[8].mxu1 %vm312_vm0, %v3007_v3 }
 0x7a5   :  { %2123 = vmatpush3.bf16.msra.mxu1 %v2806_v41  ;;  %1977 = vmatprep.mubr.msk.f32.mxu1 %vm312_vm0, %v3013_v4  ;;  %v1291_v41 = vmax.f32 %v2897_v22, %v1283_v8 }
 0x7a6   :  { %2125 = vmatprep.subr.bf16.mxu1 %v2811_v42 }
 0x7a8   :  { %1978 = vmatmul.mubr.msk.f32.gmra.mrb[10].mxu1 %vm312_vm0, %v3023_v62 }
 0x7a9   :  { %2127 = vmatpush3.bf16.msra.mxu1 %v2811_v42  ;;  %2012 = vmatprep.mubr.f32.mxu1 %v1289_v7  ;;  %v1293_v42 = vmax.f32 %v2910_v28, %v1285_v16 }
 0x7aa   :  { %2129 = vmatprep.subr.bf16.mxu1 %v2822_v47 }
 0x7ad   :  { %2131 = vmatpush3.bf16.msra.mxu1 %v2822_v47  ;;  %v1295_v47 = vmax.f32 %v2923_v35, %v1287_v38  ;;  %v3069_v35 = vld [vmem:[%s3149_s16] sm:$0xff] }
 0x7ae   :  { %2133 = vmatprep.subr.bf16.mxu1 %v2832_v52 }
 0x7b1   :  { %2135 = vmatpush3.bf16.msra.mxu1 %v2832_v52 }
 0x7b2   :  { %2137 = vmatprep.subr.bf16.mxu1 %v2842_v55 }
 0x7b5   :  { %2139 = vmatpush3.bf16.msra.mxu1 %v2842_v55 }
 0x7b6   :  { %2141 = vmatprep.subr.bf16.mxu1 %v2852_v58 }
 0x7b9   :  { %2143 = vmatpush3.bf16.msra.mxu1 %v2852_v58 }
 0x7ba   :  { %2145 = vmatprep.subr.bf16.mxu1 %v2863_v51 }
 0x7bd   :  { %2147 = vmatpush3.bf16.msra.mxu1 %v2863_v51 }
 0x7be   :  { %2149 = vmatprep.subr.bf16.mxu1 %v2873_v2 }
 0x7c1   :  { %2151 = vmatpush3.bf16.msra.mxu1 %v2873_v2  ;;  %v3057_v2 = vld [vmem:[%s3149_s16 + $0x8] sm:$0xff] }
 0x7c4   :  { %2013 = vmatmul.mubr.f32.vlgmr.msra.gmra.mrb[12].mxu1 %v1291_v41 }
 0x7c5   :  { %2015 = vmatprep.mubr.f32.mxu1 %v1293_v42 }
 0x7c8   :  { %2016 = vmatmul.mubr.f32.gmra.mrb[14].mxu1 %v1295_v47 }
 0x877   :  { %v1976_v52 = vpop.f32.mrb[8].mxu1 }
 0x878   :  { %v1495_v55 = vpop.f32.mrb[9].mxu1  ;;  %v1501_v22 = vadd.f32 %v1976_v52, %v3057_v2 }
 0x879   :  { %v1496_v43 = vadd.f32 %v1495_v55, %v3069_v35 }
 0x87a   :  { %v1861_v53 = vmul.f32 -1.442695, %v1501_v22 }
 0x87b   :  { %v1979_v58 = vpop.f32.mrb[10].mxu1  ;;  %v1860_v10 = vmul.f32 -1.442695, %v1496_v43 }
 0x87c   :  { %v1505_v51 = vpop.f32.mrb[11].mxu1  ;;  %2255 = vpow2.f32 %v1861_v53  ;;  %v1511_v8 = vadd.f32 %v1979_v58, %v3075_v9 }
 0x87d   :  { %v1506_v28 = vadd.f32 %v1505_v51, %v3062_v11 }
 0x87e   :  { %v1863_v12 = vmul.f32 -1.442695, %v1511_v8 }
 0x87f   :  { %v1862_v60 = vmul.f32 -1.442695, %v1506_v28 }
 0x881   :  { %2257 = vpow2.f32 %v1862_v60 }
 0x882   :  { %2259 = vpow2.f32 %v1860_v10 }
 0x883   :  { %2261 = vpow2.f32 %v1863_v12 }
 0x886   :  { %v2256_v14 = vpop.eup %2255 }
 0x887   :  { %v1527_v5 = vadd.f32 1.0, %v2256_v14 }
 0x889   :  { %2263 = vrcp.f32 %v1527_v5 }
 0x88b   :  { %v2258_v18 = vpop.eup %2257 }
 0x88c   :  { %v1528_v23 = vadd.f32 1.0, %v2258_v18  ;;  %v2260_v6 = vpop.eup %2259 }
 0x88d   :  { %v1526_v21 = vadd.f32 1.0, %v2260_v6  ;;  %v2262_v24 = vpop.eup %2261 }
 0x88e   :  { %2265 = vrcp.f32 %v1528_v23  ;;  %v1529_v25 = vadd.f32 1.0, %v2262_v24 }
 0x88f   :  { %2267 = vrcp.f32 %v1526_v21 }
 0x890   :  { %2269 = vrcp.f32 %v1529_v25 }
 0x893   :  { %v2264_v27 = vpop.eup %2263 }
 0x897   :  { %v3078_v61 = vpop.f32.mrb[12].mxu1 }
 0x898   :  { %1657 = vadd.xlane.f32.xlu1 %v3078_v61  ;;  %v3081_v13 = vpop.f32.mrb[13].mxu1  ;;  %v2266_v16 = vpop.eup %2265 }
 0x899   :  { %1655 = vadd.xlane.f32.xlu0 %v3081_v13  ;;  %v2268_v20 = vpop.eup %2267 }
 0x89a   :  { %v2270_v29 = vpop.eup %2269 }
 0x89b   :  { %v3084_v15 = vpop.f32.mrb[14].mxu1 }
 0x89c   :  { %1661 = vadd.xlane.f32.xlu1 %v3084_v15  ;;  %v3087_v17 = vpop.f32.mrb[15].mxu1 }
 0x89d   :  { %1659 = vadd.xlane.f32.xlu0 %v3087_v17 }
 0x8ad   :  { %1545 = vperm.xlu1 %2198, %v2264_v27  }
 0x8b1   :  { %1550 = vperm.xlu1 %2198, %v2266_v16  }
 0x8b3   :  { %1540 = vperm.xlu0 %2197, %v2268_v20  }
 0x8b7   :  { %1555 = vperm.xlu0 %2197, %v2270_v29  }
 0x925   :  { %v1658_v30 = vpop.xlane.xlu1 %1657 }
 0x926   :  { %v1664_v31 = vmul.f32 0.023809524, %v1658_v30  ;;  %v1656_v32 = vpop.xlane.xlu0 %1655 }
 0x927   :  { %v1663_v33 = vmul.f32 0.023809524, %v1656_v32 }
 0x929   :  { %v2152_v39 = vpack.c.bf16 %v1664_v31, %v1663_v33  ;;  %v1662_v34 = vpop.xlane.xlu1 %1661 }
 0x92a   :  { %v1666_v36 = vmul.f32 0.023809524, %v1662_v34  ;;  %v1660_v37 = vpop.xlane.xlu0 %1659 }
 0x92b   :  { %v1665_v38 = vmul.f32 0.023809524, %v1660_v37  ;;  %2153 = vmatprep.subr.bf16.mxu0 %v2152_v39 }
 0x92c   :  { %2155 = vmatpush3.bf16.msra.mxu0 %v2152_v39 }
 0x92d   :  { %v2156_v26 = vpack.c.bf16 %v1666_v36, %v1665_v38  ;;  %v1546_v40 = vpop.permute.xlu1 %1545 }
 0x92e   :  { %v1559_v48 = vmul.f32 %v2987_v19, %v1546_v40 }
 0x92f   :  { %2157 = vmatprep.subr.bf16.mxu0 %v2156_v26 }
 0x930   :  { %v1563_v49 = vadd.f32 %v1559_v48, %v1546_v40  ;;  %2159 = vmatpush3.bf16.msra.mxu0 %v2156_v26 }
 0x931   :  { %v1551_v54 = vpop.permute.xlu1 %1550 }
 0x932   :  { %1567 = vst [vmem:[%s3150_s18 + $0x10] sm:$0xff] %v1563_v49  ;;  %v1560_v44 = vmul.f32 %v1551_v54, %v2996_v1  ;;  %v1541_v59 = vpop.permute.xlu0 %1540 }
 0x933   :  { %v1558_v50 = vmul.f32 %v1541_v59, %v2990_v45  ;;  %2027 = vmatmul.mubr.msk.f32.vlgmr.msra.gmra.mrb[12].mxu0 %vm312_vm0, %v3007_v3 }
 0x934   :  { %v1564_v63 = vadd.f32 %v1560_v44, %v1551_v54  ;;  %2029 = vmatprep.mubr.msk.f32.mxu0 %vm312_vm0, %v3013_v4 }
 0x935   :  { %v1562_v19 = vadd.f32 %v1558_v50, %v1541_v59 }
 0x936   :  { %1568 = vst [vmem:[%s3150_s18 + $0x20] sm:$0xff] %v1564_v63  ;;  %v1556_v0 = vpop.permute.xlu0 %1555 }
 0x937   :  { %1566 = vst [vmem:[%s3150_s18] sm:$0xff] %v1562_v19  ;;  %v1561_v1 = vmul.f32 %v2993_v46, %v1556_v0  ;;  %2030 = vmatmul.mubr.msk.f32.gmra.mrb[14].mxu0 %vm312_vm0, %v3023_v62 }
 0x939   :  { %v1565_v45 = vadd.f32 %v1561_v1, %v1556_v0 }
 0x93b   :  { %1569 = vst [vmem:[%s3150_s18 + $0x30] sm:$0xff] %v1565_v45 }
 0xa06   :  { %v2028_v56 = vpop.f32.mrb[12].mxu0 }
 0xa07   :  { %v1759_v57 = vadd.f32 %v2028_v56, %v3057_v2  ;;  %v1753_v3 = vpop.f32.mrb[13].mxu0 }
 0xa08   :  { %v1754_v4 = vadd.f32 %v1753_v3, %v3069_v35 }
 0xa09   :  { %v1869_v7 = vmul.f32 -1.442695, %v1759_v57 }
 0xa0a   :  { %v1868_v41 = vmul.f32 -1.442695, %v1754_v4  ;;  %v2031_v42 = vpop.f32.mrb[14].mxu0 }
 0xa0b   :  { %2271 = vpow2.f32 %v1869_v7  ;;  %v1769_v46 = vadd.f32 %v2031_v42, %v3075_v9  ;;  %v1763_v47 = vpop.f32.mrb[15].mxu0 }
 0xa0c   :  { %2273 = vpow2.f32 %v1868_v41  ;;  %v1764_v62 = vadd.f32 %v1763_v47, %v3062_v11 }
 0xa0d   :  { %v1871_v52 = vmul.f32 -1.442695, %v1769_v46 }
 0xa0e   :  { %v1870_v55 = vmul.f32 -1.442695, %v1764_v62 }
 0xa0f   :  { %2275 = vpow2.f32 %v1871_v52 }
 0xa10   :  { %2277 = vpow2.f32 %v1870_v55 }
 0xa15   :  { %v2272_v58 = vpop.eup %2271 }
 0xa16   :  { %v2274_v51 = vpop.eup %2273  ;;  %v1785_v2 = vadd.f32 1.0, %v2272_v58 }
 0xa17   :  { %v1784_v22 = vadd.f32 1.0, %v2274_v51 }
 0xa18   :  { %2279 = vrcp.f32 %v1785_v2 }
 0xa19   :  { %v2276_v28 = vpop.eup %2275  ;;  %2281 = vrcp.f32 %v1784_v22 }
 0xa1a   :  { %v2278_v35 = vpop.eup %2277  ;;  %v1787_v53 = vadd.f32 1.0, %v2276_v28 }
 0xa1b   :  { %v1786_v43 = vadd.f32 1.0, %v2278_v35 }
 0xa1c   :  { %2283 = vrcp.f32 %v1787_v53 }
 0xa1d   :  { %2285 = vrcp.f32 %v1786_v43 }
 0xa22   :  { %v2280_v60 = vpop.eup %2279 }
 0xa23   :  { %v2282_v9 = vpop.eup %2281  ;;  %1803 = vperm.xlu0 %2197, %v2280_v60  }
 0xa24   :  { %1798 = vperm.xlu1 %2198, %v2282_v9  }
 0xa26   :  { %v2284_v11 = vpop.eup %2283 }
 0xa27   :  { %v2286_v10 = vpop.eup %2285  ;;  %1813 = vperm.xlu0 %2197, %v2284_v11  }
 0xa28   :  { %1808 = vperm.xlu1 %2198, %v2286_v10  }
 0xaa2   :  { %v1804_v8 = vpop.permute.xlu0 %1803 }
 0xaa3   :  { %v1817_v12 = vmul.f32 %v3078_v61, %v1804_v8  ;;  %v1799_v14 = vpop.permute.xlu1 %1798 }
 0xaa4   :  { %v1816_v18 = vmul.f32 %v1799_v14, %v3081_v13 }
 0xaa5   :  { %v1821_v5 = vadd.f32 %v1817_v12, %v1804_v8 }
 0xaa6   :  { %v1820_v23 = vadd.f32 %v1816_v18, %v1799_v14  ;;  %v1814_v6 = vpop.permute.xlu0 %1813 }
 0xaa7   :  { %1825 = vst [vmem:[%s3150_s18 + $0x18] sm:$0xff] %v1821_v5  ;;  %v1819_v21 = vmul.f32 %v3084_v15, %v1814_v6  ;;  %v1809_v24 = vpop.permute.xlu1 %1808 }
 0xaa8   :  { %1824 = vst [vmem:[%s3150_s18 + $0x8] sm:$0xff] %v1820_v23  ;;  %v1818_v25 = vmul.f32 %v1809_v24, %v3087_v17 }
 0xaa9   :  { %v1823_v61 = vadd.f32 %v1819_v21, %v1814_v6 }
 0xaaa   :  { %v1822_v27 = vadd.f32 %v1818_v25, %v1809_v24 }
 0xaab   :  { %1827 = vst [vmem:[%s3150_s18 + $0x38] sm:$0xff] %v1823_v61 }
 0xaac   :  { %1826 = vst [vmem:[%s3150_s18 + $0x28] sm:$0xff] %v1822_v27 }

// kernel: forward.2
= control target key start
LH: loop header
LB: loop body
LE: loop exit
PB: predicated region body
PF: predicated region fallthrough
CT: control target
= control target key end

     0   :  { %v6946_v3 = vmov 0.0   ;;  %s4772_s20 = smov 1   ;;  %vm243_vm0 = vcmask 130048   ;;  %v4774_v23 = vmov 0   ;;  %v97_v28 = vlaneseq  ;;  %s6924_s0 = inlined_call_operand.vmem [shape: f32[16,768], index: 0, kind: input, shape index: {}]   ;;  %s6925_s4 = inlined_call_operand.vmem [shape: f32[32,16], index: 4, kind: input, shape index: {}]   ;;  %s6926_s6 = inlined_call_operand.vmem [shape: f32[32,1], index: 6, kind: input, shape index: {}]   ;;  %s6927_s1 = inlined_call_operand.vmem [shape: f32[1,768], index: 1, kind: input, shape index: {}]   ;;  %s6928_s3 = inlined_call_operand.vmem [shape: f32[32,16], index: 3, kind: input, shape index: {}]   ;;  %s6929_s2 = inlined_call_operand.vmem [shape: f32[1,768], index: 2, kind: input, shape index: {}]   ;;  %s6930_s5 = inlined_call_operand.vmem [shape: f32[32,16], index: 5, kind: input, shape index: {}]   ;;  %s6931_s7 = inlined_call_operand.vmem [shape: f32[32,1], index: 7, kind: input, shape index: {}]   ;;  %s6932_s8 = inlined_call_operand.vmem [shape: f32[32,1], index: 8, kind: input, shape index: {}]   ;;  %s6933_s10 = inlined_call_operand.vmem [shape: f32[32,32], index: 10, kind: input, shape index: {}]   ;;  %s6934_s12 = inlined_call_operand.vmem [shape: f32[32,1], index: 12, kind: input, shape index: {}]   ;;  %s6935_s14 = inlined_call_operand.vmem [shape: f32[32,1], index: 14, kind: input, shape index: {}]   ;;  %s6936_s9 = inlined_call_operand.vmem [shape: f32[32,32], index: 9, kind: input, shape index: {}]   ;;  %s6937_s11 = inlined_call_operand.vmem [shape: f32[32,32], index: 11, kind: input, shape index: {}]   ;;  %s6938_s13 = inlined_call_operand.vmem [shape: f32[32,16], index: 13, kind: input, shape index: {}]   ;;  %s6939_s17 = inlined_call_operand.vmem [shape: f32[384,128], index: 17, kind: input, shape index: {}]   ;;  %s6940_s15 = inlined_call_operand.vmem [shape: f32[32,32], index: 15, kind: input, shape index: {}]   ;;  %s6941_s16 = inlined_call_operand.vmem [shape: f32[32,1], index: 16, kind: input, shape index: {}]   ;;  %s6942_s18 = inlined_call_operand.vmem [shape: f32[32,256], index: 18, kind: output, shape index: {}]  }
   0x1   :  { %6981 = sst [smem:[#allocation9_spill]] %s6924_s0  ;;  %320 = vmatprep.mubr.f32.mxu0 %v6946_v3  ;;  %415 = vmatprep.mubr.f32.mxu1 %v6946_v3  ;;  %v71_v32 = vld [vmem:[%s6927_s1] sm:$0x3f]  ;;  %vm1646_vm3 = vcmask 261120  }
   0x2   :  { %6982 = sst [smem:[#allocation10_spill]] %s6925_s4  ;;  %s6984_s29 = sld [smem:[#allocation9_spill]]  ;;  %4609 = vset.pattern.permute.xlu0 %v4774_v23  ;;  %4610 = vset.pattern.permute.xlu1 %v4774_v23  ;;  %v5026_v29 = vshrl.u32 %v97_v28, 7  ;;  %v5028_v30 = vand.u32 127, %v97_v28  ;;  %v235_v63 = vld [vmem:[%s6928_s3] sm:$0xff] }
   0x3   :  { %6983 = sst [smem:[#allocation11_spill]] %s6926_s6  ;;  %s6986_s4 = sld [smem:[#allocation10_spill]] }
   0x4   :  { %s6991_s23 = sld [smem:[#allocation11_spill]]  ;;  %v119_v31 = vsub.s32 1, %v5026_v29  ;;  %vm99_vm1 = vcmp.lt.s32.totalorder %v5028_v30, 1  ;;  %v115_v36 = vsub.s32 0, %v5026_v29  ;;  %v135_v44 = vsub.s32 5, %v5026_v29 }
   0x5   :  { %v131_v53 = vsub.s32 4, %v5026_v29  ;;  %v123_v59 = vsub.s32 2, %v5026_v29  ;;  %vm179_vm2 = vcmp.lt.s32.totalorder %v5028_v30, 127  ;;  %vm3011_vm4 = vcmp.lt.s32.totalorder %v5028_v30, 126 }
   0x6   :  { %v5037_v35 = vrot.slane %v71_v32, %v119_v31  ;;  %v5048_v43 = vrot.slane %v71_v32, %v115_v36  ;;  %v5059_v52 = vrot.slane %v71_v32, %v135_v44 }
   0x7   :  { %v5071_v62 = vrot.slane %v71_v32, %v131_v53 }
   0x8   :  { %v4874_v0 = vld [vmem:[%s6984_s29 + $0x8] sm:$0xff]  ;;  %v4879_v1 = vld [vmem:[%s6984_s29] sm:$0xff]  ;;  %v66_v2 = vld [vmem:[%s6984_s29 + $0x38] sm:$0xff] }
   0x9   :  { %77 = vrot.lane.b32.xlu1 %v4874_v0, %s4772_s20  ;;  %73 = vrot.lane.b32.xlu0 %v4879_v1, %s4772_s20  ;;  %v4893_v4 = vld [vmem:[%s6984_s29 + $0x30] sm:$0xff]  ;;  %v4896_v5 = vpack.c.bf16 %v66_v2, %v4874_v0  ;;  %v4905_v7 = vld [vmem:[%s6984_s29 + $0x48] sm:$0xff] }
   0xa   :  { %v4900_v6 = vpack.c.bf16 %v4893_v4, %v4879_v1  ;;  %v4910_v8 = vld [vmem:[%s6984_s29 + $0x18] sm:$0xff]  ;;  %v67_v9 = vld [vmem:[%s6984_s29 + $0x40] sm:$0xff]  ;;  %v61_v10 = vld [vmem:[%s6984_s29 + $0x10] sm:$0xff] }
   0xb   :  { %4171 = vmatprep.subr.bf16.mxu0 %v4896_v5  ;;  %v239_v11 = vld [vmem:[%s6986_s4] sm:$0xff]  ;;  %v4925_v12 = vpack.c.bf16 %v4905_v7, %v4910_v8  ;;  %v70_v13 = vld [vmem:[%s6984_s29 + $0x58] sm:$0xff]  ;;  %v64_v14 = vld [vmem:[%s6984_s29 + $0x28] sm:$0xff]  ;;  %v4936_v15 = vpack.c.bf16 %v67_v9, %v61_v10 }
   0xc   :  { %6985 = vst [vmem:[#allocation2_spill] sm:$0xff] %v4900_v6  ;;  %4173 = vmatpush1.bf16.msra.mxu0 %v4900_v6  ;;  %v4939_v16 = vpack.c.bf16 %v70_v13, %v64_v14  ;;  %v240_v17 = vld [vmem:[%s6986_s4 + $0x8] sm:$0xff]  ;;  %v69_v18 = vld [vmem:[%s6984_s29 + $0x50] sm:$0xff]  ;;  %v63_v19 = vld [vmem:[%s6984_s29 + $0x20] sm:$0xff] }
   0xd   :  { %6987 = vst [vmem:[#allocation3_spill] sm:$0xff] %v4925_v12  ;;  %79 = vrot.lane.b32.xlu1 %v66_v2, %s4772_s20  ;;  %75 = vrot.lane.b32.xlu0 %v4893_v4, %s4772_s20  ;;  %6988 = vst [vmem:[#allocation4_spill] sm:$0xff] %v4936_v15  ;;  %v241_v20 = vld [vmem:[%s6986_s4 + $0x10] sm:$0xff]  ;;  %v242_v21 = vld [vmem:[%s6986_s4 + $0x18] sm:$0xff]  ;;  %v4979_v22 = vpack.c.bf16 %v69_v18, %v63_v19  ;;  %s4773_s4 = smov 127  }
   0xe   :  { %4175 = vmatprep.subr.bf16.mxu0 %v4925_v12  ;;  %6989 = vst [vmem:[#allocation5_spill] sm:$0xff] %v4939_v16  ;;  %4434 = vmatprep.subr.bf16.mxu1 %v4925_v12  ;;  %v1109_v24 = vld [vmem:[%s6991_s23] sm:$0xff]  ;;  %v1110_v25 = vld [vmem:[%s6991_s23 + $0x8] sm:$0xff]  ;;  %v1111_v26 = vld [vmem:[%s6991_s23 + $0x10] sm:$0xff] }
   0xf   :  { %3822 = vmatmul.mubr.msk.f32.vlgmr.msra.gmra.mrb[0].mxu0 %vm243_vm0, %v239_v11  ;;  %4435 = vmatpush1.bf16.msra.mxu1 %v4936_v15  ;;  %6990 = vst [vmem:[#allocation6_spill] sm:$0xff] %v4979_v22  ;;  %v1112_v27 = vld [vmem:[%s6991_s23 + $0x18] sm:$0xff] }
  0x10   :  { %326 = vmatprep.mubr.f32.mxu0 %v6946_v3  ;;  %4177 = vmatpush1.bf16.msra.mxu0 %v4936_v15 }
  0x11   :  { %95 = vrot.lane.b32.xlu1 %v70_v13, %s4772_s20  ;;  %93 = vrot.lane.b32.xlu0 %v64_v14, %s4772_s20 }
  0x12   :  { %4179 = vmatprep.subr.bf16.mxu0 %v4939_v16  ;;  %3827 = vmatmul.mubr.msk.f32.vlgmr.msra.gmra.mrb[0].mxu1 %vm243_vm0, %v240_v17 }
  0x13   :  { %3823 = vmatmul.mubr.msk.f32.gmra.mrb[2].mxu0 %vm243_vm0, %v240_v17  ;;  %421 = vmatprep.mubr.f32.mxu1 %v6946_v3 }
  0x14   :  { %332 = vmatprep.mubr.f32.mxu0 %v6946_v3 }
  0x15   :  { %91 = vrot.lane.b32.xlu1 %v69_v18, %s4772_s20  ;;  %89 = vrot.lane.b32.xlu0 %v63_v19, %s4772_s20 }
  0x16   :  { %3828 = vmatmul.mubr.msk.f32.gmra.mrb[2].mxu1 %vm243_vm0, %v241_v20 }
  0x17   :  { %3824 = vmatmul.mubr.msk.f32.gmra.mrb[4].mxu0 %vm243_vm0, %v241_v20  ;;  %427 = vmatprep.mubr.f32.mxu1 %v6946_v3 }
  0x18   :  { %338 = vmatprep.mubr.f32.mxu0 %v6946_v3 }
  0x19   :  { %87 = vrot.lane.b32.xlu1 %v4905_v7, %s4772_s20  ;;  %85 = vrot.lane.b32.xlu0 %v4910_v8, %s4772_s20 }
  0x1a   :  { %3829 = vmatmul.mubr.msk.f32.gmra.mrb[4].mxu1 %vm243_vm0, %v242_v21 }
  0x1b   :  { %3825 = vmatmul.mubr.msk.f32.gmra.mrb[6].mxu0 %vm243_vm0, %v242_v21  ;;  %688 = vmatprep.mubr.f32.mxu1 %v6946_v3 }
  0x1c   :  { %409 = vmatprep.mubr.f32.mxu0 %v6946_v3 }
  0x1d   :  { %83 = vrot.lane.b32.xlu1 %v67_v9, %s4772_s20  ;;  %81 = vrot.lane.b32.xlu0 %v61_v10, %s4772_s20 }
  0x1f   :  { %3826 = vmatmul.mubr.msk.f32.vlgmr.msra.gmra.mrb[8].mxu0 %vm243_vm0, %v239_v11 }
  0x20   :  { %4181 = vmatpush1.bf16.msra.mxu0 %v4979_v22  ;;  %498 = vmatprep.mubr.f32.mxu0 %v6946_v3 }
  0x21   :  { %161 = vrot.lane.b32.xlu1 %v66_v2, %s4773_s4  ;;  %159 = vrot.lane.b32.xlu0 %v4874_v0, %s4773_s4  ;;  %v127_v0 = vsub.s32 3, %v5026_v29 }
  0x23   :  { %3830 = vmatmul.mubr.msk.f32.vlgmr.msra.gmra.mrb[10].mxu0 %vm243_vm0, %v239_v11 }
  0x24   :  { %504 = vmatprep.mubr.f32.mxu0 %v6946_v3 }
  0x25   :  { %165 = vrot.lane.b32.xlu1 %v67_v9, %s4773_s4  ;;  %163 = vrot.lane.b32.xlu0 %v61_v10, %s4773_s4  ;;  %v5084_v9 = vrot.slane %v71_v32, %v123_v59 }
  0x27   :  { %3831 = vmatmul.mubr.msk.f32.gmra.mrb[12].mxu0 %vm243_vm0, %v240_v17 }
  0x28   :  { %510 = vmatprep.mubr.f32.mxu0 %v6946_v3 }
  0x29   :  { %157 = vrot.lane.b32.xlu1 %v4893_v4, %s4773_s4  ;;  %155 = vrot.lane.b32.xlu0 %v4879_v1, %s4773_s4 }
  0x2b   :  { %3832 = vmatmul.mubr.msk.f32.gmra.mrb[14].mxu0 %vm243_vm0, %v241_v20 }
  0x2c   :  { %516 = vmatprep.mubr.f32.mxu0 %v6946_v3 }
  0x2d   :  { %169 = vrot.lane.b32.xlu1 %v4905_v7, %s4773_s4  ;;  %167 = vrot.lane.b32.xlu0 %v4910_v8, %s4773_s4 }
  0x2f   :  { %3833 = vmatmul.mubr.msk.f32.gmra.mrb[16].mxu0 %vm243_vm0, %v242_v21 }
  0x30   :  { %599 = vmatprep.mubr.f32.mxu0 %v6946_v3 }
  0x31   :  { %173 = vrot.lane.b32.xlu1 %v69_v18, %s4773_s4  ;;  %171 = vrot.lane.b32.xlu0 %v63_v19, %s4773_s4 }
  0x35   :  { %177 = vrot.lane.b32.xlu1 %v70_v13, %s4773_s4  ;;  %175 = vrot.lane.b32.xlu0 %v64_v14, %s4773_s4  ;;  %v5090_v13 = vrot.slane %v71_v32, %v127_v0  ;;  %v236_v14 = vld [vmem:[%s6928_s3 + $0x8] sm:$0xff]  ;;  %v237_v32 = vld [vmem:[%s6928_s3 + $0x10] sm:$0xff] }
  0x39   :  { %1115 = vperm.xlu0 %4609, %v1109_v24   ;;  %1120 = vperm.xlu1 %4610, %v1110_v25  }
  0x3d   :  { %1125 = vperm.xlu1 %4610, %v1111_v26   ;;  %1130 = vperm.xlu0 %4609, %v1112_v27  }
  0x7b   :  { %v78_v33 = vpop.permute.xlu1 %77  ;;  %v74_v34 = vpop.permute.xlu0 %73 }
  0x7c   :  { %v108_v37 = vsel %vm99_vm1, %v74_v34, %v78_v33 }
  0x7d   :  { %v144_v41 = vmul.f32 %v5037_v35, %v108_v37 }
  0x7f   :  { %v80_v38 = vpop.permute.xlu1 %79  ;;  %v76_v39 = vpop.permute.xlu0 %75 }
  0x80   :  { %v109_v40 = vsel %vm99_vm1, %v76_v39, %v80_v38 }
  0x81   :  { %v150_v42 = vmul.f32 %v5037_v35, %v109_v40 }
  0x83   :  { %v96_v45 = vpop.permute.xlu1 %95  ;;  %v94_v46 = vpop.permute.xlu0 %93  ;;  %v4182_v47 = vpack.c.bf16 %v150_v42, %v144_v41  ;;  %v238_v41 = vld [vmem:[%s6928_s3 + $0x18] sm:$0xff] }
  0x84   :  { %v111_v48 = vsel %vm99_vm1, %v96_v45, %v76_v39  ;;  %v110_v49 = vsel %vm99_vm1, %v94_v46, %v74_v34 }
  0x85   :  { %v149_v50 = vmul.f32 %v5048_v43, %v111_v48  ;;  %v143_v51 = vmul.f32 %v5048_v43, %v110_v49  ;;  %4183 = vmatprep.subr.bf16.mxu0 %v4182_v47 }
  0x87   :  { %v4184_v54 = vpack.c.bf16 %v149_v50, %v143_v51  ;;  %v92_v55 = vpop.permute.xlu1 %91  ;;  %v90_v56 = vpop.permute.xlu0 %89 }
  0x88   :  { %v101_v57 = vsel %vm99_vm1, %v92_v55, %v96_v45  ;;  %v100_v58 = vsel %vm99_vm1, %v90_v56, %v94_v46 }
  0x89   :  { %v154_v60 = vmul.f32 %v5059_v52, %v101_v57  ;;  %v148_v61 = vmul.f32 %v5059_v52, %v100_v58  ;;  %4185 = vmatpush1.bf16.msra.mxu0 %v4184_v54 }
  0x8b   :  { %v88_v1 = vpop.permute.xlu1 %87  ;;  %v86_v2 = vpop.permute.xlu0 %85  ;;  %v4190_v4 = vpack.c.bf16 %v154_v60, %v148_v61 }
  0x8c   :  { %v103_v7 = vsel %vm99_vm1, %v88_v1, %v92_v55  ;;  %v102_v8 = vsel %vm99_vm1, %v86_v2, %v90_v56  ;;  %3834 = vmatmul.mubr.msk.f32.vlgmr.msra.gmra.mrb[0].mxu0 %vm243_vm0, %v235_v63 }
  0x8d   :  { %v153_v10 = vmul.f32 %v5071_v62, %v103_v7  ;;  %v147_v11 = vmul.f32 %v5071_v62, %v102_v8  ;;  %4191 = vmatprep.subr.bf16.mxu0 %v4190_v4  ;;  %605 = vmatprep.mubr.f32.mxu0 %v6946_v3 }
  0x8f   :  { %v4192_v17 = vpack.c.bf16 %v153_v10, %v147_v11  ;;  %v84_v18 = vpop.permute.xlu1 %83  ;;  %v82_v19 = vpop.permute.xlu0 %81 }
  0x90   :  { %v105_v20 = vsel %vm99_vm1, %v84_v18, %v88_v1  ;;  %v107_v21 = vsel %vm99_vm1, %v80_v38, %v84_v18  ;;  %v104_v23 = vsel %vm99_vm1, %v82_v19, %v86_v2  ;;  %v106_v24 = vsel %vm99_vm1, %v78_v33, %v82_v19  ;;  %3835 = vmatmul.mubr.msk.f32.gmra.mrb[2].mxu0 %vm243_vm0, %v236_v14  ;;  %v72_v33 = vld [vmem:[%s6929_s2] sm:$0x3f]  ;;  %s4775_s2 = smov 126  }
  0x91   :  { %v151_v25 = vmul.f32 %v5084_v9, %v107_v21  ;;  %v152_v26 = vmul.f32 %v5090_v13, %v105_v20  ;;  %v145_v27 = vmul.f32 %v5084_v9, %v106_v24  ;;  %v146_v28 = vmul.f32 %v5090_v13, %v104_v23  ;;  %611 = vmatprep.mubr.f32.mxu0 %v6946_v3 }
  0x92   :  { %4193 = vmatpush1.bf16.msra.mxu0 %v4192_v17  ;;  %v5120_v40 = vrot.slane %v72_v33, %v119_v31  ;;  %v5135_v49 = vrot.slane %v72_v33, %v115_v36  ;;  %v5151_v60 = vrot.slane %v72_v33, %v123_v59  ;;  %v5161_v4 = vrot.slane %v72_v33, %v127_v0 }
  0x93   :  { %v4188_v34 = vpack.c.bf16 %v151_v25, %v145_v27  ;;  %v162_v37 = vpop.permute.xlu1 %161  ;;  %v160_v38 = vpop.permute.xlu0 %159  ;;  %v4186_v39 = vpack.c.bf16 %v152_v26, %v146_v28  ;;  %v5177_v18 = vrot.slane %v72_v33, %v131_v53  ;;  %v5181_v19 = vrot.slane %v72_v33, %v135_v44  ;;  %v802_v33 = vld [vmem:[%s6930_s5] sm:$0xff] }
  0x94   :  { %3836 = vmatmul.mubr.msk.f32.gmra.mrb[4].mxu0 %vm243_vm0, %v237_v32 }
  0x95   :  { %4187 = vmatprep.subr.bf16.mxu1 %v4186_v39  ;;  %617 = vmatprep.mubr.f32.mxu0 %v6946_v3  ;;  %v804_v39 = vld [vmem:[%s6930_s5 + $0x10] sm:$0xff] }
  0x96   :  { %4189 = vmatpush1.bf16.msra.mxu1 %v4188_v34 }
  0x97   :  { %v166_v42 = vpop.permute.xlu1 %165  ;;  %v164_v45 = vpop.permute.xlu0 %163 }
  0x98   :  { %v187_v46 = vsel %vm179_vm2, %v162_v37, %v166_v42  ;;  %v186_v47 = vsel %vm179_vm2, %v160_v38, %v164_v45  ;;  %3837 = vmatmul.mubr.msk.f32.gmra.mrb[6].mxu0 %vm243_vm0, %v238_v41 }
  0x99   :  { %v230_v31 = vmul.f32 %v5120_v40, %v187_v46  ;;  %v224_v48 = vmul.f32 %v5120_v40, %v186_v47  ;;  %777 = vmatprep.mubr.f32.mxu0 %v6946_v3  ;;  %3838 = vmatmul.mubr.msk.f32.vlgmr.msra.gmra.mrb[6].mxu1 %vm243_vm0, %v235_v63 }
  0x9a   :  { %694 = vmatprep.mubr.f32.mxu1 %v6946_v3 }
  0x9b   :  { %v158_v50 = vpop.permute.xlu1 %157  ;;  %v156_v51 = vpop.permute.xlu0 %155  ;;  %v4194_v54 = vpack.c.bf16 %v230_v31, %v224_v48 }
  0x9c   :  { %v189_v55 = vsel %vm179_vm2, %v158_v50, %v162_v37  ;;  %v188_v56 = vsel %vm179_vm2, %v156_v51, %v160_v38  ;;  %3842 = vmatmul.mubr.msk.f32.vlgmr.msra.gmra.mrb[10].mxu0 %vm243_vm0, %v235_v63  ;;  %v803_v38 = vld [vmem:[%s6930_s5 + $0x8] sm:$0xff] }
  0x9d   :  { %v229_v36 = vmul.f32 %v5135_v49, %v189_v55  ;;  %v223_v57 = vmul.f32 %v5135_v49, %v188_v56  ;;  %783 = vmatprep.mubr.f32.mxu0 %v6946_v3  ;;  %4195 = vmatprep.subr.bf16.mxu0 %v4194_v54 }
  0x9e   :  { %3839 = vmatmul.mubr.msk.f32.gmra.mrb[0].mxu1 %vm243_vm0, %v236_v14 }
  0x9f   :  { %v4196_v58 = vpack.c.bf16 %v229_v36, %v223_v57  ;;  %v170_v61 = vpop.permute.xlu1 %169  ;;  %v168_v1 = vpop.permute.xlu0 %167  ;;  %700 = vmatprep.mubr.f32.mxu1 %v6946_v3 }
  0xa0   :  { %v185_v63 = vsel %vm179_vm2, %v166_v42, %v170_v61  ;;  %v184_v2 = vsel %vm179_vm2, %v164_v45, %v168_v1  ;;  %3843 = vmatmul.mubr.msk.f32.gmra.mrb[12].mxu0 %vm243_vm0, %v236_v14 }
  0xa1   :  { %4197 = vmatpush1.bf16.msra.mxu0 %v4196_v58  ;;  %789 = vmatprep.mubr.f32.mxu0 %v6946_v3  ;;  %v231_v59 = vmul.f32 %v5151_v60, %v185_v63  ;;  %v225_v7 = vmul.f32 %v5151_v60, %v184_v2 }
  0xa2   :  { %3840 = vmatmul.mubr.msk.f32.gmra.mrb[2].mxu1 %vm243_vm0, %v237_v32 }
  0xa3   :  { %v174_v8 = vpop.permute.xlu1 %173  ;;  %v172_v10 = vpop.permute.xlu0 %171  ;;  %706 = vmatprep.mubr.f32.mxu1 %v6946_v3  ;;  %v4200_v20 = vpack.c.bf16 %v231_v59, %v225_v7 }
  0xa4   :  { %v183_v11 = vsel %vm179_vm2, %v170_v61, %v174_v8  ;;  %v182_v14 = vsel %vm179_vm2, %v168_v1, %v172_v10  ;;  %3844 = vmatmul.mubr.msk.f32.gmra.mrb[14].mxu0 %vm243_vm0, %v237_v32 }
  0xa5   :  { %v232_v0 = vmul.f32 %v5161_v4, %v183_v11  ;;  %v226_v17 = vmul.f32 %v5161_v4, %v182_v14  ;;  %795 = vmatprep.mubr.f32.mxu0 %v6946_v3 }
  0xa6   :  { %3841 = vmatmul.mubr.msk.f32.gmra.mrb[4].mxu1 %vm243_vm0, %v238_v41 }
  0xa7   :  { %v178_v21 = vpop.permute.xlu1 %177  ;;  %v176_v23 = vpop.permute.xlu0 %175  ;;  %v4198_v24 = vpack.c.bf16 %v232_v0, %v226_v17  ;;  %971 = vmatprep.mubr.f32.mxu1 %v6946_v3 }
  0xa8   :  { %v181_v25 = vsel %vm179_vm2, %v174_v8, %v178_v21  ;;  %v191_v53 = vsel %vm179_vm2, %v178_v21, %v158_v50  ;;  %v180_v29 = vsel %vm179_vm2, %v172_v10, %v176_v23  ;;  %v190_v44 = vsel %vm179_vm2, %v176_v23, %v156_v51  ;;  %3845 = vmatmul.mubr.msk.f32.gmra.mrb[16].mxu0 %vm243_vm0, %v238_v41  ;;  %v805_v41 = vld [vmem:[%s6930_s5 + $0x18] sm:$0xff] }
  0xa9   :  { %v233_v26 = vmul.f32 %v5177_v18, %v181_v25  ;;  %v234_v27 = vmul.f32 %v5181_v19, %v191_v53  ;;  %v227_v28 = vmul.f32 %v5177_v18, %v180_v29  ;;  %v228_v32 = vmul.f32 %v5181_v19, %v190_v44  ;;  %4199 = vmatprep.subr.bf16.mxu1 %v4198_v24 }
  0xaa   :  { %4201 = vmatpush1.bf16.msra.mxu1 %v4200_v20  ;;  %882 = vmatprep.mubr.f32.mxu0 %v6946_v3 }
  0xab   :  { %v4204_v34 = vpack.c.bf16 %v233_v26, %v227_v28  ;;  %v4202_v37 = vpack.c.bf16 %v234_v27, %v228_v32 }
  0xac   :  { %3846 = vmatmul.mubr.msk.f32.vlgmr.msra.gmra.mrb[0].mxu0 %vm243_vm0, %v802_v33 }
  0xad   :  { %3850 = vmatmul.mubr.msk.f32.vlgmr.msra.gmra.mrb[6].mxu1 %vm243_vm0, %v802_v33  ;;  %4203 = vmatprep.subr.bf16.mxu0 %v4202_v37 }
  0xae   :  { %888 = vmatprep.mubr.f32.mxu0 %v6946_v3  ;;  %977 = vmatprep.mubr.f32.mxu1 %v6946_v3 }
  0xaf   :  { %4205 = vmatpush1.bf16.msra.mxu0 %v4204_v34 }
  0xb0   :  { %3847 = vmatmul.mubr.msk.f32.gmra.mrb[2].mxu0 %vm243_vm0, %v803_v38 }
  0xb1   :  { %3851 = vmatmul.mubr.msk.f32.gmra.mrb[0].mxu1 %vm243_vm0, %v803_v38  ;;  %894 = vmatprep.mubr.f32.mxu0 %v6946_v3 }
  0xb2   :  { %983 = vmatprep.mubr.f32.mxu1 %v6946_v3 }
  0xb4   :  { %3848 = vmatmul.mubr.msk.f32.gmra.mrb[4].mxu0 %vm243_vm0, %v804_v39 }
  0xb5   :  { %3852 = vmatmul.mubr.msk.f32.gmra.mrb[2].mxu1 %vm243_vm0, %v804_v39  ;;  %900 = vmatprep.mubr.f32.mxu0 %v6946_v3 }
  0xb6   :  { %989 = vmatprep.mubr.f32.mxu1 %v6946_v3 }
  0xb8   :  { %3849 = vmatmul.mubr.msk.f32.gmra.mrb[6].mxu0 %vm243_vm0, %v805_v41  ;;  %v1116_v46 = vpop.permute.xlu0 %1115  ;;  %v1121_v36 = vpop.permute.xlu1 %1120 }
  0xb9   :  { %3853 = vmatmul.mubr.msk.f32.gmra.mrb[4].mxu1 %vm243_vm0, %v805_v41  ;;  %1060 = vmatprep.mubr.f32.mxu0 %v6946_v3 }
  0xba   :  { %1723 = vmatprep.mubr.f32.mxu1 %v6946_v3 }
  0xbc   :  { %3854 = vmatmul.mubr.msk.f32.vlgmr.msra.gmra.mrb[10].mxu0 %vm243_vm0, %v802_v33  ;;  %v1126_v14 = vpop.permute.xlu1 %1125  ;;  %v1131_v26 = vpop.permute.xlu0 %1130 }
  0xbd   :  { %1066 = vmatprep.mubr.f32.mxu0 %v6946_v3 }
  0xc0   :  { %3855 = vmatmul.mubr.msk.f32.gmra.mrb[12].mxu0 %vm243_vm0, %v803_v38 }
  0xc1   :  { %1072 = vmatprep.mubr.f32.mxu0 %v6946_v3 }
  0xc4   :  { %3856 = vmatmul.mubr.msk.f32.gmra.mrb[14].mxu0 %vm243_vm0, %v804_v39 }
  0xc5   :  { %1078 = vmatprep.mubr.f32.mxu0 %v6946_v3 }
  0xc8   :  { %3857 = vmatmul.mubr.msk.f32.gmra.mrb[16].mxu0 %vm243_vm0, %v805_v41 }
  0xf2   :  { %v411_v42 = vpop.f32.mrb[8].mxu0 }
  0xf3   :  { %v413_v45 = vpop.f32.mrb[9].mxu0 }
 0x17f   :  { %v884_v47 = vpop.f32.mrb[0].mxu0 }
 0x180   :  { %v886_v31 = vpop.f32.mrb[1].mxu0  ;;  %v973_v48 = vpop.f32.mrb[6].mxu1  ;;  %v5235_v55 = vadd.f32 %v1116_v46, %v884_v47 }
 0x181   :  { %v4436_v50 = vadd.f32 %v973_v48, %v411_v42  ;;  %v975_v51 = vpop.f32.mrb[7].mxu1  ;;  %v5237_v56 = vadd.f32 %v1116_v46, %v886_v31 }
 0x182   :  { %v4437_v54 = vadd.f32 %v975_v51, %v413_v45 }
 0x183   :  { %v890_v57 = vpop.f32.mrb[2].mxu0  ;;  %v1165_v63 = vadd.f32 %v5237_v56, %v5235_v55  ;;  %v5241_v2 = vadd.f32 %v4436_v50, %v1116_v46 }
 0x184   :  { %v892_v58 = vpop.f32.mrb[3].mxu0  ;;  %v979_v61 = vpop.f32.mrb[0].mxu1  ;;  %v5243_v59 = vadd.f32 %v1121_v36, %v890_v57  ;;  %v5248_v20 = vadd.f32 %v4437_v54, %v1116_v46 }
 0x185   :  { %v981_v1 = vpop.f32.mrb[1].mxu1  ;;  %v5245_v7 = vadd.f32 %v1121_v36, %v892_v58  ;;  %v1166_v17 = vadd.f32 %v1165_v63, %v5241_v2  ;;  %v5256_v44 = vadd.f32 %v1121_v36, %v979_v61 }
 0x186   :  { %v5266_v42 = vadd.f32 %v1121_v36, %v981_v1 }
 0x187   :  { %v896_v8 = vpop.f32.mrb[4].mxu0  ;;  %v1172_v21 = vadd.f32 %v5245_v7, %v5243_v59  ;;  %v1167_v33 = vadd.f32 %v1166_v17, %v5248_v20 }
 0x188   :  { %v898_v10 = vpop.f32.mrb[5].mxu0  ;;  %v985_v11 = vpop.f32.mrb[2].mxu1  ;;  %v5252_v24 = vadd.f32 %v1126_v14, %v896_v8 }
 0x189   :  { %v987_v0 = vpop.f32.mrb[3].mxu1  ;;  %v5254_v25 = vadd.f32 %v1126_v14, %v898_v10  ;;  %v1173_v28 = vadd.f32 %v1172_v21, %v5256_v44  ;;  %v5270_v47 = vadd.f32 %v1126_v14, %v985_v11 }
 0x18b   :  { %v902_v23 = vpop.f32.mrb[6].mxu0  ;;  %v1179_v34 = vadd.f32 %v5254_v25, %v5252_v24  ;;  %v1174_v48 = vadd.f32 %v1173_v28, %v5266_v42 }
 0x18c   :  { %v904_v53 = vpop.f32.mrb[7].mxu0  ;;  %v991_v29 = vpop.f32.mrb[4].mxu1  ;;  %v5262_v37 = vadd.f32 %v1131_v26, %v902_v23 }
 0x18d   :  { %v993_v27 = vpop.f32.mrb[5].mxu1  ;;  %v5264_v38 = vadd.f32 %v1131_v26, %v904_v53  ;;  %v1180_v51 = vadd.f32 %v1179_v34, %v5270_v47  ;;  %v5283_v63 = vadd.f32 %v1131_v26, %v991_v29 }
 0x18f   :  { %v1062_v32 = vpop.f32.mrb[10].mxu0  ;;  %v1186_v54 = vadd.f32 %v5264_v38, %v5262_v37 }
 0x190   :  { %v1137_v39 = vadd.f32 %v1116_v46, %v1062_v32  ;;  %v1064_v41 = vpop.f32.mrb[11].mxu0 }
 0x191   :  { %v5268_v45 = vadd.f32 %v1116_v46, %v1064_v41  ;;  %v5281_v46 = vadd.f32 %v1126_v14, %v987_v0  ;;  %v1187_v17 = vadd.f32 %v1186_v54, %v5283_v63  ;;  %v1159_v54 = vld [vmem:[%s6931_s7 + $0x10] sm:$0xff] }
 0x192   :  { %v1168_v31 = vadd.f32 %v1167_v33, %v1137_v39 }
 0x193   :  { %v1068_v50 = vpop.f32.mrb[12].mxu0  ;;  %v1181_v11 = vadd.f32 %v1180_v51, %v5281_v46  ;;  %v1162_v51 = vld [vmem:[%s6932_s8 + $0x8] sm:$0xff] }
 0x194   :  { %v5276_v57 = vadd.f32 %v1121_v36, %v1068_v50  ;;  %v1070_v58 = vpop.f32.mrb[13].mxu0  ;;  %v1169_v61 = vadd.f32 %v1168_v31, %v5268_v45  ;;  %v1157_v50 = vld [vmem:[%s6931_s7] sm:$0xff] }
 0x195   :  { %v5279_v1 = vadd.f32 %v1121_v36, %v1070_v58  ;;  %v5293_v36 = vadd.f32 %v1131_v26, %v993_v27  ;;  %v1158_v27 = vld [vmem:[%s6931_s7 + $0x8] sm:$0xff]  ;;  %v1160_v58 = vld [vmem:[%s6931_s7 + $0x18] sm:$0xff] }
 0x196   :  { %v1175_v8 = vadd.f32 %v1174_v48, %v5276_v57  ;;  %1170 = vadd.xlane.f32.xlu1 %v1169_v61 }
 0x197   :  { %v1074_v10 = vpop.f32.mrb[14].mxu0  ;;  %v1188_v32 = vadd.f32 %v1187_v17, %v5293_v36 }
 0x198   :  { %v5288_v21 = vadd.f32 %v1126_v14, %v1074_v10  ;;  %v1076_v23 = vpop.f32.mrb[15].mxu0  ;;  %v1176_v53 = vadd.f32 %v1175_v8, %v5279_v1 }
 0x199   :  { %v5291_v28 = vadd.f32 %v1126_v14, %v1076_v23 }
 0x19a   :  { %v1182_v0 = vadd.f32 %v1181_v11, %v5288_v21  ;;  %1177 = vadd.xlane.f32.xlu0 %v1176_v53 }
 0x19b   :  { %v1080_v29 = vpop.f32.mrb[16].mxu0 }
 0x19c   :  { %v5297_v33 = vadd.f32 %v1131_v26, %v1080_v29  ;;  %v1082_v34 = vpop.f32.mrb[17].mxu0  ;;  %v1183_v41 = vadd.f32 %v1182_v0, %v5291_v28 }
 0x19d   :  { %v5300_v31 = vadd.f32 %v1131_v26, %v1082_v34  ;;  %v1161_v26 = vld [vmem:[%s6932_s8] sm:$0xff] }
 0x19e   :  { %v1189_v48 = vadd.f32 %v1188_v32, %v5297_v33  ;;  %1184 = vadd.xlane.f32.xlu0 %v1183_v41 }
 0x1a0   :  { %v1190_v14 = vadd.f32 %v1189_v48, %v5300_v31 }
 0x1a2   :  { %1191 = vadd.xlane.f32.xlu1 %v1190_v14 }
 0x1b3   :  { %1317 = vperm.xlu1 %4610, %v1158_v27  }
 0x1b4   :  { %1312 = vperm.xlu0 %4609, %v1157_v50  }
 0x1b7   :  { %1356 = vperm.xlu1 %4610, %v1161_v26  }
 0x1b8   :  { %1361 = vperm.xlu0 %4609, %v1162_v51  }
 0x1bb   :  { %1322 = vperm.xlu1 %4610, %v1159_v54  }
 0x1bc   :  { %1327 = vperm.xlu0 %4609, %v1160_v58  }
 0x223   :  { %v1171_v61 = vpop.xlane.xlu1 %1170 }
 0x224   :  { %v1194_v8 = vmul.f32 0.0013020834, %v1171_v61 }
 0x226   :  { %v5323_v10 = vsub.f32 %v5235_v55, %v1194_v8  ;;  %v5326_v11 = vsub.f32 %v5237_v56, %v1194_v8  ;;  %v5329_v17 = vsub.f32 %v5241_v2, %v1194_v8  ;;  %v5332_v53 = vsub.f32 %v5248_v20, %v1194_v8 }
 0x227   :  { %v1178_v23 = vpop.xlane.xlu0 %1177  ;;  %v5338_v34 = vsub.f32 %v1137_v39, %v1194_v8  ;;  %v5352_v14 = vsub.f32 %v5268_v45, %v1194_v8 }
 0x228   :  { %v1195_v0 = vmul.f32 0.0013020834, %v1178_v23  ;;  %v1222_v29 = vmul.f32 %v5323_v10, %v5323_v10  ;;  %v1223_v32 = vmul.f32 %v5326_v11, %v5326_v11  ;;  %v1224_v55 = vmul.f32 %v5329_v17, %v5329_v17 }
 0x229   :  { %v1225_v39 = vmul.f32 %v5332_v53, %v5332_v53  ;;  %v1227_v23 = vmul.f32 %v5352_v14, %v5352_v14 }
 0x22a   :  { %v1246_v56 = vadd.f32 %v1223_v32, %v1222_v29  ;;  %v5343_v2 = vsub.f32 %v5243_v59, %v1195_v0  ;;  %v5346_v41 = vsub.f32 %v5245_v7, %v1195_v0  ;;  %v5349_v20 = vsub.f32 %v5256_v44, %v1195_v0 }
 0x22b   :  { %v1185_v48 = vpop.xlane.xlu0 %1184  ;;  %v5357_v27 = vsub.f32 %v5266_v42, %v1195_v0  ;;  %v1226_v44 = vmul.f32 %v5338_v34, %v5338_v34  ;;  %v5366_v45 = vsub.f32 %v5276_v57, %v1195_v0  ;;  %v5379_v29 = vsub.f32 %v5279_v1, %v1195_v0 }
 0x22c   :  { %v1196_v50 = vmul.f32 0.0013020834, %v1185_v48  ;;  %v1247_v26 = vadd.f32 %v1246_v56, %v1224_v55  ;;  %v1228_v59 = vmul.f32 %v5343_v2, %v5343_v2  ;;  %v1229_v7 = vmul.f32 %v5346_v41, %v5346_v41 }
 0x22d   :  { %v1230_v51 = vmul.f32 %v5349_v20, %v5349_v20  ;;  %v1231_v57 = vmul.f32 %v5357_v27, %v5357_v27  ;;  %v1232_v48 = vmul.f32 %v5366_v45, %v5366_v45 }
 0x22e   :  { %v1248_v54 = vadd.f32 %v1247_v26, %v1225_v39  ;;  %v1253_v42 = vadd.f32 %v1229_v7, %v1228_v59  ;;  %v5371_v58 = vsub.f32 %v5252_v24, %v1196_v50  ;;  %v5374_v61 = vsub.f32 %v5254_v25, %v1196_v50 }
 0x22f   :  { %v1192_v8 = vpop.xlane.xlu1 %1191  ;;  %v5384_v32 = vsub.f32 %v5270_v47, %v1196_v50  ;;  %v5391_v39 = vsub.f32 %v5281_v46, %v1196_v50  ;;  %v5396_v47 = vsub.f32 %v5288_v21, %v1196_v50  ;;  %v5412_v21 = vsub.f32 %v5291_v28, %v1196_v50 }
 0x230   :  { %v1197_v55 = vmul.f32 0.0013020834, %v1192_v8  ;;  %v1249_v56 = vadd.f32 %v1248_v54, %v1226_v44  ;;  %v1254_v24 = vadd.f32 %v1253_v42, %v1230_v51  ;;  %v1234_v25 = vmul.f32 %v5371_v58, %v5371_v58 }
 0x231   :  { %v1235_v1 = vmul.f32 %v5374_v61, %v5374_v61  ;;  %v1236_v7 = vmul.f32 %v5384_v32, %v5384_v32  ;;  %v1233_v54 = vmul.f32 %v5379_v29, %v5379_v29  ;;  %v1237_v8 = vmul.f32 %v5391_v39, %v5391_v39 }
 0x232   :  { %v1250_v0 = vadd.f32 %v1249_v56, %v1227_v23  ;;  %v1255_v26 = vadd.f32 %v1254_v24, %v1231_v57  ;;  %v5399_v59 = vsub.f32 %v5262_v37, %v1197_v55  ;;  %v5404_v51 = vsub.f32 %v5264_v38, %v1197_v55 }
 0x233   :  { %v1260_v44 = vadd.f32 %v1235_v1, %v1234_v25  ;;  %v5407_v46 = vsub.f32 %v5283_v63, %v1197_v55  ;;  %v5419_v38 = vsub.f32 %v5293_v36, %v1197_v55  ;;  %v1238_v56 = vmul.f32 %v5396_v47, %v5396_v47 }
 0x234   :  { %1251 = vadd.xlane.f32.xlu0 %v1250_v0  ;;  %v1256_v42 = vadd.f32 %v1255_v26, %v1232_v48  ;;  %v1240_v37 = vmul.f32 %v5399_v59, %v5399_v59  ;;  %v1241_v63 = vmul.f32 %v5404_v51, %v5404_v51  ;;  %v5426_v28 = vsub.f32 %v5297_v33, %v1197_v55 }
 0x235   :  { %v1261_v23 = vadd.f32 %v1260_v44, %v1236_v7  ;;  %v1242_v50 = vmul.f32 %v5407_v46, %v5407_v46  ;;  %v1239_v36 = vmul.f32 %v5412_v21, %v5412_v21  ;;  %v5433_v1 = vsub.f32 %v5300_v31, %v1197_v55  ;;  %v1163_v31 = vld [vmem:[%s6932_s8 + $0x10] sm:$0xff]  ;;  %v1164_v55 = vld [vmem:[%s6932_s8 + $0x18] sm:$0xff] }
 0x236   :  { %v1257_v57 = vadd.f32 %v1256_v42, %v1233_v54  ;;  %v1267_v25 = vadd.f32 %v1241_v63, %v1240_v37  ;;  %v1243_v0 = vmul.f32 %v5419_v38, %v5419_v38  ;;  %v1244_v33 = vmul.f32 %v5426_v28, %v5426_v28 }
 0x237   :  { %v1262_v24 = vadd.f32 %v1261_v23, %v1237_v8  ;;  %v1245_v54 = vmul.f32 %v5433_v1, %v5433_v1  ;;  %v5447_v8 = vpop.permute.xlu0 %1312  ;;  %v5449_v23 = vpop.permute.xlu1 %1317 }
 0x238   :  { %1258 = vadd.xlane.f32.xlu1 %v1257_v57  ;;  %v1268_v26 = vadd.f32 %v1267_v25, %v1242_v50 }
 0x239   :  { %v1263_v48 = vadd.f32 %v1262_v24, %v1238_v56 }
 0x23a   :  { %v1269_v44 = vadd.f32 %v1268_v26, %v1243_v0 }
 0x23b   :  { %v1264_v7 = vadd.f32 %v1263_v48, %v1239_v36  ;;  %v5451_v63 = vpop.permute.xlu0 %1361  ;;  %v5453_v57 = vpop.permute.xlu1 %1356 }
 0x23c   :  { %v1270_v42 = vadd.f32 %v1269_v44, %v1244_v33 }
 0x23d   :  { %1265 = vadd.xlane.f32.xlu0 %v1264_v7 }
 0x23e   :  { %v1271_v37 = vadd.f32 %v1270_v42, %v1245_v54 }
 0x23f   :  { %v5455_v56 = vpop.permute.xlu0 %1327  ;;  %v5457_v24 = vpop.permute.xlu1 %1322 }
 0x240   :  { %1272 = vadd.xlane.f32.xlu1 %v1271_v37 }
 0x251   :  { %1366 = vperm.xlu1 %4610, %v1163_v31  }
 0x253   :  { %1371 = vperm.xlu0 %4609, %v1164_v55  }
 0x2c1   :  { %v1252_v50 = vpop.xlane.xlu0 %1251 }
 0x2c2   :  { %v1274_v25 = vmul.f32 0.0013020834, %v1252_v50 }
 0x2c4   :  { %v1278_v36 = vadd.f32 1e-05, %v1274_v25 }
 0x2c5   :  { %v1259_v48 = vpop.xlane.xlu1 %1258 }
 0x2c6   :  { %4731 = vrsqrt.f32 %v1278_v36  ;;  %v1275_v0 = vmul.f32 0.0013020834, %v1259_v48 }
 0x2c8   :  { %v1279_v26 = vadd.f32 1e-05, %v1275_v0 }
 0x2ca   :  { %4733 = vrsqrt.f32 %v1279_v26  ;;  %v1266_v7 = vpop.xlane.xlu0 %1265 }
 0x2cb   :  { %v1276_v33 = vmul.f32 0.0013020834, %v1266_v7 }
 0x2cd   :  { %v1280_v44 = vadd.f32 1e-05, %v1276_v33  ;;  %v1273_v54 = vpop.xlane.xlu1 %1272 }
 0x2ce   :  { %v1277_v42 = vmul.f32 0.0013020834, %v1273_v54 }
 0x2cf   :  { %4735 = vrsqrt.f32 %v1280_v44 }
 0x2d0   :  { %v5459_v37 = vpop.eup %4731  ;;  %v1281_v31 = vadd.f32 1e-05, %v1277_v42 }
 0x2d1   :  { %v1286_v55 = vmul.f32 %v5459_v37, %v5323_v10  ;;  %v1287_v50 = vmul.f32 %v5459_v37, %v5326_v11  ;;  %v1291_v25 = vmul.f32 %v5459_v37, %v5352_v14  ;;  %v1289_v44 = vmul.f32 %v5459_v37, %v5332_v53 }
 0x2d2   :  { %4737 = vrsqrt.f32 %v1281_v31 }
 0x2d3   :  { %v1330_v36 = vmul.f32 %v5447_v8, %v1286_v55  ;;  %v1331_v48 = vmul.f32 %v5447_v8, %v1287_v50  ;;  %v1335_v26 = vmul.f32 %v5447_v8, %v1291_v25 }
 0x2d4   :  { %v5469_v0 = vpop.eup %4733 }
 0x2d5   :  { %v1374_v7 = vadd.f32 %v5453_v57, %v1330_v36  ;;  %v1375_v33 = vadd.f32 %v5453_v57, %v1331_v48  ;;  %v1292_v10 = vmul.f32 %v5469_v0, %v5343_v2  ;;  %v1293_v11 = vmul.f32 %v5469_v0, %v5346_v41 }
 0x2d6   :  { %v1297_v14 = vmul.f32 %v5469_v0, %v5379_v29  ;;  %v1379_v50 = vadd.f32 %v5453_v57, %v1335_v26  ;;  %v1295_v2 = vmul.f32 %v5469_v0, %v5357_v27  ;;  %v1333_v48 = vmul.f32 %v5447_v8, %v1289_v44 }
 0x2d7   :  { %v1398_v54 = vmul.f32 0.3, %v1374_v7  ;;  %v1336_v42 = vmul.f32 %v5449_v23, %v1292_v10  ;;  %v1337_v31 = vmul.f32 %v5449_v23, %v1293_v11  ;;  %v1399_v55 = vmul.f32 0.3, %v1375_v33 }
 0x2d8   :  { %v1341_v53 = vmul.f32 %v5449_v23, %v1297_v14  ;;  %v1339_v14 = vmul.f32 %v5449_v23, %v1295_v2 }
 0x2d9   :  { %v5487_v25 = vpop.eup %4735  ;;  %v5489_v41 = vmax.f32 %v1374_v7, %v1398_v54  ;;  %v1380_v29 = vadd.f32 %v5451_v63, %v1336_v42  ;;  %v1381_v36 = vadd.f32 %v5451_v63, %v1337_v31  ;;  %v5503_v54 = vmax.f32 %v1375_v33, %v1399_v55 }
 0x2da   :  { %v1298_v27 = vmul.f32 %v5487_v25, %v5371_v58  ;;  %v1299_v7 = vmul.f32 %v5487_v25, %v5374_v61  ;;  %v1300_v11 = vmul.f32 %v5487_v25, %v5384_v32  ;;  %v1403_v42 = vmul.f32 0.3, %v1379_v50 }
 0x2db   :  { %1446 = vrot.lane.b32.xlu1 %v5489_v41, %s4772_s20  ;;  %v1404_v10 = vmul.f32 0.3, %v1380_v29  ;;  %v1405_v26 = vmul.f32 0.3, %v1381_v36  ;;  %v1385_v22 = vadd.f32 %v5451_v63, %v1341_v53  ;;  %v1377_v33 = vadd.f32 %v5453_v57, %v1333_v48  ;;  %v5535_v48 = vpop.permute.xlu0 %1371 }
 0x2dc   :  { %v5506_v44 = vpop.eup %4737  ;;  %v1342_v58 = vmul.f32 %v5457_v24, %v1298_v27  ;;  %v1343_v32 = vmul.f32 %v5457_v24, %v1299_v7  ;;  %v1288_v55 = vmul.f32 %v5459_v37, %v5329_v17  ;;  %v1344_v53 = vmul.f32 %v5457_v24, %v1300_v11  ;;  %v5532_v17 = vpop.permute.xlu1 %1366 }
 0x2dd   :  { %v5508_v31 = vmax.f32 %v1380_v29, %v1404_v10  ;;  %v5510_v3 = vmax.f32 %v1381_v36, %v1405_v26  ;;  %v1304_v61 = vmul.f32 %v5506_v44, %v5399_v59  ;;  %v1306_v2 = vmul.f32 %v5506_v44, %v5407_v46 }
 0x2de   :  { %v1383_v46 = vadd.f32 %v5451_v63, %v1339_v14  ;;  %v5537_v10 = vmax.f32 %v1379_v50, %v1403_v42  ;;  %v1409_v26 = vmul.f32 0.3, %v1385_v22  ;;  %v1386_v27 = vadd.f32 %v5532_v17, %v1342_v58 }
 0x2df   :  { %1454 = vrot.lane.b32.xlu1 %v5503_v54, %s4772_s20  ;;  %1448 = vrot.lane.b32.xlu0 %v5508_v31, %s4772_s20  ;;  %v4206_v29 = vpack.c.bf16 %v5510_v3, %v5503_v54  ;;  %v4208_v59 = vpack.c.bf16 %v5508_v31, %v5489_v41  ;;  %v1348_v36 = vmul.f32 %v5455_v56, %v1304_v61  ;;  %v1401_v58 = vmul.f32 0.3, %v1377_v33 }
 0x2e0   :  { %v1305_v7 = vmul.f32 %v5506_v44, %v5404_v51  ;;  %v1387_v11 = vadd.f32 %v5532_v17, %v1343_v32  ;;  %v1332_v61 = vmul.f32 %v5447_v8, %v1288_v55  ;;  %v5547_v14 = vmul.f32 %v5459_v37, %v5338_v34 }
 0x2e1   :  { %4207 = vmatprep.subr.bf16.mxu1 %v4206_v29  ;;  %v1392_v16 = vadd.f32 %v5535_v48, %v1348_v36  ;;  %v1350_v50 = vmul.f32 %v5455_v56, %v1306_v2  ;;  %v1410_v51 = vmul.f32 0.3, %v1386_v27  ;;  %v5556_v32 = vadd.f32 %v5532_v17, %v1344_v53 }
 0x2e2   :  { %4209 = vmatpush1.bf16.msra.mxu1 %v4208_v59  ;;  %v1349_v42 = vmul.f32 %v5455_v56, %v1305_v7  ;;  %v1407_v55 = vmul.f32 0.3, %v1383_v46  ;;  %v1294_v34 = vmul.f32 %v5469_v0, %v5349_v20  ;;  %v5560_v37 = vmax.f32 %v1385_v22, %v1409_v26 }
 0x2e3   :  { %1486 = vrot.lane.b32.xlu1 %v5537_v10, %s4772_s20  ;;  %1456 = vrot.lane.b32.xlu0 %v5510_v3, %s4772_s20  ;;  %v1416_v29 = vmul.f32 0.3, %v1392_v16  ;;  %v5562_v2 = vmax.f32 %v1386_v27, %v1410_v51  ;;  %v1411_v36 = vmul.f32 0.3, %v1387_v11  ;;  %v1376_v12 = vadd.f32 %v5453_v57, %v1332_v61 }
 0x2e4   :  { %v1393_v59 = vadd.f32 %v5535_v48, %v1349_v42  ;;  %v1338_v7 = vmul.f32 %v5449_v23, %v1294_v34  ;;  %v1303_v53 = vmul.f32 %v5487_v25, %v5412_v21  ;;  %v1394_v6 = vadd.f32 %v5535_v48, %v1350_v50 }
 0x2e5   :  { %v5565_v15 = vmax.f32 %v1392_v16, %v1416_v29  ;;  %v1301_v16 = vmul.f32 %v5487_v25, %v5391_v39  ;;  %v1307_v20 = vmul.f32 %v5506_v44, %v5419_v38  ;;  %v5580_v26 = vmax.f32 %v1377_v33, %v1401_v58 }
 0x2e6   :  { %v1417_v22 = vmul.f32 0.3, %v1393_v59  ;;  %v5582_v27 = vmax.f32 %v1383_v46, %v1407_v55  ;;  %v1382_v21 = vadd.f32 %v5451_v63, %v1338_v7  ;;  %v1347_v61 = vmul.f32 %v5457_v24, %v1303_v53 }
 0x2e7   :  { %1488 = vrot.lane.b32.xlu0 %v5560_v37, %s4772_s20  ;;  %1450 = vrot.lane.b32.xlu1 %v5562_v2, %s4772_s20  ;;  %v5586_v50 = vmax.f32 %v1387_v11, %v1411_v36  ;;  %v1345_v42 = vmul.f32 %v5457_v24, %v1301_v16  ;;  %v1351_v29 = vmul.f32 %v5455_v56, %v1307_v20  ;;  %v1400_v38 = vmul.f32 0.3, %v1376_v12 }
 0x2e8   :  { %v5588_v51 = vmax.f32 %v1393_v59, %v1417_v22  ;;  %v4212_v39 = vpack.c.bf16 %v5565_v15, %v5562_v2  ;;  %v1406_v33 = vmul.f32 0.3, %v1382_v21  ;;  %v1391_v46 = vadd.f32 %v5532_v17, %v1347_v61 }
 0x2e9   :  { %v1389_v11 = vadd.f32 %v5532_v17, %v1345_v42  ;;  %v1395_v55 = vadd.f32 %v5535_v48, %v1351_v29  ;;  %v1418_v34 = vmul.f32 0.3, %v1394_v6  ;;  %v1309_v7 = vmul.f32 %v5506_v44, %v5433_v1 }
 0x2ea   :  { %v4210_v58 = vpack.c.bf16 %v5588_v51, %v5586_v50  ;;  %v5603_v59 = vmax.f32 %v1382_v21, %v1406_v33  ;;  %v1415_v36 = vmul.f32 0.3, %v1391_v46  ;;  %v4214_v53 = vpack.c.bf16 %v5582_v27, %v5580_v26  ;;  %v5615_v21 = vld [vmem:[%s6933_s10] sm:$0xff] }
 0x2eb   :  { %1452 = vrot.lane.b32.xlu0 %v5565_v15, %s4772_s20  ;;  %1458 = vrot.lane.b32.xlu1 %v5586_v50, %s4772_s20  ;;  %v1413_v22 = vmul.f32 0.3, %v1389_v11  ;;  %v1419_v16 = vmul.f32 0.3, %v1395_v55  ;;  %v1296_v20 = vmul.f32 %v5469_v0, %v5366_v45  ;;  %v1412_v61 = vmul.f32 0.3, %v5556_v32 }
 0x2ec   :  { %4211 = vmatprep.subr.bf16.mxu1 %v4210_v58  ;;  %v5617_v42 = vmax.f32 %v1376_v12, %v1400_v38  ;;  %v5619_v1 = vmax.f32 %v1391_v46, %v1415_v36  ;;  %v1353_v29 = vmul.f32 %v5455_v56, %v1309_v7  ;;  %v1308_v33 = vmul.f32 %v5506_v44, %v5426_v28 }
 0x2ed   :  { %4213 = vmatpush1.bf16.msra.mxu1 %v4212_v39  ;;  %v5626_v45 = vmax.f32 %v1389_v11, %v1413_v22  ;;  %v5628_v0 = vmax.f32 %v1395_v55, %v1419_v16  ;;  %v5634_v12 = vmax.f32 %v1394_v6, %v1418_v34  ;;  %v1340_v28 = vmul.f32 %v5449_v23, %v1296_v20  ;;  %v5648_v6 = vld [vmem:[%s6933_s10 + $0x8] sm:$0xff] }
 0x2ee   :  { %4215 = vmatprep.subr.bf16.mxu1 %v4214_v53  ;;  %v4216_v39 = vpack.c.bf16 %v5603_v59, %v5617_v42  ;;  %v1397_v38 = vadd.f32 %v5535_v48, %v1353_v29  ;;  %v1302_v46 = vmul.f32 %v5487_v25, %v5396_v47  ;;  %v6992_v58 = vmov 0.0  }
 0x2ef   :  { %1460 = vrot.lane.b32.xlu0 %v5588_v51, %s4772_s20  ;;  %1490 = vrot.lane.b32.xlu1 %v5619_v1, %s4772_s20  ;;  %v4218_v44 = vpack.c.bf16 %v5628_v0, %v5626_v45  ;;  %v5651_v11 = vmax.f32 %v5556_v32, %v1412_v61  ;;  %v1334_v55 = vmul.f32 %v5447_v8, %v5547_v14 }
 0x2f0   :  { %3858 = vmatmul.mubr.msk.f32.vlgmr.msra.gmra.mrb[8].mxu1 %vm1646_vm3, %v5615_v21  ;;  %v1421_v23 = vmul.f32 0.3, %v1397_v38  ;;  %v1352_v34 = vmul.f32 %v5455_v56, %v1308_v33  ;;  %v1384_v36 = vadd.f32 %v5451_v63, %v1340_v28  ;;  %v4222_v32 = vpack.c.bf16 %v5560_v37, %v5537_v10  ;;  %v1644_v56 = vld [vmem:[%s6933_s10 + $0x10] sm:$0xff] }
 0x2f1   :  { %4217 = vmatpush1.bf16.msra.mxu1 %v4216_v39  ;;  %1729 = vmatprep.mubr.f32.mxu1 %v6992_v58  ;;  %v4220_v47 = vpack.c.bf16 %v5634_v12, %v5651_v11  ;;  %v1346_v8 = vmul.f32 %v5457_v24, %v1302_v46  ;;  %v1378_v14 = vadd.f32 %v5453_v57, %v1334_v55  ;;  %v1645_v57 = vld [vmem:[%s6933_s10 + $0x18] sm:$0xff] }
 0x2f2   :  { %4219 = vmatprep.subr.bf16.mxu1 %v4218_v44  ;;  %v5658_v25 = vmax.f32 %v1397_v38, %v1421_v23  ;;  %v1396_v63 = vadd.f32 %v5535_v48, %v1352_v34  ;;  %v1408_v7 = vmul.f32 0.3, %v1384_v36 }
 0x2f3   :  { %1462 = vrot.lane.b32.xlu1 %v5617_v42, %s4772_s20  ;;  %v1390_v24 = vadd.f32 %v5532_v17, %v1346_v8  ;;  %v1402_v53 = vmul.f32 0.3, %v1378_v14 }
 0x2f4   :  { %3859 = vmatmul.mubr.msk.f32.gmra.mrb[10].mxu1 %vm1646_vm3, %v5648_v6  ;;  %1492 = vrot.lane.b32.xlu0 %v5658_v25, %s4772_s20  ;;  %v1420_v22 = vmul.f32 0.3, %v1396_v63  ;;  %v1432_v48 = vmax.f32 %v1384_v36, %v1408_v7  ;;  %v4226_v29 = vpack.c.bf16 %v5658_v25, %v5619_v1 }
 0x2f5   :  { %4221 = vmatpush1.bf16.msra.mxu1 %v4220_v47  ;;  %1735 = vmatprep.mubr.f32.mxu1 %v6992_v58  ;;  %v1414_v16 = vmul.f32 0.3, %v1390_v24  ;;  %v1426_v17 = vmax.f32 %v1378_v14, %v1402_v53 }
 0x2f6   :  { %4223 = vmatprep.subr.bf16.mxu1 %v4222_v32  ;;  %v1444_v61 = vmax.f32 %v1396_v63, %v1420_v22 }
 0x2f7   :  { %1470 = vrot.lane.b32.xlu1 %v5580_v26, %s4772_s20  ;;  %v4224_v20 = vpack.c.bf16 %v1432_v48, %v1426_v17  ;;  %v1438_v33 = vmax.f32 %v1390_v24, %v1414_v16 }
 0x2f8   :  { %3860 = vmatmul.mubr.msk.f32.gmra.mrb[12].mxu1 %vm1646_vm3, %v1644_v56  ;;  %1464 = vrot.lane.b32.xlu0 %v5603_v59, %s4772_s20 }
 0x2f9   :  { %1741 = vmatprep.mubr.f32.mxu1 %v6992_v58  ;;  %v4228_v39 = vpack.c.bf16 %v1444_v61, %v1438_v33 }
 0x2fb   :  { %1466 = vrot.lane.b32.xlu1 %v5651_v11, %s4772_s20 }
 0x2fc   :  { %3861 = vmatmul.mubr.msk.f32.gmra.mrb[14].mxu1 %vm1646_vm3, %v1645_v57  ;;  %1472 = vrot.lane.b32.xlu0 %v5582_v27, %s4772_s20 }
 0x2fd   :  { %1812 = vmatprep.mubr.f32.mxu1 %v6992_v58 }
 0x2ff   :  { %1474 = vrot.lane.b32.xlu1 %v5626_v45, %s4772_s20 }
 0x300   :  { %3862 = vmatmul.mubr.msk.f32.vlgmr.msra.gmra.mrb[16].mxu1 %vm1646_vm3, %v5615_v21  ;;  %1468 = vrot.lane.b32.xlu0 %v5634_v12, %s4772_s20 }
 0x301   :  { %4225 = vmatpush1.bf16.msra.mxu1 %v4224_v20  ;;  %1818 = vmatprep.mubr.f32.mxu1 %v6992_v58  ;;  %v5833_v20 = vld [vmem:[%s6936_s9] sm:$0xff] }
 0x302   :  { %4227 = vmatprep.subr.bf16.mxu1 %v4226_v29 }
 0x303   :  { %1478 = vrot.lane.b32.xlu1 %v1426_v17, %s4772_s20 }
 0x304   :  { %3863 = vmatmul.mubr.msk.f32.gmra.mrb[18].mxu1 %vm1646_vm3, %v5648_v6  ;;  %1476 = vrot.lane.b32.xlu0 %v5628_v0, %s4772_s20 }
 0x305   :  { %4229 = vmatpush1.bf16.msra.mxu1 %v4228_v39  ;;  %1824 = vmatprep.mubr.f32.mxu1 %v6992_v58 }
 0x307   :  { %1482 = vrot.lane.b32.xlu1 %v1438_v33, %s4772_s20 }
 0x308   :  { %3864 = vmatmul.mubr.msk.f32.gmra.mrb[20].mxu1 %vm1646_vm3, %v1644_v56  ;;  %1480 = vrot.lane.b32.xlu0 %v1432_v48, %s4772_s20 }
 0x309   :  { %1830 = vmatprep.mubr.f32.mxu1 %v6992_v58 }
 0x30b   :  { %1550 = vrot.lane.b32.xlu1 %v5503_v54, %s4773_s4  ;;  %v2514_v54 = vld [vmem:[%s6934_s12 + $0x10] sm:$0xff] }
 0x30c   :  { %3865 = vmatmul.mubr.msk.f32.gmra.mrb[22].mxu1 %vm1646_vm3, %v1645_v57  ;;  %1552 = vrot.lane.b32.xlu0 %v5510_v3, %s4773_s4  ;;  %v2512_v3 = vld [vmem:[%s6934_s12] sm:$0xff] }
 0x30d   :  { %1901 = vmatprep.mubr.f32.mxu1 %v6992_v58 }
 0x30f   :  { %1558 = vrot.lane.b32.xlu1 %v5617_v42, %s4773_s4 }
 0x310   :  { %3866 = vmatmul.mubr.msk.f32.vlgmr.msra.gmra.mrb[24].mxu1 %vm1646_vm3, %v5615_v21  ;;  %1560 = vrot.lane.b32.xlu0 %v5603_v59, %s4773_s4 }
 0x311   :  { %1907 = vmatprep.mubr.f32.mxu1 %v6992_v58 }
 0x313   :  { %1542 = vrot.lane.b32.xlu1 %v5489_v41, %s4773_s4  ;;  %v2564_v41 = vld [vmem:[%s6935_s14] sm:$0xff] }
 0x314   :  { %3867 = vmatmul.mubr.msk.f32.gmra.mrb[26].mxu1 %vm1646_vm3, %v5648_v6  ;;  %1484 = vrot.lane.b32.xlu0 %v1444_v61, %s4772_s20 }
 0x315   :  { %1913 = vmatprep.mubr.f32.mxu1 %v6992_v58 }
 0x317   :  { %1554 = vrot.lane.b32.xlu1 %v5586_v50, %s4773_s4 }
 0x318   :  { %3868 = vmatmul.mubr.msk.f32.gmra.mrb[28].mxu1 %vm1646_vm3, %v1644_v56  ;;  %1544 = vrot.lane.b32.xlu0 %v5508_v31, %s4773_s4  ;;  %v2565_v31 = vld [vmem:[%s6935_s14 + $0x8] sm:$0xff] }
 0x319   :  { %1919 = vmatprep.mubr.f32.mxu1 %v6992_v58 }
 0x31b   :  { %1562 = vrot.lane.b32.xlu1 %v5651_v11, %s4773_s4 }
 0x31c   :  { %3869 = vmatmul.mubr.msk.f32.gmra.mrb[30].mxu1 %vm1646_vm3, %v1645_v57  ;;  %1556 = vrot.lane.b32.xlu0 %v5588_v51, %s4773_s4 }
 0x31d   :  { %2002 = vmatprep.mubr.f32.mxu1 %v6992_v58 }
 0x31f   :  { %1546 = vrot.lane.b32.xlu1 %v5562_v2, %s4773_s4  ;;  %v2567_v2 = vld [vmem:[%s6935_s14 + $0x18] sm:$0xff] }
 0x320   :  { %1564 = vrot.lane.b32.xlu0 %v5634_v12, %s4773_s4 }
 0x323   :  { %1566 = vrot.lane.b32.xlu1 %v5580_v26, %s4773_s4 }
 0x324   :  { %1548 = vrot.lane.b32.xlu0 %v5565_v15, %s4773_s4  ;;  %v2513_v15 = vld [vmem:[%s6934_s12 + $0x8] sm:$0xff] }
 0x327   :  { %1574 = vrot.lane.b32.xlu1 %v1426_v17, %s4773_s4 }
 0x328   :  { %1568 = vrot.lane.b32.xlu0 %v5582_v27, %s4773_s4 }
 0x32b   :  { %1570 = vrot.lane.b32.xlu1 %v5626_v45, %s4773_s4 }
 0x32c   :  { %1576 = vrot.lane.b32.xlu0 %v1432_v48, %s4773_s4 }
 0x32f   :  { %1578 = vrot.lane.b32.xlu1 %v1438_v33, %s4773_s4 }
 0x330   :  { %1572 = vrot.lane.b32.xlu0 %v5628_v0, %s4773_s4 }
 0x333   :  { %1582 = vrot.lane.b32.xlu1 %v5537_v10, %s4773_s4  ;;  %v2515_v10 = vld [vmem:[%s6934_s12 + $0x18] sm:$0xff] }
 0x334   :  { %1580 = vrot.lane.b32.xlu0 %v1444_v61, %s4773_s4 }
 0x337   :  { %1586 = vrot.lane.b32.xlu1 %v5619_v1, %s4773_s4 }
 0x338   :  { %1584 = vrot.lane.b32.xlu0 %v5560_v37, %s4773_s4  ;;  %v2566_v37 = vld [vmem:[%s6935_s14 + $0x10] sm:$0xff] }
 0x33b   :  { %2518 = vperm.xlu1 %4610, %v2512_v3  }
 0x33c   :  { %1588 = vrot.lane.b32.xlu0 %v5658_v25, %s4773_s4 }
 0x33f   :  { %2523 = vperm.xlu1 %4610, %v2513_v15  }
 0x340   :  { %2570 = vperm.xlu0 %4609, %v2564_v41  }
 0x343   :  { %2528 = vperm.xlu1 %4610, %v2514_v54   ;;  %v5850_v54 = vld [vmem:[%s6936_s9 + $0x8] sm:$0xff] }
 0x344   :  { %2575 = vperm.xlu0 %4609, %v2565_v31  }
 0x347   :  { %2533 = vperm.xlu1 %4610, %v2515_v10  }
 0x348   :  { %2580 = vperm.xlu0 %4609, %v2566_v37  }
 0x34c   :  { %2585 = vperm.xlu0 %4609, %v2567_v2  }
 0x34d   :  { %v1447_v26 = vpop.permute.xlu1 %1446 }
 0x351   :  { %v1449_v27 = vpop.permute.xlu0 %1448  ;;  %v1455_v50 = vpop.permute.xlu1 %1454 }
 0x352   :  { %v1510_v51 = vsel %vm99_vm1, %v1447_v26, %v1455_v50 }
 0x353   :  { %v1519_v1 = vmul.f32 %v1510_v51, %v5037_v35 }
 0x355   :  { %v1457_v59 = vpop.permute.xlu0 %1456  ;;  %v5794_v21 = vpop.permute.xlu1 %1486 }
 0x356   :  { %v1511_v42 = vsel %vm99_vm1, %v1449_v27, %v1457_v59  ;;  %v1514_v0 = vsel %vm99_vm1, %v5794_v21, %v1447_v26 }
 0x357   :  { %v1525_v45 = vmul.f32 %v1511_v42, %v5037_v35  ;;  %v1518_v46 = vmul.f32 %v1514_v0, %v5048_v43 }
 0x359   :  { %v5803_v12 = vpop.permute.xlu0 %1488  ;;  %v1451_v38 = vpop.permute.xlu1 %1450  ;;  %v4230_v28 = vpack.c.bf16 %v1525_v45, %v1519_v1 }
 0x35a   :  { %v1515_v44 = vsel %vm99_vm1, %v5803_v12, %v1449_v27 }
 0x35b   :  { %v1524_v6 = vmul.f32 %v1515_v44, %v5048_v43  ;;  %4231 = vmatprep.subr.bf16.mxu1 %v4230_v28 }
 0x35d   :  { %v4232_v11 = vpack.c.bf16 %v1524_v6, %v1518_v46  ;;  %v1453_v23 = vpop.permute.xlu0 %1452  ;;  %v1459_v55 = vpop.permute.xlu1 %1458  ;;  %v5880_v46 = vld [vmem:[%s6936_s9 + $0x18] sm:$0xff] }
 0x35e   :  { %v1512_v34 = vsel %vm99_vm1, %v1451_v38, %v1459_v55 }
 0x35f   :  { %4233 = vmatpush1.bf16.msra.mxu1 %v4232_v11  ;;  %v1531_v32 = vmul.f32 %v1512_v34, %v5037_v35 }
 0x361   :  { %v1461_v47 = vpop.permute.xlu0 %1460  ;;  %v5814_v36 = vpop.permute.xlu1 %1490 }
 0x362   :  { %v1513_v25 = vsel %vm99_vm1, %v1453_v23, %v1461_v47  ;;  %v1516_v63 = vsel %vm99_vm1, %v5814_v36, %v1451_v38 }
 0x363   :  { %v1537_v8 = vmul.f32 %v1513_v25, %v5037_v35  ;;  %v1530_v57 = vmul.f32 %v1516_v63, %v5048_v43 }
 0x365   :  { %v4234_v56 = vpack.c.bf16 %v1537_v8, %v1531_v32  ;;  %v1463_v14 = vpop.permute.xlu1 %1462 }
 0x366   :  { %v5821_v7 = vpop.permute.xlu0 %1492  ;;  %v1506_v29 = vsel %vm99_vm1, %v1455_v50, %v1463_v14  ;;  %v5861_v50 = vld [vmem:[%s6936_s9 + $0x10] sm:$0xff] }
 0x367   :  { %4235 = vmatprep.subr.bf16.mxu1 %v4234_v56  ;;  %v1517_v24 = vsel %vm99_vm1, %v5821_v7, %v1453_v23  ;;  %v1520_v31 = vmul.f32 %v1506_v29, %v5084_v9 }
 0x368   :  { %v1536_v53 = vmul.f32 %v1517_v24, %v5048_v43 }
 0x369   :  { %v1471_v22 = vpop.permute.xlu1 %1470 }
 0x36a   :  { %v4236_v48 = vpack.c.bf16 %v1536_v53, %v1530_v57  ;;  %v1465_v35 = vpop.permute.xlu0 %1464  ;;  %v1502_v61 = vsel %vm99_vm1, %v1463_v14, %v1471_v22 }
 0x36b   :  { %v1507_v16 = vsel %vm99_vm1, %v1457_v59, %v1465_v35  ;;  %v1521_v3 = vmul.f32 %v1502_v61, %v5090_v13 }
 0x36c   :  { %4237 = vmatpush1.bf16.msra.mxu1 %v4236_v48  ;;  %v1526_v33 = vmul.f32 %v1507_v16, %v5084_v9 }
 0x36d   :  { %v1467_v17 = vpop.permute.xlu1 %1466 }
 0x36e   :  { %v1473_v43 = vpop.permute.xlu0 %1472  ;;  %v4240_v2 = vpack.c.bf16 %v1526_v33, %v1520_v31  ;;  %v1508_v59 = vsel %vm99_vm1, %v1459_v55, %v1467_v17 }
 0x36f   :  { %v1503_v39 = vsel %vm99_vm1, %v1465_v35, %v1473_v43  ;;  %3870 = vmatmul.mubr.msk.f32.vlgmr.msra.gmra.mrb[8].mxu1 %vm1646_vm3, %v5833_v20  ;;  %v1532_v6 = vmul.f32 %v1508_v59, %v5084_v9 }
 0x370   :  { %v1527_v15 = vmul.f32 %v1503_v39, %v5090_v13  ;;  %2008 = vmatprep.mubr.f32.mxu1 %v6992_v58 }
 0x371   :  { %v1475_v41 = vpop.permute.xlu1 %1474 }
 0x372   :  { %v1469_v10 = vpop.permute.xlu0 %1468  ;;  %v4238_v37 = vpack.c.bf16 %v1527_v15, %v1521_v3  ;;  %v1504_v51 = vsel %vm99_vm1, %v1467_v17, %v1475_v41 }
 0x373   :  { %3871 = vmatmul.mubr.msk.f32.gmra.mrb[10].mxu1 %vm1646_vm3, %v5850_v54  ;;  %v1509_v26 = vsel %vm99_vm1, %v1461_v47, %v1469_v10  ;;  %v1533_v0 = vmul.f32 %v1504_v51, %v5090_v13 }
 0x374   :  { %4239 = vmatprep.subr.bf16.mxu1 %v4238_v37  ;;  %2014 = vmatprep.mubr.f32.mxu1 %v6992_v58  ;;  %v1538_v1 = vmul.f32 %v1509_v26, %v5084_v9 }
 0x375   :  { %v1479_v27 = vpop.permute.xlu1 %1478  ;;  %4241 = vmatpush1.bf16.msra.mxu1 %v4240_v2 }
 0x376   :  { %v1477_v42 = vpop.permute.xlu0 %1476  ;;  %v1498_v28 = vsel %vm99_vm1, %v1471_v22, %v1479_v27  ;;  %v1494_v11 = vsel %vm99_vm1, %v1479_v27, %v5794_v21 }
 0x377   :  { %v1505_v45 = vsel %vm99_vm1, %v1469_v10, %v1477_v42  ;;  %3872 = vmatmul.mubr.msk.f32.gmra.mrb[12].mxu1 %vm1646_vm3, %v5861_v50  ;;  %v1522_v34 = vmul.f32 %v1498_v28, %v5071_v62  ;;  %v1523_v9 = vmul.f32 %v1494_v11, %v5059_v52 }
 0x378   :  { %v1539_v38 = vmul.f32 %v1505_v45, %v5090_v13  ;;  %2020 = vmatprep.mubr.f32.mxu1 %v6992_v58  ;;  %v4244_v13 = vpack.c.bf16 %v1538_v1, %v1532_v6 }
 0x379   :  { %v1483_v44 = vpop.permute.xlu1 %1482 }
 0x37a   :  { %v1481_v23 = vpop.permute.xlu0 %1480  ;;  %v4242_v55 = vpack.c.bf16 %v1539_v38, %v1533_v0  ;;  %v1496_v57 = vsel %vm99_vm1, %v1483_v44, %v5814_v36  ;;  %v1500_v53 = vsel %vm99_vm1, %v1475_v41, %v1483_v44 }
 0x37b   :  { %v1495_v47 = vsel %vm99_vm1, %v1481_v23, %v5803_v12  ;;  %v1499_v25 = vsel %vm99_vm1, %v1473_v43, %v1481_v23  ;;  %3873 = vmatmul.mubr.msk.f32.gmra.mrb[14].mxu1 %vm1646_vm3, %v5880_v46  ;;  %v1534_v36 = vmul.f32 %v1500_v53, %v5071_v62  ;;  %v1535_v17 = vmul.f32 %v1496_v57, %v5059_v52 }
 0x37c   :  { %v1528_v32 = vmul.f32 %v1499_v25, %v5071_v62  ;;  %v1529_v21 = vmul.f32 %v1495_v47, %v5059_v52  ;;  %4243 = vmatprep.subr.bf16.mxu1 %v4242_v55  ;;  %2091 = vmatprep.mubr.f32.mxu1 %v6992_v58 }
 0x37d   :  { %v1551_v8 = vpop.permute.xlu1 %1550  ;;  %4245 = vmatpush1.bf16.msra.mxu1 %v4244_v13 }
 0x37e   :  { %v4248_v56 = vpack.c.bf16 %v1528_v32, %v1522_v34  ;;  %v1553_v14 = vpop.permute.xlu0 %1552  ;;  %v4246_v12 = vpack.c.bf16 %v1529_v21, %v1523_v9 }
 0x380   :  { %3874 = vmatmul.mubr.msk.f32.vlgmr.msra.gmra.mrb[16].mxu1 %vm1646_vm3, %v5833_v20  ;;  %4247 = vmatprep.subr.bf16.mxu1 %v4246_v12  ;;  %v5999_v12 = vld [vmem:[%s6937_s11 + $0x8] sm:$0xff] }
 0x381   :  { %v5900_v63 = vpop.permute.xlu1 %1558  ;;  %4249 = vmatpush1.bf16.msra.mxu1 %v4248_v56  ;;  %2097 = vmatprep.mubr.f32.mxu1 %v6992_v58 }
 0x382   :  { %v1561_v24 = vpop.permute.xlu0 %1560  ;;  %v1602_v35 = vsel %vm179_vm2, %v1551_v8, %v5900_v63 }
 0x383   :  { %v1603_v48 = vsel %vm179_vm2, %v1553_v14, %v1561_v24  ;;  %v1615_v33 = vmul.f32 %v1602_v35, %v5120_v40 }
 0x384   :  { %3875 = vmatmul.mubr.msk.f32.gmra.mrb[18].mxu1 %vm1646_vm3, %v5850_v54  ;;  %v1621_v43 = vmul.f32 %v1603_v48, %v5120_v40 }
 0x385   :  { %v5910_v22 = vpop.permute.xlu1 %1542  ;;  %2103 = vmatprep.mubr.f32.mxu1 %v6992_v58 }
 0x386   :  { %v1485_v16 = vpop.permute.xlu0 %1484  ;;  %v1606_v41 = vsel %vm179_vm2, %v5910_v22, %v1551_v8  ;;  %v4254_v2 = vpack.c.bf16 %v1621_v43, %v1615_v33 }
 0x387   :  { %v1497_v61 = vsel %vm99_vm1, %v1485_v16, %v5821_v7  ;;  %v1501_v29 = vsel %vm99_vm1, %v1477_v42, %v1485_v16 }
 0x388   :  { %v1540_v39 = vmul.f32 %v1501_v29, %v5071_v62  ;;  %v1541_v3 = vmul.f32 %v1497_v61, %v5059_v52  ;;  %3876 = vmatmul.mubr.msk.f32.gmra.mrb[20].mxu1 %vm1646_vm3, %v5861_v50  ;;  %v1614_v52 = vmul.f32 %v1606_v41, %v5135_v49 }
 0x389   :  { %v1555_v15 = vpop.permute.xlu1 %1554  ;;  %2109 = vmatprep.mubr.f32.mxu1 %v6992_v58 }
 0x38a   :  { %v4252_v7 = vpack.c.bf16 %v1540_v39, %v1534_v36  ;;  %v5935_v31 = vpop.permute.xlu0 %1544  ;;  %v4250_v10 = vpack.c.bf16 %v1541_v3, %v1535_v17  ;;  %v2207_v36 = vld [vmem:[%s6937_s11 + $0x10] sm:$0xff] }
 0x38b   :  { %v1607_v62 = vsel %vm179_vm2, %v5935_v31, %v1553_v14 }
 0x38c   :  { %v1620_v37 = vmul.f32 %v1607_v62, %v5135_v49  ;;  %3877 = vmatmul.mubr.msk.f32.gmra.mrb[22].mxu1 %vm1646_vm3, %v5880_v46  ;;  %4251 = vmatprep.subr.bf16.mxu1 %v4250_v10 }
 0x38d   :  { %v1563_v26 = vpop.permute.xlu1 %1562  ;;  %4253 = vmatpush1.bf16.msra.mxu1 %v4252_v7  ;;  %2180 = vmatprep.mubr.f32.mxu1 %v6992_v58 }
 0x38e   :  { %v4256_v27 = vpack.c.bf16 %v1620_v37, %v1614_v52  ;;  %v1557_v51 = vpop.permute.xlu0 %1556  ;;  %4255 = vmatprep.subr.bf16.mxu1 %v4254_v2  ;;  %v1604_v42 = vsel %vm179_vm2, %v1555_v15, %v1563_v26 }
 0x38f   :  { %v1627_v0 = vmul.f32 %v1604_v42, %v5120_v40 }
 0x390   :  { %3878 = vmatmul.mubr.msk.f32.vlgmr.msra.gmra.mrb[24].mxu1 %vm1646_vm3, %v5833_v20 }
 0x391   :  { %v5947_v59 = vpop.permute.xlu1 %1546  ;;  %4257 = vmatpush1.bf16.msra.mxu1 %v4256_v27  ;;  %2186 = vmatprep.mubr.f32.mxu1 %v6992_v58 }
 0x392   :  { %v1565_v1 = vpop.permute.xlu0 %1564  ;;  %v1608_v28 = vsel %vm179_vm2, %v5947_v59, %v1555_v15 }
 0x393   :  { %v1605_v45 = vsel %vm179_vm2, %v1557_v51, %v1565_v1  ;;  %v1626_v23 = vmul.f32 %v1608_v28, %v5135_v49 }
 0x394   :  { %v1633_v38 = vmul.f32 %v1605_v45, %v5120_v40  ;;  %3879 = vmatmul.mubr.msk.f32.gmra.mrb[26].mxu1 %vm1646_vm3, %v5850_v54 }
 0x395   :  { %v1567_v20 = vpop.permute.xlu1 %1566  ;;  %2192 = vmatprep.mubr.f32.mxu1 %v6992_v58 }
 0x396   :  { %v5962_v44 = vpop.permute.xlu0 %1548  ;;  %v4258_v6 = vpack.c.bf16 %v1633_v38, %v1627_v0 }
 0x397   :  { %v1609_v11 = vsel %vm179_vm2, %v5962_v44, %v1557_v51 }
 0x398   :  { %v1632_v40 = vmul.f32 %v1609_v11, %v5135_v49  ;;  %3880 = vmatmul.mubr.msk.f32.gmra.mrb[28].mxu1 %vm1646_vm3, %v5861_v50  ;;  %4259 = vmatprep.subr.bf16.mxu1 %v4258_v6  ;;  %v5982_v49 = vld [vmem:[%s6937_s11] sm:$0xff]  ;;  %v1598_v50 = vsel %vm179_vm2, %v5900_v63, %v1567_v20 }
 0x399   :  { %v1575_v54 = vpop.permute.xlu1 %1574  ;;  %2198 = vmatprep.mubr.f32.mxu1 %v6992_v58  ;;  %v1616_v14 = vmul.f32 %v1598_v50, %v5151_v60  ;;  %v3102_v50 = vld [vmem:[%s6939_s17 + $0x90] sm:$0xff] }
 0x39a   :  { %v4260_v55 = vpack.c.bf16 %v1632_v40, %v1626_v23  ;;  %v1569_v13 = vpop.permute.xlu0 %1568  ;;  %v1594_v25 = vsel %vm179_vm2, %v1567_v20, %v1575_v54  ;;  %v6995_v23 = vld [vmem:[#allocation4_spill] sm:$0xff]  ;;  %v6996_v40 = vld [vmem:[#allocation5_spill] sm:$0xff] }
 0x39b   :  { %v1599_v34 = vsel %vm179_vm2, %v1561_v24, %v1569_v13  ;;  %v1617_v21 = vmul.f32 %v1594_v25, %v5161_v4  ;;  %v3084_v25 = vld [vmem:[%s6939_s17] sm:$0xff] }
 0x39c   :  { %3881 = vmatmul.mubr.msk.f32.gmra.mrb[30].mxu1 %vm1646_vm3, %v5880_v46  ;;  %v1622_v32 = vmul.f32 %v1599_v34, %v5151_v60  ;;  %v3100_v34 = vld [vmem:[%s6939_s17 + $0x80] sm:$0xff] }
 0x39d   :  { %v1571_v47 = vpop.permute.xlu1 %1570  ;;  %4261 = vmatpush1.bf16.msra.mxu1 %v4260_v55  ;;  %2285 = vmatprep.mubr.f32.mxu1 %v6992_v58  ;;  %v2563_v55 = vld [vmem:[%s6938_s13 + $0x18] sm:$0xff] }
 0x39e   :  { %v1577_v9 = vpop.permute.xlu0 %1576  ;;  %v4264_v57 = vpack.c.bf16 %v1622_v32, %v1616_v14  ;;  %v1600_v48 = vsel %vm179_vm2, %v1563_v26, %v1571_v47  ;;  %v3105_v14 = vld [vmem:[%s6939_s17 + $0xa8] sm:$0xff] }
 0x39f   :  { %v1595_v46 = vsel %vm179_vm2, %v1569_v13, %v1577_v9  ;;  %v1628_v29 = vmul.f32 %v1600_v48, %v5151_v60  ;;  %v6997_v13 = vld [vmem:[#allocation6_spill] sm:$0xff]  ;;  %v3107_v48 = vld [vmem:[%s6939_s17 + $0xb8] sm:$0xff] }
 0x3a0   :  { %v1623_v8 = vmul.f32 %v1595_v46, %v5161_v4  ;;  %3882 = vmatmul.mubr.msk.f32.vlgmr.msra.gmra.mrb[8].mxu1 %vm1646_vm3, %v5982_v49 }
 0x3a1   :  { %v1579_v56 = vpop.permute.xlu1 %1578  ;;  %2291 = vmatprep.mubr.f32.mxu1 %v6992_v58 }
 0x3a2   :  { %v1573_v63 = vpop.permute.xlu0 %1572  ;;  %v4262_v24 = vpack.c.bf16 %v1623_v8, %v1617_v21  ;;  %v1596_v16 = vsel %vm179_vm2, %v1571_v47, %v1579_v56  ;;  %v3101_v47 = vld [vmem:[%s6939_s17 + $0x88] sm:$0xff]  ;;  %v3086_v21 = vld [vmem:[%s6939_s17 + $0x10] sm:$0xff]  ;;  %v3087_v8 = vld [vmem:[%s6939_s17 + $0x18] sm:$0xff] }
 0x3a3   :  { %v1601_v53 = vsel %vm179_vm2, %v1565_v1, %v1573_v63  ;;  %v1629_v33 = vmul.f32 %v1596_v16, %v5161_v4 }
 0x3a4   :  { %3883 = vmatmul.mubr.msk.f32.gmra.mrb[10].mxu1 %vm1646_vm3, %v5999_v12  ;;  %4263 = vmatprep.subr.bf16.mxu1 %v4262_v24  ;;  %v1634_v17 = vmul.f32 %v1601_v53, %v5151_v60  ;;  %v2208_v60 = vld [vmem:[%s6937_s11 + $0x18] sm:$0xff]  ;;  %v3088_v24 = vld [vmem:[%s6939_s17 + $0x20] sm:$0xff]  ;;  %v3106_v53 = vld [vmem:[%s6939_s17 + $0xb0] sm:$0xff] }
 0x3a5   :  { %v1583_v35 = vpop.permute.xlu1 %1582  ;;  %4265 = vmatpush1.bf16.msra.mxu1 %v4264_v57  ;;  %2297 = vmatprep.mubr.f32.mxu1 %v6992_v58  ;;  %v3089_v57 = vld [vmem:[%s6939_s17 + $0x28] sm:$0xff]  ;;  %v6174_v16 = vpack.c.bf16 %v3107_v48, %v3106_v53 }
 0x3a6   :  { %v1581_v61 = vpop.permute.xlu0 %1580  ;;  %v1590_v3 = vsel %vm179_vm2, %v1575_v54, %v1583_v35  ;;  %v1610_v15 = vsel %vm179_vm2, %v1583_v35, %v5910_v22  ;;  %v4268_v7 = vpack.c.bf16 %v1634_v17, %v1628_v29  ;;  %v2562_v54 = vld [vmem:[%s6938_s13 + $0x10] sm:$0xff]  ;;  %v6171_v35 = vpack.c.bf16 %v3089_v57, %v3088_v24  ;;  %v3091_v17 = vld [vmem:[%s6939_s17 + $0x38] sm:$0xff]  ;;  %v3109_v29 = vld [vmem:[%s6939_s17 + $0xc8] sm:$0xff] }
 0x3a7   :  { %v1597_v43 = vsel %vm179_vm2, %v1573_v63, %v1581_v61  ;;  %v1619_v52 = vmul.f32 %v1610_v15, %v5181_v19  ;;  %v3110_v15 = vld [vmem:[%s6939_s17 + $0xd0] sm:$0xff] }
 0x3a8   :  { %v1635_v39 = vmul.f32 %v1597_v43, %v5161_v4  ;;  %3884 = vmatmul.mubr.msk.f32.gmra.mrb[12].mxu1 %vm1646_vm3, %v2207_v36  ;;  %v1618_v4 = vmul.f32 %v1590_v3, %v5177_v18  ;;  %v3093_v3 = vld [vmem:[%s6939_s17 + $0x48] sm:$0xff] }
 0x3a9   :  { %v1587_v41 = vpop.permute.xlu1 %1586  ;;  %2303 = vmatprep.mubr.f32.mxu1 %v6992_v58 }
 0x3aa   :  { %v1585_v10 = vpop.permute.xlu0 %1584  ;;  %v4266_v62 = vpack.c.bf16 %v1635_v39, %v1629_v33  ;;  %v1592_v27 = vsel %vm179_vm2, %v1579_v56, %v1587_v41  ;;  %v1612_v51 = vsel %vm179_vm2, %v1587_v41, %v5947_v59  ;;  %v3104_v56 = vld [vmem:[%s6939_s17 + $0xa0] sm:$0xff]  ;;  %v3111_v41 = vld [vmem:[%s6939_s17 + $0xd8] sm:$0xff] }
 0x3ab   :  { %v1591_v37 = vsel %vm179_vm2, %v1577_v9, %v1585_v10  ;;  %v1611_v22 = vsel %vm179_vm2, %v1585_v10, %v5935_v31  ;;  %v1630_v45 = vmul.f32 %v1592_v27, %v5177_v18  ;;  %v1631_v20 = vmul.f32 %v1612_v51, %v5181_v19  ;;  %v3103_v9 = vld [vmem:[%s6939_s17 + $0x98] sm:$0xff]  ;;  %v3092_v39 = vld [vmem:[%s6939_s17 + $0x40] sm:$0xff]  ;;  %v3094_v10 = vld [vmem:[%s6939_s17 + $0x50] sm:$0xff] }
 0x3ac   :  { %v1624_v2 = vmul.f32 %v1591_v37, %v5177_v18  ;;  %v1625_v26 = vmul.f32 %v1611_v22, %v5181_v19  ;;  %3885 = vmatmul.mubr.msk.f32.gmra.mrb[14].mxu1 %vm1646_vm3, %v2208_v60  ;;  %4267 = vmatprep.subr.bf16.mxu1 %v4266_v62  ;;  %v6137_v46 = vpack.c.bf16 %v3103_v9, %v3102_v50  ;;  %v3095_v62 = vld [vmem:[%s6939_s17 + $0x58] sm:$0xff] }
 0x3ad   :  { %4269 = vmatpush1.bf16.msra.mxu1 %v4268_v7  ;;  %2374 = vmatprep.mubr.f32.mxu1 %v6992_v58  ;;  %v6156_v63 = vpack.c.bf16 %v3105_v14, %v3104_v56  ;;  %v6210_v7 = vpack.c.bf16 %v3111_v41, %v3110_v15  ;;  %v3099_v9 = vld [vmem:[%s6939_s17 + $0x78] sm:$0xff] }
 0x3ae   :  { %v4272_v42 = vpack.c.bf16 %v1624_v2, %v1618_v4  ;;  %v1589_v1 = vpop.permute.xlu0 %1588  ;;  %v4270_v31 = vpack.c.bf16 %v1625_v26, %v1619_v52  ;;  %v6219_v4 = vpack.c.bf16 %v3095_v62, %v3094_v10 }
 0x3af   :  { %v1593_v0 = vsel %vm179_vm2, %v1581_v61, %v1589_v1  ;;  %v1613_v38 = vsel %vm179_vm2, %v1589_v1, %v5962_v44  ;;  %v2561_v44 = vld [vmem:[%s6938_s13 + $0x8] sm:$0xff]  ;;  %v3108_v61 = vld [vmem:[%s6939_s17 + $0xc0] sm:$0xff] }
 0x3b0   :  { %v1636_v28 = vmul.f32 %v1593_v0, %v5177_v18  ;;  %v1637_v59 = vmul.f32 %v1613_v38, %v5181_v19  ;;  %3886 = vmatmul.mubr.msk.f32.vlgmr.msra.gmra.mrb[16].mxu1 %vm1646_vm3, %v5982_v49  ;;  %4271 = vmatprep.subr.bf16.mxu1 %v4270_v31  ;;  %v6993_v18 = vld [vmem:[#allocation2_spill] sm:$0xff]  ;;  %v6994_v19 = vld [vmem:[#allocation3_spill] sm:$0xff]  ;;  %v6192_v33 = vpack.c.bf16 %v3109_v29, %v3108_v61 }
 0x3b1   :  { %4273 = vmatpush1.bf16.msra.mxu1 %v4272_v42  ;;  %2380 = vmatprep.mubr.f32.mxu1 %v6992_v58  ;;  %v3113_v0 = vld [vmem:[%s6939_s17 + $0xe8] sm:$0xff]  ;;  %v3096_v38 = vld [vmem:[%s6939_s17 + $0x60] sm:$0xff] }
 0x3b2   :  { %v4276_v6 = vpack.c.bf16 %v1636_v28, %v1630_v45  ;;  %v4274_v11 = vpack.c.bf16 %v1637_v59, %v1631_v20  ;;  %v3112_v45 = vld [vmem:[%s6939_s17 + $0xe0] sm:$0xff]  ;;  %v3097_v28 = vld [vmem:[%s6939_s17 + $0x68] sm:$0xff] }
 0x3b3   :  { %v6232_v20 = vpack.c.bf16 %v3113_v0, %v3112_v45 }
 0x3b4   :  { %3887 = vmatmul.mubr.msk.f32.gmra.mrb[18].mxu1 %vm1646_vm3, %v5999_v12  ;;  %4275 = vmatprep.subr.bf16.mxu1 %v4274_v11  ;;  %v6237_v11 = vpack.c.bf16 %v3097_v28, %v3096_v38 }
 0x3b5   :  { %4277 = vmatpush1.bf16.msra.mxu1 %v4276_v6  ;;  %2386 = vmatprep.mubr.f32.mxu1 %v6992_v58 }
 0x3b6   :  { %4279 = vmatprep.subr.bf16.mxu1 %v4896_v5  ;;  %v2560_v5 = vld [vmem:[%s6938_s13] sm:$0xff] }
 0x3b8   :  { %3888 = vmatmul.mubr.msk.f32.gmra.mrb[20].mxu1 %vm1646_vm3, %v2207_v36 }
 0x3b9   :  { %2392 = vmatprep.mubr.f32.mxu1 %v6992_v58 }
 0x3ba   :  { %v2519_v2 = vpop.permute.xlu1 %2518 }
 0x3bc   :  { %3889 = vmatmul.mubr.msk.f32.gmra.mrb[22].mxu1 %vm1646_vm3, %v2208_v60 }
 0x3bd   :  { %2463 = vmatprep.mubr.f32.mxu1 %v6992_v58 }
 0x3be   :  { %v2524_v42 = vpop.permute.xlu1 %2523 }
 0x3bf   :  { %v2571_v52 = vpop.permute.xlu0 %2570 }
 0x3c0   :  { %3890 = vmatmul.mubr.msk.f32.vlgmr.msra.gmra.mrb[24].mxu1 %vm1646_vm3, %v5982_v49  ;;  %v6124_v49 = vpack.c.bf16 %v3101_v47, %v3100_v34  ;;  %v3115_v34 = vld [vmem:[%s6939_s17 + $0xf8] sm:$0xff]  ;;  %v3098_v47 = vld [vmem:[%s6939_s17 + $0x70] sm:$0xff] }
 0x3c1   :  { %2469 = vmatprep.mubr.f32.mxu1 %v6992_v58  ;;  %4281 = vmatpush1.bf16.msra.mxu1 %v6993_v18  ;;  %v6273_v14 = vpack.c.bf16 %v3099_v9, %v3098_v47 }
 0x3c2   :  { %4283 = vmatprep.subr.bf16.mxu1 %v6994_v19  ;;  %4291 = vmatprep.subr.bf16.mxu0 %v6124_v49  ;;  %v2529_v19 = vpop.permute.xlu1 %2528 }
 0x3c3   :  { %v2576_v51 = vpop.permute.xlu0 %2575 }
 0x3c4   :  { %3891 = vmatmul.mubr.msk.f32.gmra.mrb[26].mxu1 %vm1646_vm3, %v5999_v12  ;;  %v6153_v12 = vpack.c.bf16 %v3087_v8, %v3086_v21  ;;  %v3116_v21 = vld [vmem:[%s6939_s17 + $0x100] sm:$0xff]  ;;  %v3117_v8 = vld [vmem:[%s6939_s17 + $0x108] sm:$0xff] }
 0x3c5   :  { %2475 = vmatprep.mubr.f32.mxu1 %v6992_v58  ;;  %v6275_v24 = vpack.c.bf16 %v3117_v8, %v3116_v21 }
 0x3c6   :  { %v2534_v57 = vpop.permute.xlu1 %2533 }
 0x3c7   :  { %v2581_v59 = vpop.permute.xlu0 %2580 }
 0x3c8   :  { %3892 = vmatmul.mubr.msk.f32.gmra.mrb[28].mxu1 %vm1646_vm3, %v2207_v36  ;;  %v3090_v36 = vld [vmem:[%s6939_s17 + $0x30] sm:$0xff]  ;;  %v4446_v61 = vadd.f32 %v2581_v59, %v2529_v19 }
 0x3c9   :  { %2481 = vmatprep.mubr.f32.mxu1 %v6992_v58  ;;  %v6189_v43 = vpack.c.bf16 %v3091_v17, %v3090_v36 }
 0x3cc   :  { %3893 = vmatmul.mubr.msk.f32.gmra.mrb[30].mxu1 %vm1646_vm3, %v2208_v60  ;;  %v6207_v60 = vpack.c.bf16 %v3093_v3, %v3092_v39 }
 0x3cd   :  { %2664 = vmatprep.mubr.f32.mxu1 %v6992_v58 }
 0x3d0   :  { %3894 = vmatmul.mubr.msk.f32.vlgmr.msra.gmra.mrb[8].mxu1 %vm243_vm0, %v2560_v5 }
 0x3d1   :  { %2670 = vmatprep.mubr.f32.mxu1 %v6992_v58  ;;  %4285 = vmatpush1.bf16.msra.mxu1 %v6995_v23 }
 0x3d2   :  { %4287 = vmatprep.subr.bf16.mxu1 %v6996_v40 }
 0x3d4   :  { %3895 = vmatmul.mubr.msk.f32.gmra.mrb[10].mxu1 %vm243_vm0, %v2561_v44 }
 0x3d5   :  { %2676 = vmatprep.mubr.f32.mxu1 %v6992_v58 }
 0x3d8   :  { %3896 = vmatmul.mubr.msk.f32.gmra.mrb[12].mxu1 %vm243_vm0, %v2562_v54 }
 0x3d9   :  { %2682 = vmatprep.mubr.f32.mxu1 %v6992_v58 }
 0x3dc   :  { %3897 = vmatmul.mubr.msk.f32.gmra.mrb[14].mxu1 %vm243_vm0, %v2563_v55 }
 0x3dd   :  { %2753 = vmatprep.mubr.f32.mxu1 %v6992_v58 }
 0x3e0   :  { %3898 = vmatmul.mubr.msk.f32.vlgmr.msra.gmra.mrb[16].mxu1 %vm243_vm0, %v2560_v5 }
 0x3e1   :  { %2759 = vmatprep.mubr.f32.mxu1 %v6992_v58  ;;  %4289 = vmatpush1.bf16.msra.mxu1 %v6997_v13  ;;  %v3114_v13 = vld [vmem:[%s6939_s17 + $0xf0] sm:$0xff] }
 0x3e2   :  { %v6260_v50 = vpack.c.bf16 %v3115_v34, %v3114_v13 }
 0x3e4   :  { %3899 = vmatmul.mubr.msk.f32.gmra.mrb[18].mxu1 %vm243_vm0, %v2561_v44 }
 0x3e5   :  { %2765 = vmatprep.mubr.f32.mxu1 %v6992_v58 }
 0x3e8   :  { %3900 = vmatmul.mubr.msk.f32.gmra.mrb[20].mxu1 %vm243_vm0, %v2562_v54 }
 0x3e9   :  { %2771 = vmatprep.mubr.f32.mxu1 %v6992_v58 }
 0x3ec   :  { %3901 = vmatmul.mubr.msk.f32.gmra.mrb[22].mxu1 %vm243_vm0, %v2563_v55 }
 0x3ed   :  { %2842 = vmatprep.mubr.f32.mxu1 %v6992_v58 }
 0x3f0   :  { %3902 = vmatmul.mubr.msk.f32.vlgmr.msra.gmra.mrb[24].mxu1 %vm243_vm0, %v2560_v5  ;;  %v6241_v5 = vadd.f32 %v2571_v52, %v2519_v2 }
 0x3f1   :  { %2848 = vmatprep.mubr.f32.mxu1 %v6992_v58 }
 0x3f4   :  { %3903 = vmatmul.mubr.msk.f32.gmra.mrb[26].mxu1 %vm243_vm0, %v2561_v44  ;;  %v4442_v44 = vadd.f32 %v2576_v51, %v2524_v42 }
 0x3f5   :  { %2854 = vmatprep.mubr.f32.mxu1 %v6992_v58 }
 0x3f8   :  { %3904 = vmatmul.mubr.msk.f32.gmra.mrb[28].mxu1 %vm243_vm0, %v2562_v54 }
 0x3f9   :  { %2860 = vmatprep.mubr.f32.mxu1 %v6992_v58  ;;  %v3085_v58 = vld [vmem:[%s6939_s17 + $0x8] sm:$0xff] }
 0x3fa   :  { %v6135_v32 = vpack.c.bf16 %v3085_v58, %v3084_v25  ;;  %v2586_v25 = vpop.permute.xlu0 %2585 }
 0x3fb   :  { %v4450_v48 = vadd.f32 %v2586_v25, %v2534_v57 }
 0x3fc   :  { %3905 = vmatmul.mubr.msk.f32.gmra.mrb[30].mxu1 %vm243_vm0, %v2563_v55  ;;  %4293 = vmatpush3.bf16.msra.mxu0 %v6135_v32 }
 0x3fd   :  { %4295 = vmatprep.subr.bf16.mxu0 %v6137_v46 }
 0x400   :  { %4297 = vmatpush3.bf16.msra.mxu0 %v6153_v12 }
 0x401   :  { %4299 = vmatprep.subr.bf16.mxu0 %v6156_v63 }
 0x404   :  { %4301 = vmatpush3.bf16.msra.mxu0 %v6171_v35 }
 0x405   :  { %4303 = vmatprep.subr.bf16.mxu0 %v6174_v16 }
 0x408   :  { %4305 = vmatpush3.bf16.msra.mxu0 %v6189_v43 }
 0x409   :  { %4307 = vmatprep.subr.bf16.mxu0 %v6192_v33 }
 0x40c   :  { %4309 = vmatpush3.bf16.msra.mxu0 %v6207_v60 }
 0x40d   :  { %4311 = vmatprep.subr.bf16.mxu0 %v6210_v7 }
 0x410   :  { %4313 = vmatpush3.bf16.msra.mxu0 %v6219_v4 }
 0x411   :  { %4315 = vmatprep.subr.bf16.mxu0 %v6232_v20 }
 0x414   :  { %4317 = vmatpush3.bf16.msra.mxu0 %v6237_v11 }
 0x415   :  { %4319 = vmatprep.subr.bf16.mxu0 %v6260_v50 }
 0x418   :  { %4321 = vmatpush3.bf16.msra.mxu0 %v6273_v14 }
 0x419   :  { %4323 = vmatprep.subr.bf16.mxu0 %v6275_v24 }
 0x4a3   :  { %v2666_v37 = vpop.f32.mrb[8].mxu1 }
 0x4a4   :  { %v2668_v22 = vpop.f32.mrb[9].mxu1  ;;  %v6279_v36 = vadd.f32 %v6241_v5, %v2666_v37 }
 0x4a5   :  { %v6244_v40 = vadd.f32 %v6241_v5, %v2668_v22 }
 0x4a7   :  { %v2672_v26 = vpop.f32.mrb[10].mxu1 }
 0x4a8   :  { %v2674_v27 = vpop.f32.mrb[11].mxu1  ;;  %v6297_v37 = vadd.f32 %v4442_v44, %v2672_v26 }
 0x4a9   :  { %v6258_v58 = vadd.f32 %v4442_v44, %v2674_v27 }
 0x4ab   :  { %v2678_v1 = vpop.f32.mrb[12].mxu1  ;;  %v4626_v29 = vpack.i.bf16 %v6258_v58, %v6279_v36 }
 0x4ac   :  { %v2680_v31 = vpop.f32.mrb[13].mxu1  ;;  %v6289_v15 = vadd.f32 %v4446_v61, %v2678_v1 }
 0x4ad   :  { %v6305_v42 = vadd.f32 %v4446_v61, %v2680_v31 }
 0x4af   :  { %v2684_v6 = vpop.f32.mrb[14].mxu1 }
 0x4b0   :  { %v2686_v18 = vpop.f32.mrb[15].mxu1  ;;  %v6319_v59 = vadd.f32 %v4450_v48, %v2684_v6 }
 0x4b1   :  { %v6286_v39 = vadd.f32 %v4450_v48, %v2686_v18 }
 0x4b3   :  { %v2755_v23 = vpop.f32.mrb[16].mxu1  ;;  %v4636_v10 = vpack.i.bf16 %v6286_v39, %v6289_v15 }
 0x4b4   :  { %v6247_v54 = vadd.f32 %v6241_v5, %v2755_v23  ;;  %v2757_v55 = vpop.f32.mrb[17].mxu1 }
 0x4b5   :  { %v6332_v47 = vadd.f32 %v6241_v5, %v2757_v55 }
 0x4b6   :  { %v4621_v56 = vpack.i.bf16 %v6247_v54, %v6244_v40 }
 0x4b7   :  { %v2761_v53 = vpop.f32.mrb[18].mxu1 }
 0x4b8   :  { %v2763_v17 = vpop.f32.mrb[19].mxu1  ;;  %4622 = vrot.lane.b32.xlu0 %v4621_v56, %s4775_s2  ;;  %4612 = vrot.lane.b32.xlu1 %v4621_v56, %s4773_s4  ;;  %v6295_v62 = vadd.f32 %v4442_v44, %v2761_v53 }
 0x4b9   :  { %v6327_v23 = vadd.f32 %v4442_v44, %v2763_v17 }
 0x4ba   :  { %v4646_v2 = vpack.i.bf16 %v6297_v37, %v6295_v62 }
 0x4bb   :  { %v2767_v3 = vpop.f32.mrb[20].mxu1 }
 0x4bc   :  { %v2769_v41 = vpop.f32.mrb[21].mxu1  ;;  %4627 = vrot.lane.b32.xlu0 %v4626_v29, %s4775_s2  ;;  %4617 = vrot.lane.b32.xlu1 %v4626_v29, %s4773_s4  ;;  %v6303_v27 = vadd.f32 %v4446_v61, %v2767_v3 }
 0x4bd   :  { %v6344_v56 = vadd.f32 %v4446_v61, %v2769_v41 }
 0x4be   :  { %v4656_v0 = vpack.i.bf16 %v6303_v27, %v6305_v42 }
 0x4bf   :  { %v2773_v52 = vpop.f32.mrb[22].mxu1  ;;  %6999 = vst [vmem:[#allocation3_spill] sm:$0xff] %v6344_v56 }
 0x4c0   :  { %v2775_v22 = vpop.f32.mrb[23].mxu1  ;;  %4637 = vrot.lane.b32.xlu0 %v4636_v10, %s4775_s2  ;;  %4632 = vrot.lane.b32.xlu1 %v4636_v10, %s4773_s4  ;;  %v6317_v38 = vadd.f32 %v4450_v48, %v2773_v52 }
 0x4c1   :  { %v6342_v21 = vadd.f32 %v4450_v48, %v2775_v22 }
 0x4c2   :  { %v4671_v13 = vpack.i.bf16 %v6319_v59, %v6317_v38 }
 0x4c3   :  { %v2844_v51 = vpop.f32.mrb[24].mxu1  ;;  %6998 = vst [vmem:[#allocation2_spill] sm:$0xff] %v6342_v21  ;;  %v4686_v53 = vpack.i.bf16 %v6342_v21, %v6344_v56 }
 0x4c4   :  { %v6308_v1 = vadd.f32 %v6241_v5, %v2844_v51  ;;  %v2846_v45 = vpop.f32.mrb[25].mxu1  ;;  %4647 = vrot.lane.b32.xlu0 %v4646_v2, %s4775_s2  ;;  %4642 = vrot.lane.b32.xlu1 %v4646_v2, %s4773_s4 }
 0x4c5   :  { %v6313_v26 = vadd.f32 %v6241_v5, %v2846_v45 }
 0x4c7   :  { %v2850_v28 = vpop.f32.mrb[26].mxu1 }
 0x4c8   :  { %v6321_v31 = vadd.f32 %v4442_v44, %v2850_v28  ;;  %v2852_v18 = vpop.f32.mrb[27].mxu1  ;;  %4657 = vrot.lane.b32.xlu0 %v4656_v0, %s4775_s2  ;;  %4652 = vrot.lane.b32.xlu1 %v4656_v0, %s4773_s4 }
 0x4c9   :  { %v6325_v19 = vadd.f32 %v4442_v44, %v2852_v18  ;;  %v4676_v44 = vpack.i.bf16 %v6327_v23, %v6332_v47 }
 0x4cb   :  { %v2856_v34 = vpop.f32.mrb[28].mxu1 }
 0x4cc   :  { %v6334_v6 = vadd.f32 %v4446_v61, %v2856_v34  ;;  %v2858_v25 = vpop.f32.mrb[29].mxu1  ;;  %4672 = vrot.lane.b32.xlu0 %v4671_v13, %s4775_s2  ;;  %4662 = vrot.lane.b32.xlu1 %v4671_v13, %s4773_s4  ;;  %v3118_v34 = vld [vmem:[%s6939_s17 + $0x110] sm:$0xff] }
 0x4cd   :  { %v6338_v9 = vadd.f32 %v4446_v61, %v2858_v25  ;;  %v3119_v25 = vld [vmem:[%s6939_s17 + $0x118] sm:$0xff] }
 0x4cf   :  { %v2862_v8 = vpop.f32.mrb[30].mxu1 }
 0x4d0   :  { %v6346_v57 = vadd.f32 %v4450_v48, %v2862_v8  ;;  %v2864_v5 = vpop.f32.mrb[31].mxu1  ;;  %4677 = vrot.lane.b32.xlu0 %v4676_v44, %s4775_s2  ;;  %4667 = vrot.lane.b32.xlu1 %v4676_v44, %s4773_s4 }
 0x4d1   :  { %v6350_v55 = vadd.f32 %v4450_v48, %v2864_v5 }
 0x4d4   :  { %4687 = vrot.lane.b32.xlu0 %v4686_v53, %s4775_s2  ;;  %4682 = vrot.lane.b32.xlu1 %v4686_v53, %s4773_s4  ;;  %v6399_v53 = vpack.c.bf16 %v3119_v25, %v3118_v34 }
 0x4d6   :  { %7004 = vst [vmem:[#allocation8_spill] sm:$0xff] %v6399_v53 }
 0x52a   :  { %v6357_v17 = vpop.permute.xlu0 %4622  ;;  %v6359_v61 = vpop.permute.xlu1 %4612 }
 0x52b   :  { %v6959_v29 = vunpack.i.h.bf16 %v6357_v17  ;;  %v4624_v3 = vunpack.i.l.bf16 %v6357_v17  ;;  %v6958_v48 = vunpack.i.h.bf16 %v6359_v61  ;;  %v4614_v41 = vunpack.i.l.bf16 %v6359_v61 }
 0x52d   :  { %v3024_v10 = vsel %vm3011_vm4, %v4624_v3, %v6959_v29  ;;  %v2951_v52 = vsel %vm179_vm2, %v4614_v41, %v6958_v48 }
 0x52e   :  { %v6373_v22 = vpop.permute.xlu0 %4627  ;;  %v6375_v2 = vpop.permute.xlu1 %4617  ;;  %v3037_v51 = vmax.f32 %v2951_v52, %v3024_v10 }
 0x52f   :  { %7000 = vst [vmem:[#allocation4_spill] sm:$0xff] %v6373_v22  ;;  %7001 = vst [vmem:[#allocation5_spill] sm:$0xff] %v6375_v2  ;;  %v6953_v45 = vunpack.i.l.bf16 %v6373_v22  ;;  %v6955_v0 = vunpack.i.l.bf16 %v6375_v2  ;;  %v4630_v10 = vunpack.i.h.bf16 %v6373_v22  ;;  %v4620_v52 = vunpack.i.h.bf16 %v6375_v2 }
 0x530   :  { %v3061_v28 = vmax.f32 %v6244_v40, %v3037_v51 }
 0x531   :  { %v3028_v18 = vsel %vm3011_vm4, %v6953_v45, %v4624_v3  ;;  %v2955_v13 = vsel %vm179_vm2, %v6955_v0, %v4614_v41  ;;  %v3120_v3 = vld [vmem:[%s6939_s17 + $0x120] sm:$0xff]  ;;  %v3121_v41 = vld [vmem:[%s6939_s17 + $0x128] sm:$0xff] }
 0x532   :  { %v3036_v44 = vmax.f32 %v2955_v13, %v3028_v18  ;;  %v6394_v40 = vpop.permute.xlu0 %4637  ;;  %v6396_v8 = vpop.permute.xlu1 %4632  ;;  %3196 = vmatprep.mubr.f32.mxu0 %v3061_v28  ;;  %v6419_v25 = vpack.c.bf16 %v3121_v41, %v3120_v3  ;;  %v3122_v41 = vld [vmem:[%s6939_s17 + $0x130] sm:$0xff] }
 0x533   :  { %7002 = vst [vmem:[#allocation6_spill] sm:$0xff] %v6394_v40  ;;  %7003 = vst [vmem:[#allocation7_spill] sm:$0xff] %v6396_v8 }
 0x534   :  { %v3060_v5 = vmax.f32 %v6279_v36, %v3036_v44 }
 0x536   :  { %v6409_v51 = vpop.permute.xlu0 %4647  ;;  %v6411_v18 = vpop.permute.xlu1 %4642  ;;  %3197 = vmatmul.mubr.f32.vlgmr.msra.gmra.mrb[18].mxu0 %v3060_v5 }
 0x537   :  { %v6954_v36 = vunpack.i.h.bf16 %v6409_v51  ;;  %v6956_v28 = vunpack.i.l.bf16 %v6409_v51  ;;  %v6960_v13 = vunpack.i.h.bf16 %v6411_v18  ;;  %v6957_v34 = vunpack.i.l.bf16 %v6411_v18  ;;  %4325 = vmatpush3.bf16.msra.mxu0 %v6275_v24 }
 0x538   :  { %4327 = vmatprep.subr.bf16.mxu0 %v6399_v53 }
 0x539   :  { %v3029_v44 = vsel %vm3011_vm4, %v6954_v36, %v4630_v10  ;;  %v3025_v5 = vsel %vm3011_vm4, %v4630_v10, %v6956_v28  ;;  %v2952_v45 = vsel %vm179_vm2, %v4620_v52, %v6957_v34  ;;  %v2956_v3 = vsel %vm179_vm2, %v6960_v13, %v4620_v52  ;;  %v3123_v36 = vld [vmem:[%s6939_s17 + $0x138] sm:$0xff] }
 0x53a   :  { %v6445_v28 = vpop.permute.xlu0 %4657  ;;  %v6447_v34 = vpop.permute.xlu1 %4652  ;;  %v3043_v48 = vmax.f32 %v2952_v45, %v3025_v5  ;;  %v3042_v29 = vmax.f32 %v2956_v3, %v3029_v44  ;;  %v6457_v22 = vpack.c.bf16 %v3123_v36, %v3122_v41  ;;  %v7005_v44 = vunpack.i.l.bf16 %v6394_v40 }
 0x53b   :  { %v6965_v52 = vunpack.i.h.bf16 %v6445_v28  ;;  %v4659_v13 = vunpack.i.l.bf16 %v6445_v28  ;;  %v6964_v21 = vunpack.i.h.bf16 %v6447_v34  ;;  %v4654_v56 = vunpack.i.l.bf16 %v6447_v34  ;;  %4329 = vmatpush3.bf16.msra.mxu0 %v6399_v53 }
 0x53c   :  { %4331 = vmatprep.subr.bf16.mxu0 %v6419_v25  ;;  %v3067_v0 = vmax.f32 %v6258_v58, %v3043_v48  ;;  %v3066_v10 = vmax.f32 %v6297_v37, %v3042_v29  ;;  %v7006_v58 = vunpack.i.l.bf16 %v6396_v8  ;;  %v3124_v29 = vld [vmem:[%s6939_s17 + $0x140] sm:$0xff]  ;;  %v3125_v48 = vld [vmem:[%s6939_s17 + $0x148] sm:$0xff]  ;;  %v4640_v36 = vunpack.i.h.bf16 %v6394_v40 }
 0x53d   :  { %v3026_v45 = vsel %vm3011_vm4, %v4659_v13, %v6965_v52  ;;  %v3030_v5 = vsel %vm3011_vm4, %v7005_v44, %v4659_v13  ;;  %v2953_v3 = vsel %vm179_vm2, %v4654_v56, %v6964_v21  ;;  %v4635_v13 = vunpack.i.h.bf16 %v6396_v8 }
 0x53e   :  { %v2957_v37 = vsel %vm179_vm2, %v7006_v58, %v4654_v56  ;;  %v6483_v41 = vpop.permute.xlu0 %4672  ;;  %v6485_v44 = vpop.permute.xlu1 %4662  ;;  %3201 = vmatprep.mubr.f32.mxu0 %v3067_v0  ;;  %v3049_v21 = vmax.f32 %v2953_v3, %v3026_v45  ;;  %v6495_v0 = vpack.c.bf16 %v3125_v48, %v3124_v29 }
 0x53f   :  { %v3048_v52 = vmax.f32 %v2957_v37, %v3030_v5  ;;  %v6972_v56 = vunpack.i.h.bf16 %v6483_v41  ;;  %v4674_v58 = vunpack.i.l.bf16 %v6483_v41  ;;  %v6971_v2 = vunpack.i.h.bf16 %v6485_v44  ;;  %4333 = vmatpush3.bf16.msra.mxu0 %v6419_v25 }
 0x540   :  { %v4664_v53 = vunpack.i.l.bf16 %v6485_v44  ;;  %3202 = vmatmul.mubr.f32.gmra.mrb[20].mxu0 %v3066_v10  ;;  %4335 = vmatprep.subr.bf16.mxu0 %v6457_v22  ;;  %v3073_v8 = vmax.f32 %v6305_v42, %v3049_v21  ;;  %v3127_v21 = vld [vmem:[%s6939_s17 + $0x158] sm:$0xff] }
 0x541   :  { %v3072_v40 = vmax.f32 %v6289_v15, %v3048_v52  ;;  %v3031_v45 = vsel %vm3011_vm4, %v6972_v56, %v4640_v36  ;;  %v3027_v5 = vsel %vm3011_vm4, %v4640_v36, %v4674_v58  ;;  %v2958_v42 = vsel %vm179_vm2, %v6971_v2, %v4635_v13  ;;  %v3126_v15 = vld [vmem:[%s6939_s17 + $0x150] sm:$0xff] }
 0x542   :  { %v2954_v3 = vsel %vm179_vm2, %v4635_v13, %v4664_v53  ;;  %v6515_v10 = vpop.permute.xlu0 %4677  ;;  %v6517_v52 = vpop.permute.xlu1 %4667  ;;  %3206 = vmatprep.mubr.f32.mxu0 %v3073_v8  ;;  %v3054_v29 = vmax.f32 %v2958_v42, %v3031_v45  ;;  %v6525_v56 = vpack.c.bf16 %v3127_v21, %v3126_v15  ;;  %v7007_v8 = vunpack.i.h.bf16 %v6357_v17 }
 0x543   :  { %v3055_v37 = vmax.f32 %v2954_v3, %v3027_v5  ;;  %v6978_v48 = vunpack.i.l.bf16 %v6515_v10  ;;  %v6980_v36 = vunpack.i.l.bf16 %v6517_v52  ;;  %4337 = vmatpush3.bf16.msra.mxu0 %v6457_v22  ;;  %v7008_v5 = vunpack.i.h.bf16 %v6359_v61 }
 0x544   :  { %3207 = vmatmul.mubr.f32.gmra.mrb[22].mxu0 %v3072_v40  ;;  %4339 = vmatprep.subr.bf16.mxu0 %v6495_v0  ;;  %v3078_v2 = vmax.f32 %v6319_v59, %v3054_v29  ;;  %v3129_v59 = vld [vmem:[%s6939_s17 + $0x168] sm:$0xff]  ;;  %v6977_v21 = vunpack.i.h.bf16 %v6515_v10  ;;  %v3130_v29 = vld [vmem:[%s6939_s17 + $0x170] sm:$0xff] }
 0x545   :  { %v3079_v13 = vmax.f32 %v6286_v39, %v3055_v37  ;;  %v3020_v45 = vsel %vm3011_vm4, %v7007_v8, %v6978_v48  ;;  %v2947_v40 = vsel %vm179_vm2, %v7008_v5, %v6980_v36  ;;  %v3128_v39 = vld [vmem:[%s6939_s17 + $0x160] sm:$0xff]  ;;  %v6976_v37 = vunpack.i.h.bf16 %v6517_v52 }
 0x546   :  { %v3038_v17 = vmax.f32 %v2947_v40, %v3020_v45  ;;  %v6545_v3 = vpop.permute.xlu0 %4687  ;;  %v6547_v42 = vpop.permute.xlu1 %4682  ;;  %v6552_v15 = vpack.c.bf16 %v3129_v59, %v3128_v39  ;;  %v7009_v45 = vunpack.i.l.bf16 %v6409_v51  ;;  %v7010_v40 = vunpack.i.l.bf16 %v6411_v18 }
 0x547   :  { %3211 = vmatprep.mubr.f32.mxu0 %v3079_v13  ;;  %4341 = vmatpush3.bf16.msra.mxu0 %v6495_v0  ;;  %v3131_v13 = vld [vmem:[%s6939_s17 + $0x178] sm:$0xff]  ;;  %v6974_v8 = vunpack.i.l.bf16 %v6547_v42  ;;  %v6975_v59 = vunpack.i.h.bf16 %v6545_v3 }
 0x548   :  { %3212 = vmatmul.mubr.f32.gmra.mrb[24].mxu0 %v3078_v2  ;;  %4343 = vmatprep.subr.bf16.mxu0 %v6525_v56  ;;  %v3062_v61 = vmax.f32 %v6247_v54, %v3038_v17  ;;  %v6973_v2 = vunpack.i.l.bf16 %v6545_v3  ;;  %v6566_v54 = vpack.c.bf16 %v3131_v13, %v3130_v29  ;;  %v3021_v5 = vsel %vm3011_vm4, %v7009_v45, %v6977_v21 }
 0x549   :  { %v2948_v39 = vsel %vm179_vm2, %v7010_v40, %v6976_v37  ;;  %v6979_v17 = vunpack.i.h.bf16 %v6547_v42  ;;  %v7012_v13 = vunpack.i.h.bf16 %v6447_v34 }
 0x54a   :  { %4098 = vmatprep.mubr.f32.mxu0 %v3062_v61  ;;  %v7011_v61 = vunpack.i.h.bf16 %v6445_v28  ;;  %v3044_v40 = vmax.f32 %v2948_v39, %v3021_v5  ;;  %v3023_v28 = vsel %vm3011_vm4, %v4674_v58, %v6975_v59 }
 0x54b   :  { %4345 = vmatpush3.bf16.msra.mxu0 %v6525_v56  ;;  %v2949_v45 = vsel %vm179_vm2, %v7012_v13, %v6974_v8 }
 0x54c   :  { %4347 = vmatprep.subr.bf16.mxu0 %v6552_v15  ;;  %v3022_v29 = vsel %vm3011_vm4, %v7011_v61, %v6973_v2  ;;  %v2950_v61 = vsel %vm179_vm2, %v4664_v53, %v6979_v17  ;;  %v3068_v34 = vmax.f32 %v6295_v62, %v3044_v40 }
 0x54d   :  { %v3050_v2 = vmax.f32 %v2949_v45, %v3022_v29  ;;  %v3056_v13 = vmax.f32 %v2950_v61, %v3023_v28  ;;  %v4721_v61 = vpack.i.bf16 %v6350_v55, %v6346_v57 }
 0x54f   :  { %4349 = vmatpush3.bf16.msra.mxu0 %v6552_v15  ;;  %v3074_v5 = vmax.f32 %v6303_v27, %v3050_v2  ;;  %v3080_v39 = vmax.f32 %v6317_v38, %v3056_v13 }
 0x550   :  { %4351 = vmatprep.subr.bf16.mxu0 %v6566_v54 }
 0x553   :  { %4353 = vmatpush3.bf16.msra.mxu0 %v6566_v54 }
 0x556   :  { %4099 = vmatmul.mubr.f32.vlgmr.msra.gmra.mrb[26].mxu0 %v3068_v34 }
 0x557   :  { %4101 = vmatprep.mubr.f32.mxu0 %v3074_v5 }
 0x55a   :  { %4102 = vmatmul.mubr.f32.gmra.mrb[28].mxu0 %v3080_v39 }
 0x609   :  { %v3954_v8 = vpop.f32.mrb[18].mxu0 }
 0x60a   :  { %v3955_v58 = vpop.f32.mrb[19].mxu0 }
 0x60b   :  { %v3956_v59 = vadd.f32 %v3955_v58, %v3954_v8 }
 0x613   :  { %v3957_v37 = vpop.f32.mrb[20].mxu0 }
 0x614   :  { %v3958_v21 = vpop.f32.mrb[21].mxu0 }
 0x615   :  { %v3959_v48 = vadd.f32 %v3958_v21, %v3957_v37 }
 0x617   :  { %v3960_v53 = vpop.f32.mrb[22].mxu0 }
 0x618   :  { %v3961_v29 = vpop.f32.mrb[23].mxu0 }
 0x619   :  { %v3962_v45 = vadd.f32 %v3961_v29, %v3960_v53 }
 0x61b   :  { %v3963_v17 = vpop.f32.mrb[24].mxu0 }
 0x61c   :  { %v3964_v36 = vpop.f32.mrb[25].mxu0 }
 0x61d   :  { %v3965_v62 = vadd.f32 %v3964_v36, %v3963_v17  ;;  %v4701_v36 = vpack.i.bf16 %v6325_v19, %v6321_v31  ;;  %v6633_v17 = vld [vmem:[%s6940_s15] sm:$0xff] }
 0x61e   :  { %4112 = vmatprep.mubr.msk.f32.mxu0 %vm1646_vm3, %v6633_v17 }
 0x629   :  { %v4100_v40 = vpop.f32.mrb[26].mxu0 }
 0x62a   :  { %v6608_v28 = vadd.f32 %v4100_v40, %v3959_v48  ;;  %v3283_v27 = vpop.f32.mrb[27].mxu0  ;;  %v4696_v48 = vpack.i.bf16 %v6313_v26, %v6308_v1 }
 0x62b   :  { %v6610_v2 = vadd.f32 %v3956_v59, %v3283_v27  ;;  %v4711_v59 = vpack.i.bf16 %v6338_v9, %v6334_v6 }
 0x62c   :  { %3304 = vadd.xlane.f32.xlu0 %v6608_v28 }
 0x62d   :  { %v4103_v38 = vpop.f32.mrb[28].mxu0  ;;  %3302 = vadd.xlane.f32.xlu1 %v6610_v2 }
 0x62e   :  { %v6614_v8 = vadd.f32 %v4103_v38, %v3965_v62  ;;  %v3293_v21 = vpop.f32.mrb[29].mxu0 }
 0x62f   :  { %v6616_v37 = vadd.f32 %v3962_v45, %v3293_v21 }
 0x631   :  { %3306 = vadd.xlane.f32.xlu0 %v6616_v37  ;;  %3308 = vadd.xlane.f32.xlu1 %v6614_v8 }
 0x642   :  { %4697 = vrot.lane.b32.xlu1 %v4696_v48, %s4775_s2 }
 0x646   :  { %4702 = vrot.lane.b32.xlu1 %v4701_v36, %s4773_s4 }
 0x647   :  { %4692 = vrot.lane.b32.xlu0 %v4696_v48, %s4773_s4 }
 0x64a   :  { %4712 = vrot.lane.b32.xlu1 %v4711_v59, %s4773_s4 }
 0x64b   :  { %4707 = vrot.lane.b32.xlu0 %v4701_v36, %s4775_s2 }
 0x64e   :  { %4722 = vrot.lane.b32.xlu1 %v4721_v61, %s4773_s4 }
 0x64f   :  { %4717 = vrot.lane.b32.xlu0 %v4711_v59, %s4775_s2 }
 0x653   :  { %4727 = vrot.lane.b32.xlu0 %v4721_v61, %s4775_s2  ;;  %v6654_v61 = vld [vmem:[%s6940_s15 + $0x8] sm:$0xff] }
 0x6b9   :  { %v3305_v34 = vpop.xlane.xlu0 %3304 }
 0x6ba   :  { %v3311_v13 = vmul.f32 0.0078125, %v3305_v34  ;;  %v3303_v5 = vpop.xlane.xlu1 %3302 }
 0x6bb   :  { %v3310_v39 = vmul.f32 0.0078125, %v3303_v5 }
 0x6bd   :  { %v4354_v58 = vpack.c.bf16 %v3311_v13, %v3310_v39  ;;  %v6664_v13 = vld [vmem:[%s6940_s15 + $0x10] sm:$0xff] }
 0x6be   :  { %v3307_v53 = vpop.xlane.xlu0 %3306  ;;  %v3309_v29 = vpop.xlane.xlu1 %3308 }
 0x6bf   :  { %v3312_v45 = vmul.f32 0.0078125, %v3307_v53  ;;  %v3313_v62 = vmul.f32 0.0078125, %v3309_v29  ;;  %4355 = vmatprep.subr.bf16.mxu0 %v4354_v58 }
 0x6c0   :  { %4357 = vmatpush3.bf16.msra.mxu0 %v4354_v58 }
 0x6c1   :  { %v4358_v40 = vpack.c.bf16 %v3313_v62, %v3312_v45 }
 0x6c2   :  { %v6643_v27 = vpop.permute.xlu0 %4692  ;;  %v6645_v38 = vpop.permute.xlu1 %4697 }
 0x6c3   :  { %v4695_v21 = vunpack.i.h.bf16 %v6643_v27  ;;  %v4694_v48 = vunpack.i.l.bf16 %v6643_v27  ;;  %v4700_v36 = vunpack.i.h.bf16 %v6645_v38  ;;  %v4699_v59 = vunpack.i.l.bf16 %v6645_v38  ;;  %4359 = vmatprep.subr.bf16.mxu0 %v4358_v40  ;;  %v7027_v38 = vld [vmem:[#allocation2_spill] sm:$0xff] }
 0x6c4   :  { %4361 = vmatpush3.bf16.msra.mxu0 %v4358_v40 }
 0x6c5   :  { %v2939_v34 = vsel %vm179_vm2, %v4694_v48, %v4695_v21  ;;  %4363 = vmatprep.subr.bf16.mxu0 %v6124_v49  ;;  %v3012_v5 = vsel %vm3011_vm4, %v4699_v59, %v4700_v36  ;;  %v6678_v49 = vld [vmem:[%s6940_s15 + $0x18] sm:$0xff] }
 0x6c6   :  { %v3040_v39 = vmax.f32 %v2939_v34, %v3012_v5  ;;  %v6690_v53 = vpop.permute.xlu1 %4702  ;;  %v7015_v5 = vunpack.i.h.bf16 %v6515_v10 }
 0x6c7   :  { %4113 = vmatmul.mubr.msk.f32.vlgmr.msra.gmra.mrb[30].mxu0 %vm1646_vm3, %v6654_v61 }
 0x6c8   :  { %4365 = vmatpush3.bf16.msra.mxu0 %v6135_v32  ;;  %4115 = vmatprep.mubr.msk.f32.mxu0 %vm1646_vm3, %v6664_v13  ;;  %v3064_v58 = vmax.f32 %v6308_v1, %v3040_v39  ;;  %v6688_v32 = vpop.permute.xlu0 %4707  ;;  %v4704_v1 = vunpack.i.l.bf16 %v6690_v53 }
 0x6c9   :  { %4367 = vmatprep.subr.bf16.mxu0 %v6137_v46 }
 0x6cb   :  { %4116 = vmatmul.mubr.msk.f32.gmra.mrb[32].mxu0 %vm1646_vm3, %v6678_v49 }
 0x6cc   :  { %4369 = vmatpush3.bf16.msra.mxu0 %v6153_v12  ;;  %3539 = vmatprep.mubr.f32.mxu0 %v3064_v58  ;;  %v6696_v46 = vpop.permute.xlu0 %4717  ;;  %v6698_v12 = vpop.permute.xlu1 %4712  ;;  %v7016_v58 = vunpack.i.h.bf16 %v6517_v52 }
 0x6cd   :  { %4371 = vmatprep.subr.bf16.mxu0 %v6156_v63  ;;  %v4710_v63 = vunpack.i.h.bf16 %v6688_v32  ;;  %v4720_v29 = vunpack.i.h.bf16 %v6696_v46  ;;  %v4719_v45 = vunpack.i.l.bf16 %v6696_v46  ;;  %v4715_v62 = vunpack.i.h.bf16 %v6698_v12 }
 0x6d0   :  { %4373 = vmatpush3.bf16.msra.mxu0 %v6171_v35  ;;  %v4709_v35 = vunpack.i.l.bf16 %v6688_v32 }
 0x6d1   :  { %4375 = vmatprep.subr.bf16.mxu0 %v6174_v16  ;;  %v4705_v16 = vunpack.i.h.bf16 %v6690_v53  ;;  %v7034_v53 = vunpack.i.h.bf16 %v6483_v41 }
 0x6d2   :  { %v3013_v40 = vsel %vm3011_vm4, %v4709_v35, %v4710_v63  ;;  %v3017_v39 = vsel %vm3011_vm4, %v7015_v5, %v4709_v35  ;;  %v7017_v5 = vunpack.i.l.bf16 %v6545_v3 }
 0x6d4   :  { %4377 = vmatpush3.bf16.msra.mxu0 %v6189_v43  ;;  %v7013_v43 = vunpack.i.l.bf16 %v6517_v52 }
 0x6d5   :  { %4379 = vmatprep.subr.bf16.mxu0 %v6192_v33 }
 0x6d6   :  { %v2943_v33 = vsel %vm179_vm2, %v7013_v43, %v4694_v48  ;;  %v2940_v48 = vsel %vm179_vm2, %v4704_v1, %v4705_v16  ;;  %v2944_v43 = vsel %vm179_vm2, %v7016_v58, %v4704_v1 }
 0x6d8   :  { %4381 = vmatpush3.bf16.msra.mxu0 %v6207_v60  ;;  %v7014_v60 = vunpack.i.l.bf16 %v6515_v10  ;;  %v3046_v10 = vmax.f32 %v2940_v48, %v3013_v40  ;;  %v3018_v40 = vsel %vm3011_vm4, %v7017_v5, %v4719_v45  ;;  %v7018_v48 = vunpack.i.l.bf16 %v6547_v42 }
 0x6d9   :  { %4383 = vmatprep.subr.bf16.mxu0 %v6210_v7 }
 0x6da   :  { %v3016_v7 = vsel %vm3011_vm4, %v7014_v60, %v4699_v59  ;;  %v6726_v59 = vpop.permute.xlu0 %4727  ;;  %v3014_v60 = vsel %vm3011_vm4, %v4719_v45, %v4720_v29  ;;  %v3070_v58 = vmax.f32 %v6321_v31, %v3046_v10 }
 0x6db   :  { %v3039_v34 = vmax.f32 %v2943_v33, %v3016_v7  ;;  %v4730_v35 = vunpack.i.h.bf16 %v6726_v59  ;;  %v3045_v7 = vmax.f32 %v2944_v43, %v3017_v39  ;;  %v7021_v43 = vunpack.i.h.bf16 %v6547_v42 }
 0x6dc   :  { %4385 = vmatpush3.bf16.msra.mxu0 %v6219_v4  ;;  %v4714_v4 = vunpack.i.l.bf16 %v6698_v12 }
 0x6dd   :  { %4387 = vmatprep.subr.bf16.mxu0 %v6232_v20  ;;  %v6728_v20 = vpop.permute.xlu1 %4722  ;;  %v3063_v1 = vmax.f32 %v6332_v47, %v3039_v34  ;;  %v3069_v45 = vmax.f32 %v6327_v23, %v3045_v7  ;;  %v7019_v34 = vld [vmem:[#allocation8_spill] sm:$0xff]  ;;  %v3035_v46 = vsel %vm3011_vm4, %v4730_v35, %v7034_v53 }
 0x6de   :  { %v4725_v52 = vunpack.i.h.bf16 %v6728_v20  ;;  %v4724_v33 = vunpack.i.l.bf16 %v6728_v20  ;;  %v7024_v7 = vld [vmem:[#allocation4_spill] sm:$0xff] }
 0x6e0   :  { %4389 = vmatpush3.bf16.msra.mxu0 %v6237_v11  ;;  %v2941_v11 = vsel %vm179_vm2, %v4714_v4, %v4715_v62  ;;  %v2942_v47 = vsel %vm179_vm2, %v4724_v33, %v4725_v52 }
 0x6e1   :  { %4391 = vmatprep.subr.bf16.mxu0 %v6260_v50  ;;  %v4729_v50 = vunpack.i.l.bf16 %v6726_v59  ;;  %v2945_v59 = vsel %vm179_vm2, %v7018_v48, %v4714_v4  ;;  %v3052_v20 = vmax.f32 %v2941_v11, %v3014_v60  ;;  %v7020_v4 = vunpack.i.h.bf16 %v6545_v3 }
 0x6e2   :  { %v3051_v39 = vmax.f32 %v2945_v59, %v3018_v40  ;;  %v2946_v60 = vsel %vm179_vm2, %v7021_v43, %v4724_v33  ;;  %v7025_v3 = vunpack.i.l.bf16 %v7024_v7  ;;  %v6860_v43 = vld [vmem:[%s6941_s16] sm:$0xff] }
 0x6e3   :  { %v3019_v31 = vsel %vm3011_vm4, %v7020_v4, %v4729_v50  ;;  %v3076_v11 = vmax.f32 %v6334_v6, %v3052_v20  ;;  %v7026_v6 = vld [vmem:[#allocation3_spill] sm:$0xff] }
 0x6e4   :  { %4393 = vmatpush3.bf16.msra.mxu0 %v6273_v14  ;;  %v3015_v14 = vsel %vm3011_vm4, %v4729_v50, %v4730_v35  ;;  %v3032_v42 = vsel %vm3011_vm4, %v4700_v36, %v7025_v3  ;;  %v3075_v50 = vmax.f32 %v7026_v6, %v3051_v39  ;;  %v3057_v33 = vmax.f32 %v2946_v60, %v3019_v31  ;;  %v6855_v31 = vld [vmem:[%s6941_s16 + $0x10] sm:$0xff] }
 0x6e5   :  { %4395 = vmatprep.subr.bf16.mxu0 %v6275_v24  ;;  %v3058_v10 = vmax.f32 %v2942_v47, %v3015_v14 }
 0x6e7   :  { %3540 = vmatmul.mubr.f32.vlgmr.msra.gmra.mrb[34].mxu0 %v3063_v1  ;;  %v7022_v1 = vld [vmem:[#allocation5_spill] sm:$0xff]  ;;  %v3082_v27 = vmax.f32 %v6346_v57, %v3058_v10  ;;  %v7028_v57 = vunpack.i.h.bf16 %v6409_v51  ;;  %v7032_v51 = vld [vmem:[#allocation7_spill] sm:$0xff] }
 0x6e8   :  { %3544 = vmatprep.mubr.f32.mxu0 %v3070_v58  ;;  %4397 = vmatpush3.bf16.msra.mxu0 %v6275_v24  ;;  %v7023_v24 = vunpack.i.l.bf16 %v7022_v1  ;;  %v7033_v48 = vunpack.i.l.bf16 %v7032_v51  ;;  %v6867_v1 = vld [vmem:[%s6941_s16 + $0x18] sm:$0xff] }
 0x6e9   :  { %4399 = vmatprep.subr.bf16.mxu0 %v7019_v34 }
 0x6ea   :  { %v2959_v23 = vsel %vm179_vm2, %v4695_v21, %v7023_v24  ;;  %v3081_v21 = vmax.f32 %v7027_v38, %v3057_v33  ;;  %v2961_v32 = vsel %vm179_vm2, %v4715_v62, %v7033_v48 }
 0x6eb   :  { %3545 = vmatmul.mubr.f32.gmra.mrb[36].mxu0 %v3069_v45  ;;  %v3041_v5 = vmax.f32 %v2959_v23, %v3032_v42 }
 0x6ec   :  { %3549 = vmatprep.mubr.f32.mxu0 %v3076_v11  ;;  %4401 = vmatpush3.bf16.msra.mxu0 %v7019_v34 }
 0x6ed   :  { %4403 = vmatprep.subr.bf16.mxu0 %v6419_v25  ;;  %v3065_v36 = vmax.f32 %v6313_v26, %v3041_v5  ;;  %v3033_v26 = vsel %vm3011_vm4, %v4710_v63, %v7028_v57  ;;  %v7035_v63 = vunpack.i.h.bf16 %v6485_v44 }
 0x6ef   :  { %3550 = vmatmul.mubr.f32.gmra.mrb[38].mxu0 %v3075_v50 }
 0x6f0   :  { %3554 = vmatprep.mubr.f32.mxu0 %v3082_v27  ;;  %4405 = vmatpush3.bf16.msra.mxu0 %v6419_v25 }
 0x6f1   :  { %4407 = vmatprep.subr.bf16.mxu0 %v6457_v22 }
 0x6f3   :  { %3555 = vmatmul.mubr.f32.gmra.mrb[40].mxu0 %v3081_v21 }
 0x6f4   :  { %4409 = vmatpush3.bf16.msra.mxu0 %v6457_v22  ;;  %4150 = vmatprep.mubr.f32.mxu0 %v3065_v36  ;;  %v7029_v22 = vunpack.i.h.bf16 %v6411_v18 }
 0x6f5   :  { %4411 = vmatprep.subr.bf16.mxu0 %v6495_v0 }
 0x6f6   :  { %v2960_v25 = vsel %vm179_vm2, %v4705_v16, %v7029_v22  ;;  %v2962_v16 = vsel %vm179_vm2, %v4725_v52, %v7035_v63 }
 0x6f7   :  { %v3047_v18 = vmax.f32 %v2960_v25, %v3033_v26  ;;  %v3059_v62 = vmax.f32 %v2962_v16, %v3035_v46 }
 0x6f8   :  { %4413 = vmatpush3.bf16.msra.mxu0 %v6495_v0  ;;  %v7030_v0 = vld [vmem:[#allocation6_spill] sm:$0xff] }
 0x6f9   :  { %4415 = vmatprep.subr.bf16.mxu0 %v6525_v56  ;;  %v7031_v40 = vunpack.i.l.bf16 %v7030_v0  ;;  %v3071_v12 = vmax.f32 %v6325_v19, %v3047_v18  ;;  %v3083_v41 = vmax.f32 %v6350_v55, %v3059_v62 }
 0x6fc   :  { %4417 = vmatpush3.bf16.msra.mxu0 %v6525_v56  ;;  %v3034_v56 = vsel %vm3011_vm4, %v4720_v29, %v7031_v40 }
 0x6fd   :  { %4419 = vmatprep.subr.bf16.mxu0 %v6552_v15  ;;  %v3053_v29 = vmax.f32 %v2961_v32, %v3034_v56 }
 0x700   :  { %4421 = vmatpush3.bf16.msra.mxu0 %v6552_v15  ;;  %v3077_v15 = vmax.f32 %v6338_v9, %v3053_v29 }
 0x701   :  { %4423 = vmatprep.subr.bf16.mxu0 %v6566_v54 }
 0x704   :  { %4425 = vmatpush3.bf16.msra.mxu0 %v6566_v54 }
 0x707   :  { %4151 = vmatmul.mubr.f32.vlgmr.msra.gmra.mrb[42].mxu0 %v3071_v12 }
 0x708   :  { %4153 = vmatprep.mubr.f32.mxu0 %v3077_v15 }
 0x70b   :  { %4154 = vmatmul.mubr.f32.gmra.mrb[44].mxu0 %v3083_v41 }
 0x70c   :  { %4164 = vmatprep.mubr.msk.f32.mxu0 %vm1646_vm3, %v6633_v17  ;;  %v6849_v17 = vld [vmem:[%s6941_s16 + $0x8] sm:$0xff] }
 0x79a   :  { %v4114_v44 = vpop.f32.mrb[30].mxu0 }
 0x79b   :  { %v3400_v35 = vpop.f32.mrb[31].mxu0  ;;  %v3406_v4 = vadd.f32 %v4114_v44, %v6849_v17 }
 0x79c   :  { %v3401_v10 = vadd.f32 %v3400_v35, %v6860_v43 }
 0x79d   :  { %v3911_v60 = vmul.f32 -1.442695, %v3406_v4 }
 0x79e   :  { %v4117_v30 = vpop.f32.mrb[32].mxu0  ;;  %v3910_v23 = vmul.f32 -1.442695, %v3401_v10 }
 0x79f   :  { %v3410_v52 = vpop.f32.mrb[33].mxu0  ;;  %4739 = vpow2.f32 %v3911_v60  ;;  %v3416_v7 = vadd.f32 %v4117_v30, %v6867_v1 }
 0x7a0   :  { %v3411_v11 = vadd.f32 %v3410_v52, %v6855_v31 }
 0x7a1   :  { %v3913_v50 = vmul.f32 -1.442695, %v3416_v7 }
 0x7a2   :  { %v3912_v24 = vmul.f32 -1.442695, %v3411_v11 }
 0x7a4   :  { %4741 = vpow2.f32 %v3912_v24 }
 0x7a5   :  { %4743 = vpow2.f32 %v3910_v23 }
 0x7a6   :  { %4745 = vpow2.f32 %v3913_v50 }
 0x7a9   :  { %v4740_v36 = vpop.eup %4739 }
 0x7aa   :  { %v3432_v57 = vadd.f32 1.0, %v4740_v36 }
 0x7ac   :  { %4747 = vrcp.f32 %v3432_v57 }
 0x7ae   :  { %v4742_v26 = vpop.eup %4741 }
 0x7af   :  { %v4744_v22 = vpop.eup %4743  ;;  %v3433_v25 = vadd.f32 1.0, %v4742_v26 }
 0x7b0   :  { %v3431_v0 = vadd.f32 1.0, %v4744_v22  ;;  %v4746_v40 = vpop.eup %4745 }
 0x7b1   :  { %4749 = vrcp.f32 %v3433_v25  ;;  %v3434_v56 = vadd.f32 1.0, %v4746_v40 }
 0x7b2   :  { %4751 = vrcp.f32 %v3431_v0 }
 0x7b3   :  { %4753 = vrcp.f32 %v3434_v56 }
 0x7b6   :  { %v4748_v51 = vpop.eup %4747 }
 0x7ba   :  { %v4026_v59 = vpop.f32.mrb[34].mxu0 }
 0x7bb   :  { %v4027_v58 = vpop.f32.mrb[35].mxu0  ;;  %v4750_v48 = vpop.eup %4749 }
 0x7bc   :  { %v4028_v54 = vadd.f32 %v4027_v58, %v4026_v59  ;;  %v4752_v32 = vpop.eup %4751 }
 0x7bd   :  { %v4754_v18 = vpop.eup %4753 }
 0x7be   :  { %v4029_v20 = vpop.f32.mrb[36].mxu0 }
 0x7bf   :  { %v4030_v19 = vpop.f32.mrb[37].mxu0 }
 0x7c0   :  { %v4031_v14 = vadd.f32 %v4030_v19, %v4029_v20 }
 0x7c2   :  { %v4032_v47 = vpop.f32.mrb[38].mxu0 }
 0x7c3   :  { %v4033_v9 = vpop.f32.mrb[39].mxu0 }
 0x7c4   :  { %v4034_v45 = vadd.f32 %v4033_v9, %v4032_v47 }
 0x7c6   :  { %v4035_v34 = vpop.f32.mrb[40].mxu0 }
 0x7c7   :  { %v4036_v39 = vpop.f32.mrb[41].mxu0 }
 0x7c8   :  { %v4037_v55 = vadd.f32 %v4036_v39, %v4035_v34 }
 0x7da   :  { %v4152_v3 = vpop.f32.mrb[42].mxu0 }
 0x7db   :  { %v6870_v42 = vadd.f32 %v4152_v3, %v4031_v14  ;;  %v3626_v6 = vpop.f32.mrb[43].mxu0 }
 0x7dc   :  { %v6872_v33 = vadd.f32 %v4028_v54, %v3626_v6 }
 0x7dd   :  { %3647 = vadd.xlane.f32.xlu0 %v6870_v42 }
 0x7de   :  { %v4155_v27 = vpop.f32.mrb[44].mxu0  ;;  %3645 = vadd.xlane.f32.xlu1 %v6872_v33 }
 0x7df   :  { %v6876_v5 = vadd.f32 %v4155_v27, %v4037_v55  ;;  %v3636_v38 = vpop.f32.mrb[45].mxu0 }
 0x7e0   :  { %v6878_v21 = vadd.f32 %v4034_v45, %v3636_v38 }
 0x7e2   :  { %3649 = vadd.xlane.f32.xlu0 %v6878_v21  ;;  %3651 = vadd.xlane.f32.xlu1 %v6876_v5 }
 0x7f3   :  { %3450 = vperm.xlu1 %4610, %v4748_v51  }
 0x7f7   :  { %3455 = vperm.xlu1 %4610, %v4750_v48  }
 0x7f8   :  { %3445 = vperm.xlu0 %4609, %v4752_v32  }
 0x7fc   :  { %3460 = vperm.xlu0 %4609, %v4754_v18  }
 0x86a   :  { %v3648_v53 = vpop.xlane.xlu0 %3647 }
 0x86b   :  { %v3654_v46 = vmul.f32 0.0078125, %v3648_v53  ;;  %v3646_v63 = vpop.xlane.xlu1 %3645 }
 0x86c   :  { %v3653_v16 = vmul.f32 0.0078125, %v3646_v63 }
 0x86e   :  { %v4426_v29 = vpack.c.bf16 %v3654_v46, %v3653_v16 }
 0x86f   :  { %v3650_v12 = vpop.xlane.xlu0 %3649  ;;  %v3652_v62 = vpop.xlane.xlu1 %3651 }
 0x870   :  { %v3655_v15 = vmul.f32 0.0078125, %v3650_v12  ;;  %v3656_v41 = vmul.f32 0.0078125, %v3652_v62  ;;  %4427 = vmatprep.subr.bf16.mxu0 %v4426_v29 }
 0x871   :  { %4429 = vmatpush3.bf16.msra.mxu0 %v4426_v29 }
 0x872   :  { %v4430_v44 = vpack.c.bf16 %v3656_v41, %v3655_v15 }
 0x873   :  { %v3451_v35 = vpop.permute.xlu1 %3450 }
 0x874   :  { %v3464_v30 = vmul.f32 %v3451_v35, %v6608_v28  ;;  %4431 = vmatprep.subr.bf16.mxu0 %v4430_v44 }
 0x875   :  { %4433 = vmatpush3.bf16.msra.mxu0 %v4430_v44 }
 0x876   :  { %v3468_v52 = vadd.f32 %v3464_v30, %v3451_v35 }
 0x877   :  { %v3446_v59 = vpop.permute.xlu0 %3445  ;;  %v3456_v58 = vpop.permute.xlu1 %3455 }
 0x878   :  { %3472 = vst [vmem:[%s6942_s18 + $0x10] sm:$0xff] %v3468_v52  ;;  %v3463_v54 = vmul.f32 %v3446_v59, %v6610_v2  ;;  %v3465_v20 = vmul.f32 %v3456_v58, %v6616_v37  ;;  %4165 = vmatmul.mubr.msk.f32.vlgmr.msra.gmra.mrb[46].mxu0 %vm1646_vm3, %v6654_v61 }
 0x879   :  { %4167 = vmatprep.mubr.msk.f32.mxu0 %vm1646_vm3, %v6664_v13 }
 0x87a   :  { %v3467_v28 = vadd.f32 %v3463_v54, %v3446_v59  ;;  %v3469_v19 = vadd.f32 %v3465_v20, %v3456_v58 }
 0x87b   :  { %v3461_v14 = vpop.permute.xlu0 %3460 }
 0x87c   :  { %3471 = vst [vmem:[%s6942_s18] sm:$0xff] %v3467_v28  ;;  %3473 = vst [vmem:[%s6942_s18 + $0x20] sm:$0xff] %v3469_v19  ;;  %v3466_v2 = vmul.f32 %v3461_v14, %v6614_v8  ;;  %4168 = vmatmul.mubr.msk.f32.gmra.mrb[48].mxu0 %vm1646_vm3, %v6678_v49 }
 0x87e   :  { %v3470_v37 = vadd.f32 %v3466_v2, %v3461_v14 }
 0x880   :  { %3474 = vst [vmem:[%s6942_s18 + $0x30] sm:$0xff] %v3470_v37 }
 0x94b   :  { %v4166_v61 = vpop.f32.mrb[46].mxu0 }
 0x94c   :  { %v3749_v13 = vadd.f32 %v4166_v61, %v6849_v17  ;;  %v3743_v47 = vpop.f32.mrb[47].mxu0 }
 0x94d   :  { %v3744_v9 = vadd.f32 %v3743_v47, %v6860_v43 }
 0x94e   :  { %v3919_v45 = vmul.f32 -1.442695, %v3749_v13 }
 0x94f   :  { %v3918_v34 = vmul.f32 -1.442695, %v3744_v9  ;;  %v4169_v39 = vpop.f32.mrb[48].mxu0 }
 0x950   :  { %4755 = vpow2.f32 %v3919_v45  ;;  %v3759_v8 = vadd.f32 %v4169_v39, %v6867_v1  ;;  %v3753_v55 = vpop.f32.mrb[49].mxu0 }
 0x951   :  { %4757 = vpow2.f32 %v3918_v34  ;;  %v3754_v49 = vadd.f32 %v3753_v55, %v6855_v31 }
 0x952   :  { %v3921_v4 = vmul.f32 -1.442695, %v3759_v8 }
 0x953   :  { %v3920_v60 = vmul.f32 -1.442695, %v3754_v49 }
 0x954   :  { %4759 = vpow2.f32 %v3921_v4 }
 0x955   :  { %4761 = vpow2.f32 %v3920_v60 }
 0x95a   :  { %v4756_v11 = vpop.eup %4755 }
 0x95b   :  { %v4758_v10 = vpop.eup %4757  ;;  %v3775_v17 = vadd.f32 1.0, %v4756_v11 }
 0x95c   :  { %v3774_v24 = vadd.f32 1.0, %v4758_v10 }
 0x95d   :  { %4763 = vrcp.f32 %v3775_v17 }
 0x95e   :  { %v4760_v43 = vpop.eup %4759  ;;  %4765 = vrcp.f32 %v3774_v24 }
 0x95f   :  { %v4762_v23 = vpop.eup %4761  ;;  %v3777_v7 = vadd.f32 1.0, %v4760_v43 }
 0x960   :  { %v3776_v3 = vadd.f32 1.0, %v4762_v23 }
 0x961   :  { %4767 = vrcp.f32 %v3777_v7 }
 0x962   :  { %4769 = vrcp.f32 %v3776_v3 }
 0x967   :  { %v4764_v1 = vpop.eup %4763 }
 0x968   :  { %v4766_v6 = vpop.eup %4765  ;;  %3793 = vperm.xlu0 %4609, %v4764_v1  }
 0x969   :  { %3788 = vperm.xlu1 %4610, %v4766_v6  }
 0x96b   :  { %v4768_v31 = vpop.eup %4767 }
 0x96c   :  { %v4770_v50 = vpop.eup %4769  ;;  %3803 = vperm.xlu0 %4609, %v4768_v31  }
 0x96d   :  { %3798 = vperm.xlu1 %4610, %v4770_v50  }
 0x9e7   :  { %v3794_v27 = vpop.permute.xlu0 %3793 }
 0x9e8   :  { %v3807_v38 = vmul.f32 %v3794_v27, %v6870_v42  ;;  %v3789_v36 = vpop.permute.xlu1 %3788 }
 0x9e9   :  { %v3806_v57 = vmul.f32 %v3789_v36, %v6872_v33 }
 0x9ea   :  { %v3811_v26 = vadd.f32 %v3807_v38, %v3794_v27 }
 0x9eb   :  { %v3810_v22 = vadd.f32 %v3806_v57, %v3789_v36  ;;  %v3804_v25 = vpop.permute.xlu0 %3803 }
 0x9ec   :  { %3815 = vst [vmem:[%s6942_s18 + $0x18] sm:$0xff] %v3811_v26  ;;  %v3809_v0 = vmul.f32 %v3804_v25, %v6876_v5  ;;  %v3799_v40 = vpop.permute.xlu1 %3798 }
 0x9ed   :  { %3814 = vst [vmem:[%s6942_s18 + $0x8] sm:$0xff] %v3810_v22  ;;  %v3808_v56 = vmul.f32 %v3799_v40, %v6878_v21 }
 0x9ee   :  { %v3813_v42 = vadd.f32 %v3809_v0, %v3804_v25 }
 0x9ef   :  { %v3812_v51 = vadd.f32 %v3808_v56, %v3799_v40 }
 0x9f0   :  { %3817 = vst [vmem:[%s6942_s18 + $0x38] sm:$0xff] %v3813_v42 }
 0x9f1   :  { %3816 = vst [vmem:[%s6942_s18 + $0x28] sm:$0xff] %v3812_v51 }

</bundles_post_ra>
